<compile_context>
chip_gen: v5e
topology: v5e:2x2
jax: 0.10.0
libtpu: 0.0.40
codegen_flags: <defaults>
</compile_context>

<pallas_src>
import functools

import jax
import jax.numpy as jnp
from jax import lax
from jax.experimental import pallas as pl
from jax.experimental.pallas import tpu as pltpu


def _spatial_attention_kernel(w_ref, x_ref, o_ref, *, ks, H, W):
    # w_ref : SMEM f32[2*ks*ks]  flattened OIHW conv1 weight (O=1 squeezed)
    # x_ref : VMEM (C, H*W)      one batch element, lane-dense
    # o_ref : VMEM (C, H*W)
    pad = ks // 2
    HW = H * W
    C = x_ref.shape[0]

    CH = 8                       # sublane-full channel chunk (f32 vreg height)
    n_full = C // CH
    rem = C % CH
    unroll = min(max(n_full, 1), 4)

    # ---- channel-wise mean / max (torch.mean / torch.max over dim=1) ----
    # Full-sublane (8, HW) chunks so every vld/vadd/vmax uses all 8 sublanes.
    if n_full > 0:
        def _reduce(i, carry):
            s, m = carry
            c0 = pl.multiple_of(i * CH, CH)
            blk = x_ref[pl.ds(c0, CH), :].astype(jnp.float32)    # (8, HW)
            return s + blk, jnp.maximum(m, blk)

        s8 = jnp.zeros((CH, HW), jnp.float32)
        m8 = jnp.full((CH, HW), -jnp.inf, jnp.float32)
        s8, m8 = lax.fori_loop(0, n_full, _reduce, (s8, m8), unroll=unroll)
        s = jnp.sum(s8, axis=0, keepdims=True)                   # (1, HW)
        mx = jnp.max(m8, axis=0, keepdims=True)
    else:
        s = jnp.zeros((1, HW), jnp.float32)
        mx = jnp.full((1, HW), -jnp.inf, jnp.float32)
    if rem:
        tail = x_ref[pl.ds(n_full * CH, rem), :].astype(jnp.float32)
        s = s + jnp.sum(tail, axis=0, keepdims=True)
        mx = jnp.maximum(mx, jnp.max(tail, axis=0, keepdims=True))

    avg = s * (1.0 / C)
    cm2 = jnp.concatenate([avg, mx], axis=0)                     # (2, HW)

    # ---- ks x ks conv over the stacked (avg, max) map in flat lane space ----
    # Hoist all scalar weight reads out of the tap loops (read once).
    wts = [w_ref[i] for i in range(2 * ks * ks)]

    pos = lax.broadcasted_iota(jnp.int32, (1, HW), 1)            # flat pixel idx
    col = pos % W                                                # pixel column
    row2 = lax.broadcasted_iota(jnp.int32, (2, 1), 0)            # (2,1) selector

    # Column-validity masks, shared by all row offsets and both channels.
    col_ok = {}
    for dj in range(-pad, pad + 1):
        if dj:
            col_ok[dj] = jnp.logical_and(col + dj >= 0, col + dj < W)

    conv2 = jnp.zeros((2, HW), jnp.float32)
    for di in range(-pad, pad + 1):
        # rowshift[:, p] = cm2[:, p + di*W] (one circular roll on the XLU,
        # shared by both channels), then zero rows whose source row (y + di)
        # falls outside [0, H).
        if di:
            rowshift = pltpu.roll(cm2, (-di * W) % HW, 1)
            lo = max(0, -di) * W
            hi = min(H, H - di) * W
            row_ok = jnp.logical_and(pos >= lo, pos < hi)
            rowshift = jnp.where(row_ok, rowshift, 0.0)
        else:
            rowshift = cm2
        for dj in range(-pad, pad + 1):
            if dj:
                tap = pltpu.roll(rowshift, (-dj) % HW, 1)
                tap = jnp.where(col_ok[dj], tap, 0.0)
            else:
                tap = rowshift
            w_avg = wts[(di + pad) * ks + (dj + pad)]             # channel 0
            w_max = wts[(ks + (di + pad)) * ks + (dj + pad)]      # channel 1
            wcol = jnp.where(row2 == 0, w_avg, w_max)             # (2, 1)
            conv2 = conv2 + wcol * tap                            # (2, HW)

    conv = jnp.sum(conv2, axis=0, keepdims=True)                  # (1, HW)
    attn = jax.nn.sigmoid(conv)                                   # (1, HW) f32

    # ---- sigmoid gate: full-sublane (8, HW) loads / stores per iteration ----
    # TODO(synk): for bf16 models cast attn to bf16 once here and do the gate
    # multiply/store in bf16 (keep the channel-sum reduction above in f32).
    if n_full > 0:
        attn_b = jnp.broadcast_to(attn, (CH, HW))                 # hoisted once

        def _gate(i, carry):
            c0 = pl.multiple_of(i * CH, CH)
            blk = x_ref[pl.ds(c0, CH), :].astype(jnp.float32)
            o_ref[pl.ds(c0, CH), :] = (blk * attn_b).astype(o_ref.dtype)
            return carry

        lax.fori_loop(0, n_full, _gate, 0, unroll=unroll)
    if rem:
        tail = x_ref[pl.ds(n_full * CH, rem), :].astype(jnp.float32)
        o_ref[pl.ds(n_full * CH, rem), :] = (
            tail * jnp.broadcast_to(attn, (rem, HW))).astype(o_ref.dtype)


def spatial_attention(x, conv1_weight, kernel_size=7):
    """x: (N, C, H, W); conv1_weight: (1, 2, ks, ks) OIHW.  Returns (N, C, H, W)."""
    assert kernel_size in (3, 7), "kernel size must be 3 or 7"
    N, C, H, W = x.shape
    HW = H * W

    x_flat = x.reshape(N, C, HW)                            # lane-dense layout
    w_flat = conv1_weight.astype(jnp.float32).reshape(-1)   # (2*ks*ks,)

    kernel = functools.partial(
        _spatial_attention_kernel, ks=kernel_size, H=H, W=W)

    # Size the VMEM limit from the actual block bytes: double-buffered
    # (input + output) blocks plus headroom, clamped to the smallest physical
    # VMEM across supported chips (v7x: 64 MiB).
    itemsize = jnp.dtype(x.dtype).itemsize
    blk_bytes = C * HW * itemsize
    vmem_limit = int(min(64 << 20, max(16 << 20, 4 * blk_bytes + (8 << 20))))

    # TODO(synk): for production-sized blocks (e.g. C~512, 56x56+) add an
    # H-tile grid axis with a (ks//2)-row halo, mark it "parallel" so v7x's
    # second TensorCore gets work even at N=1, and size the tile so
    # 2 x (in + out) block bytes stays under ~32-48 MiB on v7x; on v6e/v5e
    # keep one big (C, H*W) block per batch element as done here.
    out_flat = pl.pallas_call(
        kernel,
        out_shape=jax.ShapeDtypeStruct((N, C, HW), x.dtype),
        grid=(N,),
        in_specs=[
            # small weight vector lives in SMEM (scalar reads, hoisted)
            pl.BlockSpec(memory_space=pltpu.MemorySpace.SMEM),
            # lane-dense input block, leading batch dim squeezed
            pl.BlockSpec((None, C, HW), lambda n: (n, 0, 0)),
        ],
        out_specs=pl.BlockSpec((None, C, HW), lambda n: (n, 0, 0)),
        compiler_params=pltpu.CompilerParams(
            dimension_semantics=("parallel",),
            vmem_limit_bytes=vmem_limit,
        ),
    )(w_flat, x_flat)

    return out_flat.reshape(N, C, H, W)


def _reference(x, conv1_weight, kernel_size=7):
    pad = kernel_size // 2
    avg = jnp.mean(x, axis=1, keepdims=True)
    mx = jnp.max(x, axis=1, keepdims=True)
    cat = jnp.concatenate([avg, mx], axis=1)
    conv = jax.lax.conv_general_dilated(
        cat, conv1_weight, window_strides=(1, 1),
        padding=[(pad, pad), (pad, pad)],
        dimension_numbers=("NCHW", "OIHW", "NCHW"))
    return jax.nn.sigmoid(conv) * x


if __name__ == "__main__":
    key = jax.random.PRNGKey(0)
    kx, kw = jax.random.split(key)

    N, C, H, W = 2, 4, 16, 16
    ks = 7

    x = jax.random.normal(kx, (N, C, H, W), jnp.float32)

    # Deterministic synthetic conv1 weight: Conv2d(2, 1, 7, bias=False) shape.
    fan_in = 2 * ks * ks
    bound = (1.0 / fan_in) ** 0.5
    conv1_weight = jax.random.uniform(
        kw, (1, 2, ks, ks), jnp.float32, minval=-bound, maxval=bound)

    out = spatial_attention(x, conv1_weight, kernel_size=ks)
    jax.block_until_ready(out)

    ref = _reference(x, conv1_weight, kernel_size=ks)
    assert out.shape == (N, C, H, W)
    assert jnp.allclose(out, ref, atol=1e-4, rtol=1e-4), "mismatch vs reference"

    print("KERNEL_OK")
</pallas_src>

<mosaic_0001>
module attributes {stable_mosaic.version = 11 : i64} {
  func.func @_spatial_attention_kernel(%arg0: i32, %arg1: memref<98xf32, #tpu.memory_space<smem>>, %arg2: memref<1x4x256xf32, #tpu.memory_space<vmem>>, %arg3: memref<1x4x256xf32, #tpu.memory_space<vmem>>) attributes {dimension_semantics = [#tpu.dimension_semantics<parallel>], iteration_bounds = array<i64: 2>, scalar_prefetch = 0 : i64, scratch_operands = 0 : i64, tpu.core_type = #tpu.core_type<tc>, window_params = [{transform_indices = @transform_0, window_bounds = array<i64: 98>}, {transform_indices = @transform_1, window_bounds = array<i64: 1, 4, 256>}, {transform_indices = @transform_2, window_bounds = array<i64: 1, 4, 256>}]} {
    %cst = arith.constant 0.000000e+00 : f32
    %0 = vector.broadcast %cst : f32 to vector<1x256xf32>
    %cst_0 = arith.constant 0xFF800000 : f32
    %1 = vector.broadcast %cst_0 : f32 to vector<1x256xf32>
    %c0 = arith.constant 0 : index
    %c0_1 = arith.constant 0 : index
    %c0_2 = arith.constant 0 : index
    %2 = vector.load %arg2[%c0, %c0_1, %c0_2] : memref<1x4x256xf32, #tpu.memory_space<vmem>>, vector<1x4x256xf32>
    %3 = vector.shape_cast %2 : vector<1x4x256xf32> to vector<4x256xf32>
    %cst_3 = arith.constant dense<0.000000e+00> : vector<256xf32>
    %4 = vector.multi_reduction <add>, %3, %cst_3 [0] : vector<4x256xf32> to vector<256xf32>
    %5 = vector.shape_cast %4 : vector<256xf32> to vector<1x256xf32>
    %6 = arith.addf %0, %5 : vector<1x256xf32>
    %cst_4 = arith.constant dense<0xFF800000> : vector<256xf32>
    %7 = vector.multi_reduction <maximumf>, %3, %cst_4 [0] : vector<4x256xf32> to vector<256xf32>
    %8 = vector.shape_cast %7 : vector<256xf32> to vector<1x256xf32>
    %9 = arith.maximumf %1, %8 : vector<1x256xf32>
    %cst_5 = arith.constant 2.500000e-01 : f32
    %10 = vector.broadcast %cst_5 : f32 to vector<1x256xf32>
    %11 = arith.mulf %6, %10 : vector<1x256xf32>
    %12 = tpu.concatenate %11, %9 in 0 : vector<1x256xf32>, vector<1x256xf32> -> vector<2x256xf32>
    %c0_6 = arith.constant 0 : index
    %13 = memref.load %arg1[%c0_6] : memref<98xf32, #tpu.memory_space<smem>>
    %c1 = arith.constant 1 : index
    %14 = memref.load %arg1[%c1] : memref<98xf32, #tpu.memory_space<smem>>
    %c2 = arith.constant 2 : index
    %15 = memref.load %arg1[%c2] : memref<98xf32, #tpu.memory_space<smem>>
    %c3 = arith.constant 3 : index
    %16 = memref.load %arg1[%c3] : memref<98xf32, #tpu.memory_space<smem>>
    %c4 = arith.constant 4 : index
    %17 = memref.load %arg1[%c4] : memref<98xf32, #tpu.memory_space<smem>>
    %c5 = arith.constant 5 : index
    %18 = memref.load %arg1[%c5] : memref<98xf32, #tpu.memory_space<smem>>
    %c6 = arith.constant 6 : index
    %19 = memref.load %arg1[%c6] : memref<98xf32, #tpu.memory_space<smem>>
    %c7 = arith.constant 7 : index
    %20 = memref.load %arg1[%c7] : memref<98xf32, #tpu.memory_space<smem>>
    %c8 = arith.constant 8 : index
    %21 = memref.load %arg1[%c8] : memref<98xf32, #tpu.memory_space<smem>>
    %c9 = arith.constant 9 : index
    %22 = memref.load %arg1[%c9] : memref<98xf32, #tpu.memory_space<smem>>
    %c10 = arith.constant 10 : index
    %23 = memref.load %arg1[%c10] : memref<98xf32, #tpu.memory_space<smem>>
    %c11 = arith.constant 11 : index
    %24 = memref.load %arg1[%c11] : memref<98xf32, #tpu.memory_space<smem>>
    %c12 = arith.constant 12 : index
    %25 = memref.load %arg1[%c12] : memref<98xf32, #tpu.memory_space<smem>>
    %c13 = arith.constant 13 : index
    %26 = memref.load %arg1[%c13] : memref<98xf32, #tpu.memory_space<smem>>
    %c14 = arith.constant 14 : index
    %27 = memref.load %arg1[%c14] : memref<98xf32, #tpu.memory_space<smem>>
    %c15 = arith.constant 15 : index
    %28 = memref.load %arg1[%c15] : memref<98xf32, #tpu.memory_space<smem>>
    %c16 = arith.constant 16 : index
    %29 = memref.load %arg1[%c16] : memref<98xf32, #tpu.memory_space<smem>>
    %c17 = arith.constant 17 : index
    %30 = memref.load %arg1[%c17] : memref<98xf32, #tpu.memory_space<smem>>
    %c18 = arith.constant 18 : index
    %31 = memref.load %arg1[%c18] : memref<98xf32, #tpu.memory_space<smem>>
    %c19 = arith.constant 19 : index
    %32 = memref.load %arg1[%c19] : memref<98xf32, #tpu.memory_space<smem>>
    %c20 = arith.constant 20 : index
    %33 = memref.load %arg1[%c20] : memref<98xf32, #tpu.memory_space<smem>>
    %c21 = arith.constant 21 : index
    %34 = memref.load %arg1[%c21] : memref<98xf32, #tpu.memory_space<smem>>
    %c22 = arith.constant 22 : index
    %35 = memref.load %arg1[%c22] : memref<98xf32, #tpu.memory_space<smem>>
    %c23 = arith.constant 23 : index
    %36 = memref.load %arg1[%c23] : memref<98xf32, #tpu.memory_space<smem>>
    %c24 = arith.constant 24 : index
    %37 = memref.load %arg1[%c24] : memref<98xf32, #tpu.memory_space<smem>>
    %c25 = arith.constant 25 : index
    %38 = memref.load %arg1[%c25] : memref<98xf32, #tpu.memory_space<smem>>
    %c26 = arith.constant 26 : index
    %39 = memref.load %arg1[%c26] : memref<98xf32, #tpu.memory_space<smem>>
    %c27 = arith.constant 27 : index
    %40 = memref.load %arg1[%c27] : memref<98xf32, #tpu.memory_space<smem>>
    %c28 = arith.constant 28 : index
    %41 = memref.load %arg1[%c28] : memref<98xf32, #tpu.memory_space<smem>>
    %c29 = arith.constant 29 : index
    %42 = memref.load %arg1[%c29] : memref<98xf32, #tpu.memory_space<smem>>
    %c30 = arith.constant 30 : index
    %43 = memref.load %arg1[%c30] : memref<98xf32, #tpu.memory_space<smem>>
    %c31 = arith.constant 31 : index
    %44 = memref.load %arg1[%c31] : memref<98xf32, #tpu.memory_space<smem>>
    %c32 = arith.constant 32 : index
    %45 = memref.load %arg1[%c32] : memref<98xf32, #tpu.memory_space<smem>>
    %c33 = arith.constant 33 : index
    %46 = memref.load %arg1[%c33] : memref<98xf32, #tpu.memory_space<smem>>
    %c34 = arith.constant 34 : index
    %47 = memref.load %arg1[%c34] : memref<98xf32, #tpu.memory_space<smem>>
    %c35 = arith.constant 35 : index
    %48 = memref.load %arg1[%c35] : memref<98xf32, #tpu.memory_space<smem>>
    %c36 = arith.constant 36 : index
    %49 = memref.load %arg1[%c36] : memref<98xf32, #tpu.memory_space<smem>>
    %c37 = arith.constant 37 : index
    %50 = memref.load %arg1[%c37] : memref<98xf32, #tpu.memory_space<smem>>
    %c38 = arith.constant 38 : index
    %51 = memref.load %arg1[%c38] : memref<98xf32, #tpu.memory_space<smem>>
    %c39 = arith.constant 39 : index
    %52 = memref.load %arg1[%c39] : memref<98xf32, #tpu.memory_space<smem>>
    %c40 = arith.constant 40 : index
    %53 = memref.load %arg1[%c40] : memref<98xf32, #tpu.memory_space<smem>>
    %c41 = arith.constant 41 : index
    %54 = memref.load %arg1[%c41] : memref<98xf32, #tpu.memory_space<smem>>
    %c42 = arith.constant 42 : index
    %55 = memref.load %arg1[%c42] : memref<98xf32, #tpu.memory_space<smem>>
    %c43 = arith.constant 43 : index
    %56 = memref.load %arg1[%c43] : memref<98xf32, #tpu.memory_space<smem>>
    %c44 = arith.constant 44 : index
    %57 = memref.load %arg1[%c44] : memref<98xf32, #tpu.memory_space<smem>>
    %c45 = arith.constant 45 : index
    %58 = memref.load %arg1[%c45] : memref<98xf32, #tpu.memory_space<smem>>
    %c46 = arith.constant 46 : index
    %59 = memref.load %arg1[%c46] : memref<98xf32, #tpu.memory_space<smem>>
    %c47 = arith.constant 47 : index
    %60 = memref.load %arg1[%c47] : memref<98xf32, #tpu.memory_space<smem>>
    %c48 = arith.constant 48 : index
    %61 = memref.load %arg1[%c48] : memref<98xf32, #tpu.memory_space<smem>>
    %c49 = arith.constant 49 : index
    %62 = memref.load %arg1[%c49] : memref<98xf32, #tpu.memory_space<smem>>
    %c50 = arith.constant 50 : index
    %63 = memref.load %arg1[%c50] : memref<98xf32, #tpu.memory_space<smem>>
    %c51 = arith.constant 51 : index
    %64 = memref.load %arg1[%c51] : memref<98xf32, #tpu.memory_space<smem>>
    %c52 = arith.constant 52 : index
    %65 = memref.load %arg1[%c52] : memref<98xf32, #tpu.memory_space<smem>>
    %c53 = arith.constant 53 : index
    %66 = memref.load %arg1[%c53] : memref<98xf32, #tpu.memory_space<smem>>
    %c54 = arith.constant 54 : index
    %67 = memref.load %arg1[%c54] : memref<98xf32, #tpu.memory_space<smem>>
    %c55 = arith.constant 55 : index
    %68 = memref.load %arg1[%c55] : memref<98xf32, #tpu.memory_space<smem>>
    %c56 = arith.constant 56 : index
    %69 = memref.load %arg1[%c56] : memref<98xf32, #tpu.memory_space<smem>>
    %c57 = arith.constant 57 : index
    %70 = memref.load %arg1[%c57] : memref<98xf32, #tpu.memory_space<smem>>
    %c58 = arith.constant 58 : index
    %71 = memref.load %arg1[%c58] : memref<98xf32, #tpu.memory_space<smem>>
    %c59 = arith.constant 59 : index
    %72 = memref.load %arg1[%c59] : memref<98xf32, #tpu.memory_space<smem>>
    %c60 = arith.constant 60 : index
    %73 = memref.load %arg1[%c60] : memref<98xf32, #tpu.memory_space<smem>>
    %c61 = arith.constant 61 : index
    %74 = memref.load %arg1[%c61] : memref<98xf32, #tpu.memory_space<smem>>
    %c62 = arith.constant 62 : index
    %75 = memref.load %arg1[%c62] : memref<98xf32, #tpu.memory_space<smem>>
    %c63 = arith.constant 63 : index
    %76 = memref.load %arg1[%c63] : memref<98xf32, #tpu.memory_space<smem>>
    %c64 = arith.constant 64 : index
    %77 = memref.load %arg1[%c64] : memref<98xf32, #tpu.memory_space<smem>>
    %c65 = arith.constant 65 : index
    %78 = memref.load %arg1[%c65] : memref<98xf32, #tpu.memory_space<smem>>
    %c66 = arith.constant 66 : index
    %79 = memref.load %arg1[%c66] : memref<98xf32, #tpu.memory_space<smem>>
    %c67 = arith.constant 67 : index
    %80 = memref.load %arg1[%c67] : memref<98xf32, #tpu.memory_space<smem>>
    %c68 = arith.constant 68 : index
    %81 = memref.load %arg1[%c68] : memref<98xf32, #tpu.memory_space<smem>>
    %c69 = arith.constant 69 : index
    %82 = memref.load %arg1[%c69] : memref<98xf32, #tpu.memory_space<smem>>
    %c70 = arith.constant 70 : index
    %83 = memref.load %arg1[%c70] : memref<98xf32, #tpu.memory_space<smem>>
    %c71 = arith.constant 71 : index
    %84 = memref.load %arg1[%c71] : memref<98xf32, #tpu.memory_space<smem>>
    %c72 = arith.constant 72 : index
    %85 = memref.load %arg1[%c72] : memref<98xf32, #tpu.memory_space<smem>>
    %c73 = arith.constant 73 : index
    %86 = memref.load %arg1[%c73] : memref<98xf32, #tpu.memory_space<smem>>
    %c74 = arith.constant 74 : index
    %87 = memref.load %arg1[%c74] : memref<98xf32, #tpu.memory_space<smem>>
    %c75 = arith.constant 75 : index
    %88 = memref.load %arg1[%c75] : memref<98xf32, #tpu.memory_space<smem>>
    %c76 = arith.constant 76 : index
    %89 = memref.load %arg1[%c76] : memref<98xf32, #tpu.memory_space<smem>>
    %c77 = arith.constant 77 : index
    %90 = memref.load %arg1[%c77] : memref<98xf32, #tpu.memory_space<smem>>
    %c78 = arith.constant 78 : index
    %91 = memref.load %arg1[%c78] : memref<98xf32, #tpu.memory_space<smem>>
    %c79 = arith.constant 79 : index
    %92 = memref.load %arg1[%c79] : memref<98xf32, #tpu.memory_space<smem>>
    %c80 = arith.constant 80 : index
    %93 = memref.load %arg1[%c80] : memref<98xf32, #tpu.memory_space<smem>>
    %c81 = arith.constant 81 : index
    %94 = memref.load %arg1[%c81] : memref<98xf32, #tpu.memory_space<smem>>
    %c82 = arith.constant 82 : index
    %95 = memref.load %arg1[%c82] : memref<98xf32, #tpu.memory_space<smem>>
    %c83 = arith.constant 83 : index
    %96 = memref.load %arg1[%c83] : memref<98xf32, #tpu.memory_space<smem>>
    %c84 = arith.constant 84 : index
    %97 = memref.load %arg1[%c84] : memref<98xf32, #tpu.memory_space<smem>>
    %c85 = arith.constant 85 : index
    %98 = memref.load %arg1[%c85] : memref<98xf32, #tpu.memory_space<smem>>
    %c86 = arith.constant 86 : index
    %99 = memref.load %arg1[%c86] : memref<98xf32, #tpu.memory_space<smem>>
    %c87 = arith.constant 87 : index
    %100 = memref.load %arg1[%c87] : memref<98xf32, #tpu.memory_space<smem>>
    %c88 = arith.constant 88 : index
    %101 = memref.load %arg1[%c88] : memref<98xf32, #tpu.memory_space<smem>>
    %c89 = arith.constant 89 : index
    %102 = memref.load %arg1[%c89] : memref<98xf32, #tpu.memory_space<smem>>
    %c90 = arith.constant 90 : index
    %103 = memref.load %arg1[%c90] : memref<98xf32, #tpu.memory_space<smem>>
    %c91 = arith.constant 91 : index
    %104 = memref.load %arg1[%c91] : memref<98xf32, #tpu.memory_space<smem>>
    %c92 = arith.constant 92 : index
    %105 = memref.load %arg1[%c92] : memref<98xf32, #tpu.memory_space<smem>>
    %c93 = arith.constant 93 : index
    %106 = memref.load %arg1[%c93] : memref<98xf32, #tpu.memory_space<smem>>
    %c94 = arith.constant 94 : index
    %107 = memref.load %arg1[%c94] : memref<98xf32, #tpu.memory_space<smem>>
    %c95 = arith.constant 95 : index
    %108 = memref.load %arg1[%c95] : memref<98xf32, #tpu.memory_space<smem>>
    %c96 = arith.constant 96 : index
    %109 = memref.load %arg1[%c96] : memref<98xf32, #tpu.memory_space<smem>>
    %c97 = arith.constant 97 : index
    %110 = memref.load %arg1[%c97] : memref<98xf32, #tpu.memory_space<smem>>
    %111 = tpu.iota {dimensions = array<i32: 1>} : vector<1x256xi32>
    %c16_i32 = arith.constant 16 : i32
    %c0_i32 = arith.constant 0 : i32
    %112 = arith.cmpi eq, %c16_i32, %c0_i32 : i32
    %c1_i32 = arith.constant 1 : i32
    %113 = arith.select %112, %c1_i32, %c16_i32 : i32
    %114 = vector.broadcast %113 : i32 to vector<1x256xi32>
    %115 = arith.remsi %111, %114 : vector<1x256xi32>
    %c0_i32_7 = arith.constant 0 : i32
    %116 = vector.broadcast %c0_i32_7 : i32 to vector<1x256xi32>
    %117 = arith.cmpi ne, %115, %116 : vector<1x256xi32>
    %c0_i32_8 = arith.constant 0 : i32
    %118 = vector.broadcast %c0_i32_8 : i32 to vector<1x256xi32>
    %119 = arith.cmpi slt, %115, %118 : vector<1x256xi32>
    %c0_i32_9 = arith.constant 0 : i32
    %120 = arith.cmpi slt, %113, %c0_i32_9 : i32
    %121 = vector.broadcast %120 : i1 to vector<1x256xi1>
    %122 = vector.broadcast %121 : vector<1x256xi1> to vector<1x256xi1>
    %123 = arith.xori %119, %122 : vector<1x256xi1>
    %124 = arith.andi %123, %117 : vector<1x256xi1>
    %125 = vector.broadcast %113 : i32 to vector<1x256xi32>
    %126 = arith.addi %115, %125 : vector<1x256xi32>
    %127 = arith.select %124, %126, %115 : vector<1x256xi1>, vector<1x256xi32>
    %128 = tpu.iota {dimensions = array<i32: 0>} : vector<2x1xi32>
    %c-3_i32 = arith.constant -3 : i32
    %129 = vector.broadcast %c-3_i32 : i32 to vector<1x256xi32>
    %130 = arith.addi %127, %129 : vector<1x256xi32>
    %c0_i32_10 = arith.constant 0 : i32
    %131 = vector.broadcast %c0_i32_10 : i32 to vector<1x256xi32>
    %132 = arith.cmpi sge, %130, %131 : vector<1x256xi32>
    %c-3_i32_11 = arith.constant -3 : i32
    %133 = vector.broadcast %c-3_i32_11 : i32 to vector<1x256xi32>
    %134 = arith.addi %127, %133 : vector<1x256xi32>
    %c16_i32_12 = arith.constant 16 : i32
    %135 = vector.broadcast %c16_i32_12 : i32 to vector<1x256xi32>
    %136 = arith.cmpi slt, %134, %135 : vector<1x256xi32>
    %137 = arith.andi %132, %136 : vector<1x256xi1>
    %c-2_i32 = arith.constant -2 : i32
    %138 = vector.broadcast %c-2_i32 : i32 to vector<1x256xi32>
    %139 = arith.addi %127, %138 : vector<1x256xi32>
    %c0_i32_13 = arith.constant 0 : i32
    %140 = vector.broadcast %c0_i32_13 : i32 to vector<1x256xi32>
    %141 = arith.cmpi sge, %139, %140 : vector<1x256xi32>
    %c-2_i32_14 = arith.constant -2 : i32
    %142 = vector.broadcast %c-2_i32_14 : i32 to vector<1x256xi32>
    %143 = arith.addi %127, %142 : vector<1x256xi32>
    %c16_i32_15 = arith.constant 16 : i32
    %144 = vector.broadcast %c16_i32_15 : i32 to vector<1x256xi32>
    %145 = arith.cmpi slt, %143, %144 : vector<1x256xi32>
    %146 = arith.andi %141, %145 : vector<1x256xi1>
    %c-1_i32 = arith.constant -1 : i32
    %147 = vector.broadcast %c-1_i32 : i32 to vector<1x256xi32>
    %148 = arith.addi %127, %147 : vector<1x256xi32>
    %c0_i32_16 = arith.constant 0 : i32
    %149 = vector.broadcast %c0_i32_16 : i32 to vector<1x256xi32>
    %150 = arith.cmpi sge, %148, %149 : vector<1x256xi32>
    %c-1_i32_17 = arith.constant -1 : i32
    %151 = vector.broadcast %c-1_i32_17 : i32 to vector<1x256xi32>
    %152 = arith.addi %127, %151 : vector<1x256xi32>
    %c16_i32_18 = arith.constant 16 : i32
    %153 = vector.broadcast %c16_i32_18 : i32 to vector<1x256xi32>
    %154 = arith.cmpi slt, %152, %153 : vector<1x256xi32>
    %155 = arith.andi %150, %154 : vector<1x256xi1>
    %c1_i32_19 = arith.constant 1 : i32
    %156 = vector.broadcast %c1_i32_19 : i32 to vector<1x256xi32>
    %157 = arith.addi %127, %156 : vector<1x256xi32>
    %c0_i32_20 = arith.constant 0 : i32
    %158 = vector.broadcast %c0_i32_20 : i32 to vector<1x256xi32>
    %159 = arith.cmpi sge, %157, %158 : vector<1x256xi32>
    %c1_i32_21 = arith.constant 1 : i32
    %160 = vector.broadcast %c1_i32_21 : i32 to vector<1x256xi32>
    %161 = arith.addi %127, %160 : vector<1x256xi32>
    %c16_i32_22 = arith.constant 16 : i32
    %162 = vector.broadcast %c16_i32_22 : i32 to vector<1x256xi32>
    %163 = arith.cmpi slt, %161, %162 : vector<1x256xi32>
    %164 = arith.andi %159, %163 : vector<1x256xi1>
    %c2_i32 = arith.constant 2 : i32
    %165 = vector.broadcast %c2_i32 : i32 to vector<1x256xi32>
    %166 = arith.addi %127, %165 : vector<1x256xi32>
    %c0_i32_23 = arith.constant 0 : i32
    %167 = vector.broadcast %c0_i32_23 : i32 to vector<1x256xi32>
    %168 = arith.cmpi sge, %166, %167 : vector<1x256xi32>
    %c2_i32_24 = arith.constant 2 : i32
    %169 = vector.broadcast %c2_i32_24 : i32 to vector<1x256xi32>
    %170 = arith.addi %127, %169 : vector<1x256xi32>
    %c16_i32_25 = arith.constant 16 : i32
    %171 = vector.broadcast %c16_i32_25 : i32 to vector<1x256xi32>
    %172 = arith.cmpi slt, %170, %171 : vector<1x256xi32>
    %173 = arith.andi %168, %172 : vector<1x256xi1>
    %c3_i32 = arith.constant 3 : i32
    %174 = vector.broadcast %c3_i32 : i32 to vector<1x256xi32>
    %175 = arith.addi %127, %174 : vector<1x256xi32>
    %c0_i32_26 = arith.constant 0 : i32
    %176 = vector.broadcast %c0_i32_26 : i32 to vector<1x256xi32>
    %177 = arith.cmpi sge, %175, %176 : vector<1x256xi32>
    %c3_i32_27 = arith.constant 3 : i32
    %178 = vector.broadcast %c3_i32_27 : i32 to vector<1x256xi32>
    %179 = arith.addi %127, %178 : vector<1x256xi32>
    %c16_i32_28 = arith.constant 16 : i32
    %180 = vector.broadcast %c16_i32_28 : i32 to vector<1x256xi32>
    %181 = arith.cmpi slt, %179, %180 : vector<1x256xi32>
    %182 = arith.andi %177, %181 : vector<1x256xi1>
    %cst_29 = arith.constant 0.000000e+00 : f32
    %183 = vector.broadcast %cst_29 : f32 to vector<2x256xf32>
    %c48_i32 = arith.constant 48 : i32
    %184 = tpu.dynamic_rotate %12 by %c48_i32 dim 1 : vector<2x256xf32>, i32 -> vector<2x256xf32>
    %c48_i32_30 = arith.constant 48 : i32
    %185 = vector.broadcast %c48_i32_30 : i32 to vector<1x256xi32>
    %186 = arith.cmpi sge, %111, %185 : vector<1x256xi32>
    %c256_i32 = arith.constant 256 : i32
    %187 = vector.broadcast %c256_i32 : i32 to vector<1x256xi32>
    %188 = arith.cmpi slt, %111, %187 : vector<1x256xi32>
    %189 = arith.andi %186, %188 : vector<1x256xi1>
    %cst_31 = arith.constant 0.000000e+00 : f32
    %190 = vector.shape_cast %189 : vector<1x256xi1> to vector<1x256xi1>
    %191 = vector.broadcast %190 : vector<1x256xi1> to vector<2x256xi1>
    %192 = vector.broadcast %cst_31 : f32 to vector<2x256xf32>
    %193 = arith.select %191, %184, %192 : vector<2x256xi1>, vector<2x256xf32>
    %c3_i32_32 = arith.constant 3 : i32
    %194 = tpu.dynamic_rotate %193 by %c3_i32_32 dim 1 : vector<2x256xf32>, i32 -> vector<2x256xf32>
    %cst_33 = arith.constant 0.000000e+00 : f32
    %195 = vector.shape_cast %137 : vector<1x256xi1> to vector<1x256xi1>
    %196 = vector.broadcast %195 : vector<1x256xi1> to vector<2x256xi1>
    %197 = vector.broadcast %cst_33 : f32 to vector<2x256xf32>
    %198 = arith.select %196, %194, %197 : vector<2x256xi1>, vector<2x256xf32>
    %c0_i32_34 = arith.constant 0 : i32
    %199 = vector.broadcast %c0_i32_34 : i32 to vector<2x1xi32>
    %200 = arith.cmpi eq, %128, %199 : vector<2x1xi32>
    %201 = vector.broadcast %13 : f32 to vector<2x1xf32>
    %202 = vector.broadcast %62 : f32 to vector<2x1xf32>
    %203 = arith.select %200, %201, %202 : vector<2x1xi1>, vector<2x1xf32>
    %204 = vector.broadcast %203 : vector<2x1xf32> to vector<2x256xf32>
    %205 = arith.mulf %204, %198 : vector<2x256xf32>
    %206 = arith.addf %183, %205 : vector<2x256xf32>
    %c2_i32_35 = arith.constant 2 : i32
    %207 = tpu.dynamic_rotate %193 by %c2_i32_35 dim 1 : vector<2x256xf32>, i32 -> vector<2x256xf32>
    %cst_36 = arith.constant 0.000000e+00 : f32
    %208 = vector.shape_cast %146 : vector<1x256xi1> to vector<1x256xi1>
    %209 = vector.broadcast %208 : vector<1x256xi1> to vector<2x256xi1>
    %210 = vector.broadcast %cst_36 : f32 to vector<2x256xf32>
    %211 = arith.select %209, %207, %210 : vector<2x256xi1>, vector<2x256xf32>
    %c0_i32_37 = arith.constant 0 : i32
    %212 = vector.broadcast %c0_i32_37 : i32 to vector<2x1xi32>
    %213 = arith.cmpi eq, %128, %212 : vector<2x1xi32>
    %214 = vector.broadcast %14 : f32 to vector<2x1xf32>
    %215 = vector.broadcast %63 : f32 to vector<2x1xf32>
    %216 = arith.select %213, %214, %215 : vector<2x1xi1>, vector<2x1xf32>
    %217 = vector.broadcast %216 : vector<2x1xf32> to vector<2x256xf32>
    %218 = arith.mulf %217, %211 : vector<2x256xf32>
    %219 = arith.addf %206, %218 : vector<2x256xf32>
    %c1_i32_38 = arith.constant 1 : i32
    %220 = tpu.dynamic_rotate %193 by %c1_i32_38 dim 1 : vector<2x256xf32>, i32 -> vector<2x256xf32>
    %cst_39 = arith.constant 0.000000e+00 : f32
    %221 = vector.shape_cast %155 : vector<1x256xi1> to vector<1x256xi1>
    %222 = vector.broadcast %221 : vector<1x256xi1> to vector<2x256xi1>
    %223 = vector.broadcast %cst_39 : f32 to vector<2x256xf32>
    %224 = arith.select %222, %220, %223 : vector<2x256xi1>, vector<2x256xf32>
    %c0_i32_40 = arith.constant 0 : i32
    %225 = vector.broadcast %c0_i32_40 : i32 to vector<2x1xi32>
    %226 = arith.cmpi eq, %128, %225 : vector<2x1xi32>
    %227 = vector.broadcast %15 : f32 to vector<2x1xf32>
    %228 = vector.broadcast %64 : f32 to vector<2x1xf32>
    %229 = arith.select %226, %227, %228 : vector<2x1xi1>, vector<2x1xf32>
    %230 = vector.broadcast %229 : vector<2x1xf32> to vector<2x256xf32>
    %231 = arith.mulf %230, %224 : vector<2x256xf32>
    %232 = arith.addf %219, %231 : vector<2x256xf32>
    %c0_i32_41 = arith.constant 0 : i32
    %233 = vector.broadcast %c0_i32_41 : i32 to vector<2x1xi32>
    %234 = arith.cmpi eq, %128, %233 : vector<2x1xi32>
    %235 = vector.broadcast %16 : f32 to vector<2x1xf32>
    %236 = vector.broadcast %65 : f32 to vector<2x1xf32>
    %237 = arith.select %234, %235, %236 : vector<2x1xi1>, vector<2x1xf32>
    %238 = vector.broadcast %237 : vector<2x1xf32> to vector<2x256xf32>
    %239 = arith.mulf %238, %193 : vector<2x256xf32>
    %240 = arith.addf %232, %239 : vector<2x256xf32>
    %c255_i32 = arith.constant 255 : i32
    %241 = tpu.dynamic_rotate %193 by %c255_i32 dim 1 : vector<2x256xf32>, i32 -> vector<2x256xf32>
    %cst_42 = arith.constant 0.000000e+00 : f32
    %242 = vector.shape_cast %164 : vector<1x256xi1> to vector<1x256xi1>
    %243 = vector.broadcast %242 : vector<1x256xi1> to vector<2x256xi1>
    %244 = vector.broadcast %cst_42 : f32 to vector<2x256xf32>
    %245 = arith.select %243, %241, %244 : vector<2x256xi1>, vector<2x256xf32>
    %c0_i32_43 = arith.constant 0 : i32
    %246 = vector.broadcast %c0_i32_43 : i32 to vector<2x1xi32>
    %247 = arith.cmpi eq, %128, %246 : vector<2x1xi32>
    %248 = vector.broadcast %17 : f32 to vector<2x1xf32>
    %249 = vector.broadcast %66 : f32 to vector<2x1xf32>
    %250 = arith.select %247, %248, %249 : vector<2x1xi1>, vector<2x1xf32>
    %251 = vector.broadcast %250 : vector<2x1xf32> to vector<2x256xf32>
    %252 = arith.mulf %251, %245 : vector<2x256xf32>
    %253 = arith.addf %240, %252 : vector<2x256xf32>
    %c254_i32 = arith.constant 254 : i32
    %254 = tpu.dynamic_rotate %193 by %c254_i32 dim 1 : vector<2x256xf32>, i32 -> vector<2x256xf32>
    %cst_44 = arith.constant 0.000000e+00 : f32
    %255 = vector.shape_cast %173 : vector<1x256xi1> to vector<1x256xi1>
    %256 = vector.broadcast %255 : vector<1x256xi1> to vector<2x256xi1>
    %257 = vector.broadcast %cst_44 : f32 to vector<2x256xf32>
    %258 = arith.select %256, %254, %257 : vector<2x256xi1>, vector<2x256xf32>
    %c0_i32_45 = arith.constant 0 : i32
    %259 = vector.broadcast %c0_i32_45 : i32 to vector<2x1xi32>
    %260 = arith.cmpi eq, %128, %259 : vector<2x1xi32>
    %261 = vector.broadcast %18 : f32 to vector<2x1xf32>
    %262 = vector.broadcast %67 : f32 to vector<2x1xf32>
    %263 = arith.select %260, %261, %262 : vector<2x1xi1>, vector<2x1xf32>
    %264 = vector.broadcast %263 : vector<2x1xf32> to vector<2x256xf32>
    %265 = arith.mulf %264, %258 : vector<2x256xf32>
    %266 = arith.addf %253, %265 : vector<2x256xf32>
    %c253_i32 = arith.constant 253 : i32
    %267 = tpu.dynamic_rotate %193 by %c253_i32 dim 1 : vector<2x256xf32>, i32 -> vector<2x256xf32>
    %cst_46 = arith.constant 0.000000e+00 : f32
    %268 = vector.shape_cast %182 : vector<1x256xi1> to vector<1x256xi1>
    %269 = vector.broadcast %268 : vector<1x256xi1> to vector<2x256xi1>
    %270 = vector.broadcast %cst_46 : f32 to vector<2x256xf32>
    %271 = arith.select %269, %267, %270 : vector<2x256xi1>, vector<2x256xf32>
    %c0_i32_47 = arith.constant 0 : i32
    %272 = vector.broadcast %c0_i32_47 : i32 to vector<2x1xi32>
    %273 = arith.cmpi eq, %128, %272 : vector<2x1xi32>
    %274 = vector.broadcast %19 : f32 to vector<2x1xf32>
    %275 = vector.broadcast %68 : f32 to vector<2x1xf32>
    %276 = arith.select %273, %274, %275 : vector<2x1xi1>, vector<2x1xf32>
    %277 = vector.broadcast %276 : vector<2x1xf32> to vector<2x256xf32>
    %278 = arith.mulf %277, %271 : vector<2x256xf32>
    %279 = arith.addf %266, %278 : vector<2x256xf32>
    %c32_i32 = arith.constant 32 : i32
    %280 = tpu.dynamic_rotate %12 by %c32_i32 dim 1 : vector<2x256xf32>, i32 -> vector<2x256xf32>
    %c32_i32_48 = arith.constant 32 : i32
    %281 = vector.broadcast %c32_i32_48 : i32 to vector<1x256xi32>
    %282 = arith.cmpi sge, %111, %281 : vector<1x256xi32>
    %c256_i32_49 = arith.constant 256 : i32
    %283 = vector.broadcast %c256_i32_49 : i32 to vector<1x256xi32>
    %284 = arith.cmpi slt, %111, %283 : vector<1x256xi32>
    %285 = arith.andi %282, %284 : vector<1x256xi1>
    %cst_50 = arith.constant 0.000000e+00 : f32
    %286 = vector.shape_cast %285 : vector<1x256xi1> to vector<1x256xi1>
    %287 = vector.broadcast %286 : vector<1x256xi1> to vector<2x256xi1>
    %288 = vector.broadcast %cst_50 : f32 to vector<2x256xf32>
    %289 = arith.select %287, %280, %288 : vector<2x256xi1>, vector<2x256xf32>
    %c3_i32_51 = arith.constant 3 : i32
    %290 = tpu.dynamic_rotate %289 by %c3_i32_51 dim 1 : vector<2x256xf32>, i32 -> vector<2x256xf32>
    %cst_52 = arith.constant 0.000000e+00 : f32
    %291 = vector.shape_cast %137 : vector<1x256xi1> to vector<1x256xi1>
    %292 = vector.broadcast %291 : vector<1x256xi1> to vector<2x256xi1>
    %293 = vector.broadcast %cst_52 : f32 to vector<2x256xf32>
    %294 = arith.select %292, %290, %293 : vector<2x256xi1>, vector<2x256xf32>
    %c0_i32_53 = arith.constant 0 : i32
    %295 = vector.broadcast %c0_i32_53 : i32 to vector<2x1xi32>
    %296 = arith.cmpi eq, %128, %295 : vector<2x1xi32>
    %297 = vector.broadcast %20 : f32 to vector<2x1xf32>
    %298 = vector.broadcast %69 : f32 to vector<2x1xf32>
    %299 = arith.select %296, %297, %298 : vector<2x1xi1>, vector<2x1xf32>
    %300 = vector.broadcast %299 : vector<2x1xf32> to vector<2x256xf32>
    %301 = arith.mulf %300, %294 : vector<2x256xf32>
    %302 = arith.addf %279, %301 : vector<2x256xf32>
    %c2_i32_54 = arith.constant 2 : i32
    %303 = tpu.dynamic_rotate %289 by %c2_i32_54 dim 1 : vector<2x256xf32>, i32 -> vector<2x256xf32>
    %cst_55 = arith.constant 0.000000e+00 : f32
    %304 = vector.shape_cast %146 : vector<1x256xi1> to vector<1x256xi1>
    %305 = vector.broadcast %304 : vector<1x256xi1> to vector<2x256xi1>
    %306 = vector.broadcast %cst_55 : f32 to vector<2x256xf32>
    %307 = arith.select %305, %303, %306 : vector<2x256xi1>, vector<2x256xf32>
    %c0_i32_56 = arith.constant 0 : i32
    %308 = vector.broadcast %c0_i32_56 : i32 to vector<2x1xi32>
    %309 = arith.cmpi eq, %128, %308 : vector<2x1xi32>
    %310 = vector.broadcast %21 : f32 to vector<2x1xf32>
    %311 = vector.broadcast %70 : f32 to vector<2x1xf32>
    %312 = arith.select %309, %310, %311 : vector<2x1xi1>, vector<2x1xf32>
    %313 = vector.broadcast %312 : vector<2x1xf32> to vector<2x256xf32>
    %314 = arith.mulf %313, %307 : vector<2x256xf32>
    %315 = arith.addf %302, %314 : vector<2x256xf32>
    %c1_i32_57 = arith.constant 1 : i32
    %316 = tpu.dynamic_rotate %289 by %c1_i32_57 dim 1 : vector<2x256xf32>, i32 -> vector<2x256xf32>
    %cst_58 = arith.constant 0.000000e+00 : f32
    %317 = vector.shape_cast %155 : vector<1x256xi1> to vector<1x256xi1>
    %318 = vector.broadcast %317 : vector<1x256xi1> to vector<2x256xi1>
    %319 = vector.broadcast %cst_58 : f32 to vector<2x256xf32>
    %320 = arith.select %318, %316, %319 : vector<2x256xi1>, vector<2x256xf32>
    %c0_i32_59 = arith.constant 0 : i32
    %321 = vector.broadcast %c0_i32_59 : i32 to vector<2x1xi32>
    %322 = arith.cmpi eq, %128, %321 : vector<2x1xi32>
    %323 = vector.broadcast %22 : f32 to vector<2x1xf32>
    %324 = vector.broadcast %71 : f32 to vector<2x1xf32>
    %325 = arith.select %322, %323, %324 : vector<2x1xi1>, vector<2x1xf32>
    %326 = vector.broadcast %325 : vector<2x1xf32> to vector<2x256xf32>
    %327 = arith.mulf %326, %320 : vector<2x256xf32>
    %328 = arith.addf %315, %327 : vector<2x256xf32>
    %c0_i32_60 = arith.constant 0 : i32
    %329 = vector.broadcast %c0_i32_60 : i32 to vector<2x1xi32>
    %330 = arith.cmpi eq, %128, %329 : vector<2x1xi32>
    %331 = vector.broadcast %23 : f32 to vector<2x1xf32>
    %332 = vector.broadcast %72 : f32 to vector<2x1xf32>
    %333 = arith.select %330, %331, %332 : vector<2x1xi1>, vector<2x1xf32>
    %334 = vector.broadcast %333 : vector<2x1xf32> to vector<2x256xf32>
    %335 = arith.mulf %334, %289 : vector<2x256xf32>
    %336 = arith.addf %328, %335 : vector<2x256xf32>
    %c255_i32_61 = arith.constant 255 : i32
    %337 = tpu.dynamic_rotate %289 by %c255_i32_61 dim 1 : vector<2x256xf32>, i32 -> vector<2x256xf32>
    %cst_62 = arith.constant 0.000000e+00 : f32
    %338 = vector.shape_cast %164 : vector<1x256xi1> to vector<1x256xi1>
    %339 = vector.broadcast %338 : vector<1x256xi1> to vector<2x256xi1>
    %340 = vector.broadcast %cst_62 : f32 to vector<2x256xf32>
    %341 = arith.select %339, %337, %340 : vector<2x256xi1>, vector<2x256xf32>
    %c0_i32_63 = arith.constant 0 : i32
    %342 = vector.broadcast %c0_i32_63 : i32 to vector<2x1xi32>
    %343 = arith.cmpi eq, %128, %342 : vector<2x1xi32>
    %344 = vector.broadcast %24 : f32 to vector<2x1xf32>
    %345 = vector.broadcast %73 : f32 to vector<2x1xf32>
    %346 = arith.select %343, %344, %345 : vector<2x1xi1>, vector<2x1xf32>
    %347 = vector.broadcast %346 : vector<2x1xf32> to vector<2x256xf32>
    %348 = arith.mulf %347, %341 : vector<2x256xf32>
    %349 = arith.addf %336, %348 : vector<2x256xf32>
    %c254_i32_64 = arith.constant 254 : i32
    %350 = tpu.dynamic_rotate %289 by %c254_i32_64 dim 1 : vector<2x256xf32>, i32 -> vector<2x256xf32>
    %cst_65 = arith.constant 0.000000e+00 : f32
    %351 = vector.shape_cast %173 : vector<1x256xi1> to vector<1x256xi1>
    %352 = vector.broadcast %351 : vector<1x256xi1> to vector<2x256xi1>
    %353 = vector.broadcast %cst_65 : f32 to vector<2x256xf32>
    %354 = arith.select %352, %350, %353 : vector<2x256xi1>, vector<2x256xf32>
    %c0_i32_66 = arith.constant 0 : i32
    %355 = vector.broadcast %c0_i32_66 : i32 to vector<2x1xi32>
    %356 = arith.cmpi eq, %128, %355 : vector<2x1xi32>
    %357 = vector.broadcast %25 : f32 to vector<2x1xf32>
    %358 = vector.broadcast %74 : f32 to vector<2x1xf32>
    %359 = arith.select %356, %357, %358 : vector<2x1xi1>, vector<2x1xf32>
    %360 = vector.broadcast %359 : vector<2x1xf32> to vector<2x256xf32>
    %361 = arith.mulf %360, %354 : vector<2x256xf32>
    %362 = arith.addf %349, %361 : vector<2x256xf32>
    %c253_i32_67 = arith.constant 253 : i32
    %363 = tpu.dynamic_rotate %289 by %c253_i32_67 dim 1 : vector<2x256xf32>, i32 -> vector<2x256xf32>
    %cst_68 = arith.constant 0.000000e+00 : f32
    %364 = vector.shape_cast %182 : vector<1x256xi1> to vector<1x256xi1>
    %365 = vector.broadcast %364 : vector<1x256xi1> to vector<2x256xi1>
    %366 = vector.broadcast %cst_68 : f32 to vector<2x256xf32>
    %367 = arith.select %365, %363, %366 : vector<2x256xi1>, vector<2x256xf32>
    %c0_i32_69 = arith.constant 0 : i32
    %368 = vector.broadcast %c0_i32_69 : i32 to vector<2x1xi32>
    %369 = arith.cmpi eq, %128, %368 : vector<2x1xi32>
    %370 = vector.broadcast %26 : f32 to vector<2x1xf32>
    %371 = vector.broadcast %75 : f32 to vector<2x1xf32>
    %372 = arith.select %369, %370, %371 : vector<2x1xi1>, vector<2x1xf32>
    %373 = vector.broadcast %372 : vector<2x1xf32> to vector<2x256xf32>
    %374 = arith.mulf %373, %367 : vector<2x256xf32>
    %375 = arith.addf %362, %374 : vector<2x256xf32>
    %c16_i32_70 = arith.constant 16 : i32
    %376 = tpu.dynamic_rotate %12 by %c16_i32_70 dim 1 : vector<2x256xf32>, i32 -> vector<2x256xf32>
    %c16_i32_71 = arith.constant 16 : i32
    %377 = vector.broadcast %c16_i32_71 : i32 to vector<1x256xi32>
    %378 = arith.cmpi sge, %111, %377 : vector<1x256xi32>
    %c256_i32_72 = arith.constant 256 : i32
    %379 = vector.broadcast %c256_i32_72 : i32 to vector<1x256xi32>
    %380 = arith.cmpi slt, %111, %379 : vector<1x256xi32>
    %381 = arith.andi %378, %380 : vector<1x256xi1>
    %cst_73 = arith.constant 0.000000e+00 : f32
    %382 = vector.shape_cast %381 : vector<1x256xi1> to vector<1x256xi1>
    %383 = vector.broadcast %382 : vector<1x256xi1> to vector<2x256xi1>
    %384 = vector.broadcast %cst_73 : f32 to vector<2x256xf32>
    %385 = arith.select %383, %376, %384 : vector<2x256xi1>, vector<2x256xf32>
    %c3_i32_74 = arith.constant 3 : i32
    %386 = tpu.dynamic_rotate %385 by %c3_i32_74 dim 1 : vector<2x256xf32>, i32 -> vector<2x256xf32>
    %cst_75 = arith.constant 0.000000e+00 : f32
    %387 = vector.shape_cast %137 : vector<1x256xi1> to vector<1x256xi1>
    %388 = vector.broadcast %387 : vector<1x256xi1> to vector<2x256xi1>
    %389 = vector.broadcast %cst_75 : f32 to vector<2x256xf32>
    %390 = arith.select %388, %386, %389 : vector<2x256xi1>, vector<2x256xf32>
    %c0_i32_76 = arith.constant 0 : i32
    %391 = vector.broadcast %c0_i32_76 : i32 to vector<2x1xi32>
    %392 = arith.cmpi eq, %128, %391 : vector<2x1xi32>
    %393 = vector.broadcast %27 : f32 to vector<2x1xf32>
    %394 = vector.broadcast %76 : f32 to vector<2x1xf32>
    %395 = arith.select %392, %393, %394 : vector<2x1xi1>, vector<2x1xf32>
    %396 = vector.broadcast %395 : vector<2x1xf32> to vector<2x256xf32>
    %397 = arith.mulf %396, %390 : vector<2x256xf32>
    %398 = arith.addf %375, %397 : vector<2x256xf32>
    %c2_i32_77 = arith.constant 2 : i32
    %399 = tpu.dynamic_rotate %385 by %c2_i32_77 dim 1 : vector<2x256xf32>, i32 -> vector<2x256xf32>
    %cst_78 = arith.constant 0.000000e+00 : f32
    %400 = vector.shape_cast %146 : vector<1x256xi1> to vector<1x256xi1>
    %401 = vector.broadcast %400 : vector<1x256xi1> to vector<2x256xi1>
    %402 = vector.broadcast %cst_78 : f32 to vector<2x256xf32>
    %403 = arith.select %401, %399, %402 : vector<2x256xi1>, vector<2x256xf32>
    %c0_i32_79 = arith.constant 0 : i32
    %404 = vector.broadcast %c0_i32_79 : i32 to vector<2x1xi32>
    %405 = arith.cmpi eq, %128, %404 : vector<2x1xi32>
    %406 = vector.broadcast %28 : f32 to vector<2x1xf32>
    %407 = vector.broadcast %77 : f32 to vector<2x1xf32>
    %408 = arith.select %405, %406, %407 : vector<2x1xi1>, vector<2x1xf32>
    %409 = vector.broadcast %408 : vector<2x1xf32> to vector<2x256xf32>
    %410 = arith.mulf %409, %403 : vector<2x256xf32>
    %411 = arith.addf %398, %410 : vector<2x256xf32>
    %c1_i32_80 = arith.constant 1 : i32
    %412 = tpu.dynamic_rotate %385 by %c1_i32_80 dim 1 : vector<2x256xf32>, i32 -> vector<2x256xf32>
    %cst_81 = arith.constant 0.000000e+00 : f32
    %413 = vector.shape_cast %155 : vector<1x256xi1> to vector<1x256xi1>
    %414 = vector.broadcast %413 : vector<1x256xi1> to vector<2x256xi1>
    %415 = vector.broadcast %cst_81 : f32 to vector<2x256xf32>
    %416 = arith.select %414, %412, %415 : vector<2x256xi1>, vector<2x256xf32>
    %c0_i32_82 = arith.constant 0 : i32
    %417 = vector.broadcast %c0_i32_82 : i32 to vector<2x1xi32>
    %418 = arith.cmpi eq, %128, %417 : vector<2x1xi32>
    %419 = vector.broadcast %29 : f32 to vector<2x1xf32>
    %420 = vector.broadcast %78 : f32 to vector<2x1xf32>
    %421 = arith.select %418, %419, %420 : vector<2x1xi1>, vector<2x1xf32>
    %422 = vector.broadcast %421 : vector<2x1xf32> to vector<2x256xf32>
    %423 = arith.mulf %422, %416 : vector<2x256xf32>
    %424 = arith.addf %411, %423 : vector<2x256xf32>
    %c0_i32_83 = arith.constant 0 : i32
    %425 = vector.broadcast %c0_i32_83 : i32 to vector<2x1xi32>
    %426 = arith.cmpi eq, %128, %425 : vector<2x1xi32>
    %427 = vector.broadcast %30 : f32 to vector<2x1xf32>
    %428 = vector.broadcast %79 : f32 to vector<2x1xf32>
    %429 = arith.select %426, %427, %428 : vector<2x1xi1>, vector<2x1xf32>
    %430 = vector.broadcast %429 : vector<2x1xf32> to vector<2x256xf32>
    %431 = arith.mulf %430, %385 : vector<2x256xf32>
    %432 = arith.addf %424, %431 : vector<2x256xf32>
    %c255_i32_84 = arith.constant 255 : i32
    %433 = tpu.dynamic_rotate %385 by %c255_i32_84 dim 1 : vector<2x256xf32>, i32 -> vector<2x256xf32>
    %cst_85 = arith.constant 0.000000e+00 : f32
    %434 = vector.shape_cast %164 : vector<1x256xi1> to vector<1x256xi1>
    %435 = vector.broadcast %434 : vector<1x256xi1> to vector<2x256xi1>
    %436 = vector.broadcast %cst_85 : f32 to vector<2x256xf32>
    %437 = arith.select %435, %433, %436 : vector<2x256xi1>, vector<2x256xf32>
    %c0_i32_86 = arith.constant 0 : i32
    %438 = vector.broadcast %c0_i32_86 : i32 to vector<2x1xi32>
    %439 = arith.cmpi eq, %128, %438 : vector<2x1xi32>
    %440 = vector.broadcast %31 : f32 to vector<2x1xf32>
    %441 = vector.broadcast %80 : f32 to vector<2x1xf32>
    %442 = arith.select %439, %440, %441 : vector<2x1xi1>, vector<2x1xf32>
    %443 = vector.broadcast %442 : vector<2x1xf32> to vector<2x256xf32>
    %444 = arith.mulf %443, %437 : vector<2x256xf32>
    %445 = arith.addf %432, %444 : vector<2x256xf32>
    %c254_i32_87 = arith.constant 254 : i32
    %446 = tpu.dynamic_rotate %385 by %c254_i32_87 dim 1 : vector<2x256xf32>, i32 -> vector<2x256xf32>
    %cst_88 = arith.constant 0.000000e+00 : f32
    %447 = vector.shape_cast %173 : vector<1x256xi1> to vector<1x256xi1>
    %448 = vector.broadcast %447 : vector<1x256xi1> to vector<2x256xi1>
    %449 = vector.broadcast %cst_88 : f32 to vector<2x256xf32>
    %450 = arith.select %448, %446, %449 : vector<2x256xi1>, vector<2x256xf32>
    %c0_i32_89 = arith.constant 0 : i32
    %451 = vector.broadcast %c0_i32_89 : i32 to vector<2x1xi32>
    %452 = arith.cmpi eq, %128, %451 : vector<2x1xi32>
    %453 = vector.broadcast %32 : f32 to vector<2x1xf32>
    %454 = vector.broadcast %81 : f32 to vector<2x1xf32>
    %455 = arith.select %452, %453, %454 : vector<2x1xi1>, vector<2x1xf32>
    %456 = vector.broadcast %455 : vector<2x1xf32> to vector<2x256xf32>
    %457 = arith.mulf %456, %450 : vector<2x256xf32>
    %458 = arith.addf %445, %457 : vector<2x256xf32>
    %c253_i32_90 = arith.constant 253 : i32
    %459 = tpu.dynamic_rotate %385 by %c253_i32_90 dim 1 : vector<2x256xf32>, i32 -> vector<2x256xf32>
    %cst_91 = arith.constant 0.000000e+00 : f32
    %460 = vector.shape_cast %182 : vector<1x256xi1> to vector<1x256xi1>
    %461 = vector.broadcast %460 : vector<1x256xi1> to vector<2x256xi1>
    %462 = vector.broadcast %cst_91 : f32 to vector<2x256xf32>
    %463 = arith.select %461, %459, %462 : vector<2x256xi1>, vector<2x256xf32>
    %c0_i32_92 = arith.constant 0 : i32
    %464 = vector.broadcast %c0_i32_92 : i32 to vector<2x1xi32>
    %465 = arith.cmpi eq, %128, %464 : vector<2x1xi32>
    %466 = vector.broadcast %33 : f32 to vector<2x1xf32>
    %467 = vector.broadcast %82 : f32 to vector<2x1xf32>
    %468 = arith.select %465, %466, %467 : vector<2x1xi1>, vector<2x1xf32>
    %469 = vector.broadcast %468 : vector<2x1xf32> to vector<2x256xf32>
    %470 = arith.mulf %469, %463 : vector<2x256xf32>
    %471 = arith.addf %458, %470 : vector<2x256xf32>
    %c3_i32_93 = arith.constant 3 : i32
    %472 = tpu.dynamic_rotate %12 by %c3_i32_93 dim 1 : vector<2x256xf32>, i32 -> vector<2x256xf32>
    %cst_94 = arith.constant 0.000000e+00 : f32
    %473 = vector.shape_cast %137 : vector<1x256xi1> to vector<1x256xi1>
    %474 = vector.broadcast %473 : vector<1x256xi1> to vector<2x256xi1>
    %475 = vector.broadcast %cst_94 : f32 to vector<2x256xf32>
    %476 = arith.select %474, %472, %475 : vector<2x256xi1>, vector<2x256xf32>
    %c0_i32_95 = arith.constant 0 : i32
    %477 = vector.broadcast %c0_i32_95 : i32 to vector<2x1xi32>
    %478 = arith.cmpi eq, %128, %477 : vector<2x1xi32>
    %479 = vector.broadcast %34 : f32 to vector<2x1xf32>
    %480 = vector.broadcast %83 : f32 to vector<2x1xf32>
    %481 = arith.select %478, %479, %480 : vector<2x1xi1>, vector<2x1xf32>
    %482 = vector.broadcast %481 : vector<2x1xf32> to vector<2x256xf32>
    %483 = arith.mulf %482, %476 : vector<2x256xf32>
    %484 = arith.addf %471, %483 : vector<2x256xf32>
    %c2_i32_96 = arith.constant 2 : i32
    %485 = tpu.dynamic_rotate %12 by %c2_i32_96 dim 1 : vector<2x256xf32>, i32 -> vector<2x256xf32>
    %cst_97 = arith.constant 0.000000e+00 : f32
    %486 = vector.shape_cast %146 : vector<1x256xi1> to vector<1x256xi1>
    %487 = vector.broadcast %486 : vector<1x256xi1> to vector<2x256xi1>
    %488 = vector.broadcast %cst_97 : f32 to vector<2x256xf32>
    %489 = arith.select %487, %485, %488 : vector<2x256xi1>, vector<2x256xf32>
    %c0_i32_98 = arith.constant 0 : i32
    %490 = vector.broadcast %c0_i32_98 : i32 to vector<2x1xi32>
    %491 = arith.cmpi eq, %128, %490 : vector<2x1xi32>
    %492 = vector.broadcast %35 : f32 to vector<2x1xf32>
    %493 = vector.broadcast %84 : f32 to vector<2x1xf32>
    %494 = arith.select %491, %492, %493 : vector<2x1xi1>, vector<2x1xf32>
    %495 = vector.broadcast %494 : vector<2x1xf32> to vector<2x256xf32>
    %496 = arith.mulf %495, %489 : vector<2x256xf32>
    %497 = arith.addf %484, %496 : vector<2x256xf32>
    %c1_i32_99 = arith.constant 1 : i32
    %498 = tpu.dynamic_rotate %12 by %c1_i32_99 dim 1 : vector<2x256xf32>, i32 -> vector<2x256xf32>
    %cst_100 = arith.constant 0.000000e+00 : f32
    %499 = vector.shape_cast %155 : vector<1x256xi1> to vector<1x256xi1>
    %500 = vector.broadcast %499 : vector<1x256xi1> to vector<2x256xi1>
    %501 = vector.broadcast %cst_100 : f32 to vector<2x256xf32>
    %502 = arith.select %500, %498, %501 : vector<2x256xi1>, vector<2x256xf32>
    %c0_i32_101 = arith.constant 0 : i32
    %503 = vector.broadcast %c0_i32_101 : i32 to vector<2x1xi32>
    %504 = arith.cmpi eq, %128, %503 : vector<2x1xi32>
    %505 = vector.broadcast %36 : f32 to vector<2x1xf32>
    %506 = vector.broadcast %85 : f32 to vector<2x1xf32>
    %507 = arith.select %504, %505, %506 : vector<2x1xi1>, vector<2x1xf32>
    %508 = vector.broadcast %507 : vector<2x1xf32> to vector<2x256xf32>
    %509 = arith.mulf %508, %502 : vector<2x256xf32>
    %510 = arith.addf %497, %509 : vector<2x256xf32>
    %c0_i32_102 = arith.constant 0 : i32
    %511 = vector.broadcast %c0_i32_102 : i32 to vector<2x1xi32>
    %512 = arith.cmpi eq, %128, %511 : vector<2x1xi32>
    %513 = vector.broadcast %37 : f32 to vector<2x1xf32>
    %514 = vector.broadcast %86 : f32 to vector<2x1xf32>
    %515 = arith.select %512, %513, %514 : vector<2x1xi1>, vector<2x1xf32>
    %516 = vector.broadcast %515 : vector<2x1xf32> to vector<2x256xf32>
    %517 = arith.mulf %516, %12 : vector<2x256xf32>
    %518 = arith.addf %510, %517 : vector<2x256xf32>
    %c255_i32_103 = arith.constant 255 : i32
    %519 = tpu.dynamic_rotate %12 by %c255_i32_103 dim 1 : vector<2x256xf32>, i32 -> vector<2x256xf32>
    %cst_104 = arith.constant 0.000000e+00 : f32
    %520 = vector.shape_cast %164 : vector<1x256xi1> to vector<1x256xi1>
    %521 = vector.broadcast %520 : vector<1x256xi1> to vector<2x256xi1>
    %522 = vector.broadcast %cst_104 : f32 to vector<2x256xf32>
    %523 = arith.select %521, %519, %522 : vector<2x256xi1>, vector<2x256xf32>
    %c0_i32_105 = arith.constant 0 : i32
    %524 = vector.broadcast %c0_i32_105 : i32 to vector<2x1xi32>
    %525 = arith.cmpi eq, %128, %524 : vector<2x1xi32>
    %526 = vector.broadcast %38 : f32 to vector<2x1xf32>
    %527 = vector.broadcast %87 : f32 to vector<2x1xf32>
    %528 = arith.select %525, %526, %527 : vector<2x1xi1>, vector<2x1xf32>
    %529 = vector.broadcast %528 : vector<2x1xf32> to vector<2x256xf32>
    %530 = arith.mulf %529, %523 : vector<2x256xf32>
    %531 = arith.addf %518, %530 : vector<2x256xf32>
    %c254_i32_106 = arith.constant 254 : i32
    %532 = tpu.dynamic_rotate %12 by %c254_i32_106 dim 1 : vector<2x256xf32>, i32 -> vector<2x256xf32>
    %cst_107 = arith.constant 0.000000e+00 : f32
    %533 = vector.shape_cast %173 : vector<1x256xi1> to vector<1x256xi1>
    %534 = vector.broadcast %533 : vector<1x256xi1> to vector<2x256xi1>
    %535 = vector.broadcast %cst_107 : f32 to vector<2x256xf32>
    %536 = arith.select %534, %532, %535 : vector<2x256xi1>, vector<2x256xf32>
    %c0_i32_108 = arith.constant 0 : i32
    %537 = vector.broadcast %c0_i32_108 : i32 to vector<2x1xi32>
    %538 = arith.cmpi eq, %128, %537 : vector<2x1xi32>
    %539 = vector.broadcast %39 : f32 to vector<2x1xf32>
    %540 = vector.broadcast %88 : f32 to vector<2x1xf32>
    %541 = arith.select %538, %539, %540 : vector<2x1xi1>, vector<2x1xf32>
    %542 = vector.broadcast %541 : vector<2x1xf32> to vector<2x256xf32>
    %543 = arith.mulf %542, %536 : vector<2x256xf32>
    %544 = arith.addf %531, %543 : vector<2x256xf32>
    %c253_i32_109 = arith.constant 253 : i32
    %545 = tpu.dynamic_rotate %12 by %c253_i32_109 dim 1 : vector<2x256xf32>, i32 -> vector<2x256xf32>
    %cst_110 = arith.constant 0.000000e+00 : f32
    %546 = vector.shape_cast %182 : vector<1x256xi1> to vector<1x256xi1>
    %547 = vector.broadcast %546 : vector<1x256xi1> to vector<2x256xi1>
    %548 = vector.broadcast %cst_110 : f32 to vector<2x256xf32>
    %549 = arith.select %547, %545, %548 : vector<2x256xi1>, vector<2x256xf32>
    %c0_i32_111 = arith.constant 0 : i32
    %550 = vector.broadcast %c0_i32_111 : i32 to vector<2x1xi32>
    %551 = arith.cmpi eq, %128, %550 : vector<2x1xi32>
    %552 = vector.broadcast %40 : f32 to vector<2x1xf32>
    %553 = vector.broadcast %89 : f32 to vector<2x1xf32>
    %554 = arith.select %551, %552, %553 : vector<2x1xi1>, vector<2x1xf32>
    %555 = vector.broadcast %554 : vector<2x1xf32> to vector<2x256xf32>
    %556 = arith.mulf %555, %549 : vector<2x256xf32>
    %557 = arith.addf %544, %556 : vector<2x256xf32>
    %c240_i32 = arith.constant 240 : i32
    %558 = tpu.dynamic_rotate %12 by %c240_i32 dim 1 : vector<2x256xf32>, i32 -> vector<2x256xf32>
    %c0_i32_112 = arith.constant 0 : i32
    %559 = vector.broadcast %c0_i32_112 : i32 to vector<1x256xi32>
    %560 = arith.cmpi sge, %111, %559 : vector<1x256xi32>
    %c240_i32_113 = arith.constant 240 : i32
    %561 = vector.broadcast %c240_i32_113 : i32 to vector<1x256xi32>
    %562 = arith.cmpi slt, %111, %561 : vector<1x256xi32>
    %563 = arith.andi %560, %562 : vector<1x256xi1>
    %cst_114 = arith.constant 0.000000e+00 : f32
    %564 = vector.shape_cast %563 : vector<1x256xi1> to vector<1x256xi1>
    %565 = vector.broadcast %564 : vector<1x256xi1> to vector<2x256xi1>
    %566 = vector.broadcast %cst_114 : f32 to vector<2x256xf32>
    %567 = arith.select %565, %558, %566 : vector<2x256xi1>, vector<2x256xf32>
    %c3_i32_115 = arith.constant 3 : i32
    %568 = tpu.dynamic_rotate %567 by %c3_i32_115 dim 1 : vector<2x256xf32>, i32 -> vector<2x256xf32>
    %cst_116 = arith.constant 0.000000e+00 : f32
    %569 = vector.shape_cast %137 : vector<1x256xi1> to vector<1x256xi1>
    %570 = vector.broadcast %569 : vector<1x256xi1> to vector<2x256xi1>
    %571 = vector.broadcast %cst_116 : f32 to vector<2x256xf32>
    %572 = arith.select %570, %568, %571 : vector<2x256xi1>, vector<2x256xf32>
    %c0_i32_117 = arith.constant 0 : i32
    %573 = vector.broadcast %c0_i32_117 : i32 to vector<2x1xi32>
    %574 = arith.cmpi eq, %128, %573 : vector<2x1xi32>
    %575 = vector.broadcast %41 : f32 to vector<2x1xf32>
    %576 = vector.broadcast %90 : f32 to vector<2x1xf32>
    %577 = arith.select %574, %575, %576 : vector<2x1xi1>, vector<2x1xf32>
    %578 = vector.broadcast %577 : vector<2x1xf32> to vector<2x256xf32>
    %579 = arith.mulf %578, %572 : vector<2x256xf32>
    %580 = arith.addf %557, %579 : vector<2x256xf32>
    %c2_i32_118 = arith.constant 2 : i32
    %581 = tpu.dynamic_rotate %567 by %c2_i32_118 dim 1 : vector<2x256xf32>, i32 -> vector<2x256xf32>
    %cst_119 = arith.constant 0.000000e+00 : f32
    %582 = vector.shape_cast %146 : vector<1x256xi1> to vector<1x256xi1>
    %583 = vector.broadcast %582 : vector<1x256xi1> to vector<2x256xi1>
    %584 = vector.broadcast %cst_119 : f32 to vector<2x256xf32>
    %585 = arith.select %583, %581, %584 : vector<2x256xi1>, vector<2x256xf32>
    %c0_i32_120 = arith.constant 0 : i32
    %586 = vector.broadcast %c0_i32_120 : i32 to vector<2x1xi32>
    %587 = arith.cmpi eq, %128, %586 : vector<2x1xi32>
    %588 = vector.broadcast %42 : f32 to vector<2x1xf32>
    %589 = vector.broadcast %91 : f32 to vector<2x1xf32>
    %590 = arith.select %587, %588, %589 : vector<2x1xi1>, vector<2x1xf32>
    %591 = vector.broadcast %590 : vector<2x1xf32> to vector<2x256xf32>
    %592 = arith.mulf %591, %585 : vector<2x256xf32>
    %593 = arith.addf %580, %592 : vector<2x256xf32>
    %c1_i32_121 = arith.constant 1 : i32
    %594 = tpu.dynamic_rotate %567 by %c1_i32_121 dim 1 : vector<2x256xf32>, i32 -> vector<2x256xf32>
    %cst_122 = arith.constant 0.000000e+00 : f32
    %595 = vector.shape_cast %155 : vector<1x256xi1> to vector<1x256xi1>
    %596 = vector.broadcast %595 : vector<1x256xi1> to vector<2x256xi1>
    %597 = vector.broadcast %cst_122 : f32 to vector<2x256xf32>
    %598 = arith.select %596, %594, %597 : vector<2x256xi1>, vector<2x256xf32>
    %c0_i32_123 = arith.constant 0 : i32
    %599 = vector.broadcast %c0_i32_123 : i32 to vector<2x1xi32>
    %600 = arith.cmpi eq, %128, %599 : vector<2x1xi32>
    %601 = vector.broadcast %43 : f32 to vector<2x1xf32>
    %602 = vector.broadcast %92 : f32 to vector<2x1xf32>
    %603 = arith.select %600, %601, %602 : vector<2x1xi1>, vector<2x1xf32>
    %604 = vector.broadcast %603 : vector<2x1xf32> to vector<2x256xf32>
    %605 = arith.mulf %604, %598 : vector<2x256xf32>
    %606 = arith.addf %593, %605 : vector<2x256xf32>
    %c0_i32_124 = arith.constant 0 : i32
    %607 = vector.broadcast %c0_i32_124 : i32 to vector<2x1xi32>
    %608 = arith.cmpi eq, %128, %607 : vector<2x1xi32>
    %609 = vector.broadcast %44 : f32 to vector<2x1xf32>
    %610 = vector.broadcast %93 : f32 to vector<2x1xf32>
    %611 = arith.select %608, %609, %610 : vector<2x1xi1>, vector<2x1xf32>
    %612 = vector.broadcast %611 : vector<2x1xf32> to vector<2x256xf32>
    %613 = arith.mulf %612, %567 : vector<2x256xf32>
    %614 = arith.addf %606, %613 : vector<2x256xf32>
    %c255_i32_125 = arith.constant 255 : i32
    %615 = tpu.dynamic_rotate %567 by %c255_i32_125 dim 1 : vector<2x256xf32>, i32 -> vector<2x256xf32>
    %cst_126 = arith.constant 0.000000e+00 : f32
    %616 = vector.shape_cast %164 : vector<1x256xi1> to vector<1x256xi1>
    %617 = vector.broadcast %616 : vector<1x256xi1> to vector<2x256xi1>
    %618 = vector.broadcast %cst_126 : f32 to vector<2x256xf32>
    %619 = arith.select %617, %615, %618 : vector<2x256xi1>, vector<2x256xf32>
    %c0_i32_127 = arith.constant 0 : i32
    %620 = vector.broadcast %c0_i32_127 : i32 to vector<2x1xi32>
    %621 = arith.cmpi eq, %128, %620 : vector<2x1xi32>
    %622 = vector.broadcast %45 : f32 to vector<2x1xf32>
    %623 = vector.broadcast %94 : f32 to vector<2x1xf32>
    %624 = arith.select %621, %622, %623 : vector<2x1xi1>, vector<2x1xf32>
    %625 = vector.broadcast %624 : vector<2x1xf32> to vector<2x256xf32>
    %626 = arith.mulf %625, %619 : vector<2x256xf32>
    %627 = arith.addf %614, %626 : vector<2x256xf32>
    %c254_i32_128 = arith.constant 254 : i32
    %628 = tpu.dynamic_rotate %567 by %c254_i32_128 dim 1 : vector<2x256xf32>, i32 -> vector<2x256xf32>
    %cst_129 = arith.constant 0.000000e+00 : f32
    %629 = vector.shape_cast %173 : vector<1x256xi1> to vector<1x256xi1>
    %630 = vector.broadcast %629 : vector<1x256xi1> to vector<2x256xi1>
    %631 = vector.broadcast %cst_129 : f32 to vector<2x256xf32>
    %632 = arith.select %630, %628, %631 : vector<2x256xi1>, vector<2x256xf32>
    %c0_i32_130 = arith.constant 0 : i32
    %633 = vector.broadcast %c0_i32_130 : i32 to vector<2x1xi32>
    %634 = arith.cmpi eq, %128, %633 : vector<2x1xi32>
    %635 = vector.broadcast %46 : f32 to vector<2x1xf32>
    %636 = vector.broadcast %95 : f32 to vector<2x1xf32>
    %637 = arith.select %634, %635, %636 : vector<2x1xi1>, vector<2x1xf32>
    %638 = vector.broadcast %637 : vector<2x1xf32> to vector<2x256xf32>
    %639 = arith.mulf %638, %632 : vector<2x256xf32>
    %640 = arith.addf %627, %639 : vector<2x256xf32>
    %c253_i32_131 = arith.constant 253 : i32
    %641 = tpu.dynamic_rotate %567 by %c253_i32_131 dim 1 : vector<2x256xf32>, i32 -> vector<2x256xf32>
    %cst_132 = arith.constant 0.000000e+00 : f32
    %642 = vector.shape_cast %182 : vector<1x256xi1> to vector<1x256xi1>
    %643 = vector.broadcast %642 : vector<1x256xi1> to vector<2x256xi1>
    %644 = vector.broadcast %cst_132 : f32 to vector<2x256xf32>
    %645 = arith.select %643, %641, %644 : vector<2x256xi1>, vector<2x256xf32>
    %c0_i32_133 = arith.constant 0 : i32
    %646 = vector.broadcast %c0_i32_133 : i32 to vector<2x1xi32>
    %647 = arith.cmpi eq, %128, %646 : vector<2x1xi32>
    %648 = vector.broadcast %47 : f32 to vector<2x1xf32>
    %649 = vector.broadcast %96 : f32 to vector<2x1xf32>
    %650 = arith.select %647, %648, %649 : vector<2x1xi1>, vector<2x1xf32>
    %651 = vector.broadcast %650 : vector<2x1xf32> to vector<2x256xf32>
    %652 = arith.mulf %651, %645 : vector<2x256xf32>
    %653 = arith.addf %640, %652 : vector<2x256xf32>
    %c224_i32 = arith.constant 224 : i32
    %654 = tpu.dynamic_rotate %12 by %c224_i32 dim 1 : vector<2x256xf32>, i32 -> vector<2x256xf32>
    %c0_i32_134 = arith.constant 0 : i32
    %655 = vector.broadcast %c0_i32_134 : i32 to vector<1x256xi32>
    %656 = arith.cmpi sge, %111, %655 : vector<1x256xi32>
    %c224_i32_135 = arith.constant 224 : i32
    %657 = vector.broadcast %c224_i32_135 : i32 to vector<1x256xi32>
    %658 = arith.cmpi slt, %111, %657 : vector<1x256xi32>
    %659 = arith.andi %656, %658 : vector<1x256xi1>
    %cst_136 = arith.constant 0.000000e+00 : f32
    %660 = vector.shape_cast %659 : vector<1x256xi1> to vector<1x256xi1>
    %661 = vector.broadcast %660 : vector<1x256xi1> to vector<2x256xi1>
    %662 = vector.broadcast %cst_136 : f32 to vector<2x256xf32>
    %663 = arith.select %661, %654, %662 : vector<2x256xi1>, vector<2x256xf32>
    %c3_i32_137 = arith.constant 3 : i32
    %664 = tpu.dynamic_rotate %663 by %c3_i32_137 dim 1 : vector<2x256xf32>, i32 -> vector<2x256xf32>
    %cst_138 = arith.constant 0.000000e+00 : f32
    %665 = vector.shape_cast %137 : vector<1x256xi1> to vector<1x256xi1>
    %666 = vector.broadcast %665 : vector<1x256xi1> to vector<2x256xi1>
    %667 = vector.broadcast %cst_138 : f32 to vector<2x256xf32>
    %668 = arith.select %666, %664, %667 : vector<2x256xi1>, vector<2x256xf32>
    %c0_i32_139 = arith.constant 0 : i32
    %669 = vector.broadcast %c0_i32_139 : i32 to vector<2x1xi32>
    %670 = arith.cmpi eq, %128, %669 : vector<2x1xi32>
    %671 = vector.broadcast %48 : f32 to vector<2x1xf32>
    %672 = vector.broadcast %97 : f32 to vector<2x1xf32>
    %673 = arith.select %670, %671, %672 : vector<2x1xi1>, vector<2x1xf32>
    %674 = vector.broadcast %673 : vector<2x1xf32> to vector<2x256xf32>
    %675 = arith.mulf %674, %668 : vector<2x256xf32>
    %676 = arith.addf %653, %675 : vector<2x256xf32>
    %c2_i32_140 = arith.constant 2 : i32
    %677 = tpu.dynamic_rotate %663 by %c2_i32_140 dim 1 : vector<2x256xf32>, i32 -> vector<2x256xf32>
    %cst_141 = arith.constant 0.000000e+00 : f32
    %678 = vector.shape_cast %146 : vector<1x256xi1> to vector<1x256xi1>
    %679 = vector.broadcast %678 : vector<1x256xi1> to vector<2x256xi1>
    %680 = vector.broadcast %cst_141 : f32 to vector<2x256xf32>
    %681 = arith.select %679, %677, %680 : vector<2x256xi1>, vector<2x256xf32>
    %c0_i32_142 = arith.constant 0 : i32
    %682 = vector.broadcast %c0_i32_142 : i32 to vector<2x1xi32>
    %683 = arith.cmpi eq, %128, %682 : vector<2x1xi32>
    %684 = vector.broadcast %49 : f32 to vector<2x1xf32>
    %685 = vector.broadcast %98 : f32 to vector<2x1xf32>
    %686 = arith.select %683, %684, %685 : vector<2x1xi1>, vector<2x1xf32>
    %687 = vector.broadcast %686 : vector<2x1xf32> to vector<2x256xf32>
    %688 = arith.mulf %687, %681 : vector<2x256xf32>
    %689 = arith.addf %676, %688 : vector<2x256xf32>
    %c1_i32_143 = arith.constant 1 : i32
    %690 = tpu.dynamic_rotate %663 by %c1_i32_143 dim 1 : vector<2x256xf32>, i32 -> vector<2x256xf32>
    %cst_144 = arith.constant 0.000000e+00 : f32
    %691 = vector.shape_cast %155 : vector<1x256xi1> to vector<1x256xi1>
    %692 = vector.broadcast %691 : vector<1x256xi1> to vector<2x256xi1>
    %693 = vector.broadcast %cst_144 : f32 to vector<2x256xf32>
    %694 = arith.select %692, %690, %693 : vector<2x256xi1>, vector<2x256xf32>
    %c0_i32_145 = arith.constant 0 : i32
    %695 = vector.broadcast %c0_i32_145 : i32 to vector<2x1xi32>
    %696 = arith.cmpi eq, %128, %695 : vector<2x1xi32>
    %697 = vector.broadcast %50 : f32 to vector<2x1xf32>
    %698 = vector.broadcast %99 : f32 to vector<2x1xf32>
    %699 = arith.select %696, %697, %698 : vector<2x1xi1>, vector<2x1xf32>
    %700 = vector.broadcast %699 : vector<2x1xf32> to vector<2x256xf32>
    %701 = arith.mulf %700, %694 : vector<2x256xf32>
    %702 = arith.addf %689, %701 : vector<2x256xf32>
    %c0_i32_146 = arith.constant 0 : i32
    %703 = vector.broadcast %c0_i32_146 : i32 to vector<2x1xi32>
    %704 = arith.cmpi eq, %128, %703 : vector<2x1xi32>
    %705 = vector.broadcast %51 : f32 to vector<2x1xf32>
    %706 = vector.broadcast %100 : f32 to vector<2x1xf32>
    %707 = arith.select %704, %705, %706 : vector<2x1xi1>, vector<2x1xf32>
    %708 = vector.broadcast %707 : vector<2x1xf32> to vector<2x256xf32>
    %709 = arith.mulf %708, %663 : vector<2x256xf32>
    %710 = arith.addf %702, %709 : vector<2x256xf32>
    %c255_i32_147 = arith.constant 255 : i32
    %711 = tpu.dynamic_rotate %663 by %c255_i32_147 dim 1 : vector<2x256xf32>, i32 -> vector<2x256xf32>
    %cst_148 = arith.constant 0.000000e+00 : f32
    %712 = vector.shape_cast %164 : vector<1x256xi1> to vector<1x256xi1>
    %713 = vector.broadcast %712 : vector<1x256xi1> to vector<2x256xi1>
    %714 = vector.broadcast %cst_148 : f32 to vector<2x256xf32>
    %715 = arith.select %713, %711, %714 : vector<2x256xi1>, vector<2x256xf32>
    %c0_i32_149 = arith.constant 0 : i32
    %716 = vector.broadcast %c0_i32_149 : i32 to vector<2x1xi32>
    %717 = arith.cmpi eq, %128, %716 : vector<2x1xi32>
    %718 = vector.broadcast %52 : f32 to vector<2x1xf32>
    %719 = vector.broadcast %101 : f32 to vector<2x1xf32>
    %720 = arith.select %717, %718, %719 : vector<2x1xi1>, vector<2x1xf32>
    %721 = vector.broadcast %720 : vector<2x1xf32> to vector<2x256xf32>
    %722 = arith.mulf %721, %715 : vector<2x256xf32>
    %723 = arith.addf %710, %722 : vector<2x256xf32>
    %c254_i32_150 = arith.constant 254 : i32
    %724 = tpu.dynamic_rotate %663 by %c254_i32_150 dim 1 : vector<2x256xf32>, i32 -> vector<2x256xf32>
    %cst_151 = arith.constant 0.000000e+00 : f32
    %725 = vector.shape_cast %173 : vector<1x256xi1> to vector<1x256xi1>
    %726 = vector.broadcast %725 : vector<1x256xi1> to vector<2x256xi1>
    %727 = vector.broadcast %cst_151 : f32 to vector<2x256xf32>
    %728 = arith.select %726, %724, %727 : vector<2x256xi1>, vector<2x256xf32>
    %c0_i32_152 = arith.constant 0 : i32
    %729 = vector.broadcast %c0_i32_152 : i32 to vector<2x1xi32>
    %730 = arith.cmpi eq, %128, %729 : vector<2x1xi32>
    %731 = vector.broadcast %53 : f32 to vector<2x1xf32>
    %732 = vector.broadcast %102 : f32 to vector<2x1xf32>
    %733 = arith.select %730, %731, %732 : vector<2x1xi1>, vector<2x1xf32>
    %734 = vector.broadcast %733 : vector<2x1xf32> to vector<2x256xf32>
    %735 = arith.mulf %734, %728 : vector<2x256xf32>
    %736 = arith.addf %723, %735 : vector<2x256xf32>
    %c253_i32_153 = arith.constant 253 : i32
    %737 = tpu.dynamic_rotate %663 by %c253_i32_153 dim 1 : vector<2x256xf32>, i32 -> vector<2x256xf32>
    %cst_154 = arith.constant 0.000000e+00 : f32
    %738 = vector.shape_cast %182 : vector<1x256xi1> to vector<1x256xi1>
    %739 = vector.broadcast %738 : vector<1x256xi1> to vector<2x256xi1>
    %740 = vector.broadcast %cst_154 : f32 to vector<2x256xf32>
    %741 = arith.select %739, %737, %740 : vector<2x256xi1>, vector<2x256xf32>
    %c0_i32_155 = arith.constant 0 : i32
    %742 = vector.broadcast %c0_i32_155 : i32 to vector<2x1xi32>
    %743 = arith.cmpi eq, %128, %742 : vector<2x1xi32>
    %744 = vector.broadcast %54 : f32 to vector<2x1xf32>
    %745 = vector.broadcast %103 : f32 to vector<2x1xf32>
    %746 = arith.select %743, %744, %745 : vector<2x1xi1>, vector<2x1xf32>
    %747 = vector.broadcast %746 : vector<2x1xf32> to vector<2x256xf32>
    %748 = arith.mulf %747, %741 : vector<2x256xf32>
    %749 = arith.addf %736, %748 : vector<2x256xf32>
    %c208_i32 = arith.constant 208 : i32
    %750 = tpu.dynamic_rotate %12 by %c208_i32 dim 1 : vector<2x256xf32>, i32 -> vector<2x256xf32>
    %c0_i32_156 = arith.constant 0 : i32
    %751 = vector.broadcast %c0_i32_156 : i32 to vector<1x256xi32>
    %752 = arith.cmpi sge, %111, %751 : vector<1x256xi32>
    %c208_i32_157 = arith.constant 208 : i32
    %753 = vector.broadcast %c208_i32_157 : i32 to vector<1x256xi32>
    %754 = arith.cmpi slt, %111, %753 : vector<1x256xi32>
    %755 = arith.andi %752, %754 : vector<1x256xi1>
    %cst_158 = arith.constant 0.000000e+00 : f32
    %756 = vector.shape_cast %755 : vector<1x256xi1> to vector<1x256xi1>
    %757 = vector.broadcast %756 : vector<1x256xi1> to vector<2x256xi1>
    %758 = vector.broadcast %cst_158 : f32 to vector<2x256xf32>
    %759 = arith.select %757, %750, %758 : vector<2x256xi1>, vector<2x256xf32>
    %c3_i32_159 = arith.constant 3 : i32
    %760 = tpu.dynamic_rotate %759 by %c3_i32_159 dim 1 : vector<2x256xf32>, i32 -> vector<2x256xf32>
    %cst_160 = arith.constant 0.000000e+00 : f32
    %761 = vector.shape_cast %137 : vector<1x256xi1> to vector<1x256xi1>
    %762 = vector.broadcast %761 : vector<1x256xi1> to vector<2x256xi1>
    %763 = vector.broadcast %cst_160 : f32 to vector<2x256xf32>
    %764 = arith.select %762, %760, %763 : vector<2x256xi1>, vector<2x256xf32>
    %c0_i32_161 = arith.constant 0 : i32
    %765 = vector.broadcast %c0_i32_161 : i32 to vector<2x1xi32>
    %766 = arith.cmpi eq, %128, %765 : vector<2x1xi32>
    %767 = vector.broadcast %55 : f32 to vector<2x1xf32>
    %768 = vector.broadcast %104 : f32 to vector<2x1xf32>
    %769 = arith.select %766, %767, %768 : vector<2x1xi1>, vector<2x1xf32>
    %770 = vector.broadcast %769 : vector<2x1xf32> to vector<2x256xf32>
    %771 = arith.mulf %770, %764 : vector<2x256xf32>
    %772 = arith.addf %749, %771 : vector<2x256xf32>
    %c2_i32_162 = arith.constant 2 : i32
    %773 = tpu.dynamic_rotate %759 by %c2_i32_162 dim 1 : vector<2x256xf32>, i32 -> vector<2x256xf32>
    %cst_163 = arith.constant 0.000000e+00 : f32
    %774 = vector.shape_cast %146 : vector<1x256xi1> to vector<1x256xi1>
    %775 = vector.broadcast %774 : vector<1x256xi1> to vector<2x256xi1>
    %776 = vector.broadcast %cst_163 : f32 to vector<2x256xf32>
    %777 = arith.select %775, %773, %776 : vector<2x256xi1>, vector<2x256xf32>
    %c0_i32_164 = arith.constant 0 : i32
    %778 = vector.broadcast %c0_i32_164 : i32 to vector<2x1xi32>
    %779 = arith.cmpi eq, %128, %778 : vector<2x1xi32>
    %780 = vector.broadcast %56 : f32 to vector<2x1xf32>
    %781 = vector.broadcast %105 : f32 to vector<2x1xf32>
    %782 = arith.select %779, %780, %781 : vector<2x1xi1>, vector<2x1xf32>
    %783 = vector.broadcast %782 : vector<2x1xf32> to vector<2x256xf32>
    %784 = arith.mulf %783, %777 : vector<2x256xf32>
    %785 = arith.addf %772, %784 : vector<2x256xf32>
    %c1_i32_165 = arith.constant 1 : i32
    %786 = tpu.dynamic_rotate %759 by %c1_i32_165 dim 1 : vector<2x256xf32>, i32 -> vector<2x256xf32>
    %cst_166 = arith.constant 0.000000e+00 : f32
    %787 = vector.shape_cast %155 : vector<1x256xi1> to vector<1x256xi1>
    %788 = vector.broadcast %787 : vector<1x256xi1> to vector<2x256xi1>
    %789 = vector.broadcast %cst_166 : f32 to vector<2x256xf32>
    %790 = arith.select %788, %786, %789 : vector<2x256xi1>, vector<2x256xf32>
    %c0_i32_167 = arith.constant 0 : i32
    %791 = vector.broadcast %c0_i32_167 : i32 to vector<2x1xi32>
    %792 = arith.cmpi eq, %128, %791 : vector<2x1xi32>
    %793 = vector.broadcast %57 : f32 to vector<2x1xf32>
    %794 = vector.broadcast %106 : f32 to vector<2x1xf32>
    %795 = arith.select %792, %793, %794 : vector<2x1xi1>, vector<2x1xf32>
    %796 = vector.broadcast %795 : vector<2x1xf32> to vector<2x256xf32>
    %797 = arith.mulf %796, %790 : vector<2x256xf32>
    %798 = arith.addf %785, %797 : vector<2x256xf32>
    %c0_i32_168 = arith.constant 0 : i32
    %799 = vector.broadcast %c0_i32_168 : i32 to vector<2x1xi32>
    %800 = arith.cmpi eq, %128, %799 : vector<2x1xi32>
    %801 = vector.broadcast %58 : f32 to vector<2x1xf32>
    %802 = vector.broadcast %107 : f32 to vector<2x1xf32>
    %803 = arith.select %800, %801, %802 : vector<2x1xi1>, vector<2x1xf32>
    %804 = vector.broadcast %803 : vector<2x1xf32> to vector<2x256xf32>
    %805 = arith.mulf %804, %759 : vector<2x256xf32>
    %806 = arith.addf %798, %805 : vector<2x256xf32>
    %c255_i32_169 = arith.constant 255 : i32
    %807 = tpu.dynamic_rotate %759 by %c255_i32_169 dim 1 : vector<2x256xf32>, i32 -> vector<2x256xf32>
    %cst_170 = arith.constant 0.000000e+00 : f32
    %808 = vector.shape_cast %164 : vector<1x256xi1> to vector<1x256xi1>
    %809 = vector.broadcast %808 : vector<1x256xi1> to vector<2x256xi1>
    %810 = vector.broadcast %cst_170 : f32 to vector<2x256xf32>
    %811 = arith.select %809, %807, %810 : vector<2x256xi1>, vector<2x256xf32>
    %c0_i32_171 = arith.constant 0 : i32
    %812 = vector.broadcast %c0_i32_171 : i32 to vector<2x1xi32>
    %813 = arith.cmpi eq, %128, %812 : vector<2x1xi32>
    %814 = vector.broadcast %59 : f32 to vector<2x1xf32>
    %815 = vector.broadcast %108 : f32 to vector<2x1xf32>
    %816 = arith.select %813, %814, %815 : vector<2x1xi1>, vector<2x1xf32>
    %817 = vector.broadcast %816 : vector<2x1xf32> to vector<2x256xf32>
    %818 = arith.mulf %817, %811 : vector<2x256xf32>
    %819 = arith.addf %806, %818 : vector<2x256xf32>
    %c254_i32_172 = arith.constant 254 : i32
    %820 = tpu.dynamic_rotate %759 by %c254_i32_172 dim 1 : vector<2x256xf32>, i32 -> vector<2x256xf32>
    %cst_173 = arith.constant 0.000000e+00 : f32
    %821 = vector.shape_cast %173 : vector<1x256xi1> to vector<1x256xi1>
    %822 = vector.broadcast %821 : vector<1x256xi1> to vector<2x256xi1>
    %823 = vector.broadcast %cst_173 : f32 to vector<2x256xf32>
    %824 = arith.select %822, %820, %823 : vector<2x256xi1>, vector<2x256xf32>
    %c0_i32_174 = arith.constant 0 : i32
    %825 = vector.broadcast %c0_i32_174 : i32 to vector<2x1xi32>
    %826 = arith.cmpi eq, %128, %825 : vector<2x1xi32>
    %827 = vector.broadcast %60 : f32 to vector<2x1xf32>
    %828 = vector.broadcast %109 : f32 to vector<2x1xf32>
    %829 = arith.select %826, %827, %828 : vector<2x1xi1>, vector<2x1xf32>
    %830 = vector.broadcast %829 : vector<2x1xf32> to vector<2x256xf32>
    %831 = arith.mulf %830, %824 : vector<2x256xf32>
    %832 = arith.addf %819, %831 : vector<2x256xf32>
    %c253_i32_175 = arith.constant 253 : i32
    %833 = tpu.dynamic_rotate %759 by %c253_i32_175 dim 1 : vector<2x256xf32>, i32 -> vector<2x256xf32>
    %cst_176 = arith.constant 0.000000e+00 : f32
    %834 = vector.shape_cast %182 : vector<1x256xi1> to vector<1x256xi1>
    %835 = vector.broadcast %834 : vector<1x256xi1> to vector<2x256xi1>
    %836 = vector.broadcast %cst_176 : f32 to vector<2x256xf32>
    %837 = arith.select %835, %833, %836 : vector<2x256xi1>, vector<2x256xf32>
    %c0_i32_177 = arith.constant 0 : i32
    %838 = vector.broadcast %c0_i32_177 : i32 to vector<2x1xi32>
    %839 = arith.cmpi eq, %128, %838 : vector<2x1xi32>
    %840 = vector.broadcast %61 : f32 to vector<2x1xf32>
    %841 = vector.broadcast %110 : f32 to vector<2x1xf32>
    %842 = arith.select %839, %840, %841 : vector<2x1xi1>, vector<2x1xf32>
    %843 = vector.broadcast %842 : vector<2x1xf32> to vector<2x256xf32>
    %844 = arith.mulf %843, %837 : vector<2x256xf32>
    %845 = arith.addf %832, %844 : vector<2x256xf32>
    %cst_178 = arith.constant dense<0.000000e+00> : vector<256xf32>
    %846 = vector.multi_reduction <add>, %845, %cst_178 [0] : vector<2x256xf32> to vector<256xf32>
    %847 = vector.shape_cast %846 : vector<256xf32> to vector<1x256xf32>
    %848 = arith.negf %847 : vector<1x256xf32>
    %849 = math.exp %848 : vector<1x256xf32>
    %cst_179 = arith.constant 1.000000e+00 : f32
    %850 = vector.broadcast %cst_179 : f32 to vector<1x256xf32>
    %851 = arith.addf %850, %849 : vector<1x256xf32>
    %852 = arith.divf %850, %851 : vector<1x256xf32>
    %c0_180 = arith.constant 0 : index
    %c0_181 = arith.constant 0 : index
    %c0_182 = arith.constant 0 : index
    %853 = vector.load %arg2[%c0_180, %c0_181, %c0_182] : memref<1x4x256xf32, #tpu.memory_space<vmem>>, vector<1x4x256xf32>
    %854 = vector.shape_cast %853 : vector<1x4x256xf32> to vector<4x256xf32>
    %855 = vector.shape_cast %852 : vector<1x256xf32> to vector<1x256xf32>
    %856 = vector.broadcast %855 : vector<1x256xf32> to vector<4x256xf32>
    %857 = arith.mulf %854, %856 : vector<4x256xf32>
    %c0_183 = arith.constant 0 : index
    %c0_184 = arith.constant 0 : index
    %c0_185 = arith.constant 0 : index
    %858 = vector.load %arg3[%c0_183, %c0_184, %c0_185] : memref<1x4x256xf32, #tpu.memory_space<vmem>>, vector<1x4x256xf32>
    %859 = vector.shape_cast %858 : vector<1x4x256xf32> to vector<4x256xf32>
    %860 = vector.shape_cast %857 : vector<4x256xf32> to vector<1x4x256xf32>
    tpu.vector_store %arg3[%c0_183, %c0_184, %c0_185], %860 {strides = array<i32>} : memref<1x4x256xf32, #tpu.memory_space<vmem>>, vector<1x4x256xf32>,
    return
  }
  func.func @transform_0(%arg0: i32) -> i32 {
    %c0_i32 = arith.constant 0 : i32
    %c0_i32_0 = arith.constant 0 : i32
    return %c0_i32 : i32
  }
  func.func @transform_1(%arg0: i32) -> (i32, i32, i32) {
    %c0_i32 = arith.constant 0 : i32
    %c0_i32_0 = arith.constant 0 : i32
    %c0_i32_1 = arith.constant 0 : i32
    return %arg0, %c0_i32, %c0_i32_0 : i32, i32, i32
  }
  func.func @transform_2(%arg0: i32) -> (i32, i32, i32) {
    %c0_i32 = arith.constant 0 : i32
    %c0_i32_0 = arith.constant 0 : i32
    %c0_i32_1 = arith.constant 0 : i32
    return %arg0, %c0_i32, %c0_i32_0 : i32, i32, i32
  }
}

</mosaic_0001>

<bundles_post_ra>
// kernel: tpu_custom_call.1
= control target key start
LH: loop header
LB: loop body
LE: loop exit
PB: predicated region body
PF: predicated region fallthrough
CT: control target
= control target key end

     0   :  { %s3187_s0 = inlined_call_operand.hbm [shape: f32[98], index: 0, kind: input, shape index: {}]   ;;  %s3188_s1 = inlined_call_operand.hbm [shape: f32[2,4,256], index: 1, kind: input, shape index: {}]   ;;  %s3189_s2 = inlined_call_operand.hbm [shape: f32[2,4,256], index: 2, kind: output, shape index: {}]  }
   0x1   :  { %3218 = sst [smem:[#allocation31_spill]] %s3187_s0 }
   0x2   :  { %3219 = sst [smem:[#allocation32_spill]] %s3188_s1 }
   0x3   :  { %7 = vsyncpa [#allocation5], 0 }
   0x4   :  { %8 = vsyncpa [#allocation3], 0 }
   0x5   :  { %10 = vsyncpa [#allocation3 + $0x1], 0 }
   0x6   :  { %11 = vsyncpa [#allocation4], 0 }
   0x7   :  { %13 = vsyncpa [#allocation4 + $0x1], 0  ;;  %s1713_s9 = smov 0   ;;  %s1715_s10 = smov 0  }
   0x8   :  { %s1717_s11 = smov 0   ;;  %s1719_s12 = smov 0  }
   0x9 LB: > { %s1734_s13 = sadd.s32 4294967295, %s1683_s12   ;;  %s1374_s14 = sadd.s32 4294967294, %s1683_s12   ;;  %s1683_s12 = sphi %s1719_s12, %s3323_s12   ;;  %s1679_s11 = sphi %s1717_s11, %s3322_s11   ;;  %s1675_s10 = sphi %s1715_s10, %s3321_s10   ;;  %s1671_s9 = sphi %s1713_s9, %s3320_s9  }
   0xa   : > { %p60_p0 = scmp.ne.s32.totalorder %s1675_s10, %s1671_s9  ;;  %p61_p1 = scmp.eq.s32.totalorder %s1734_s13, 0 }
   0xb   : > { %p84_p2 = scmp.eq.s32.totalorder %s1734_s13, 1  ;;  %p90_p3 = scmp.eq.s32.totalorder %s1374_s14, 1 }
   0xc   : > { %p1743_p4 = por %p61_p1, %p60_p0  ;;  %p1375_p5 = scmp.ge.s32.totalorder %s1683_s12, 1 }
   0xd   : > { %p1748_p6 = por %p90_p3, %p60_p0  ;;  %p97_p7 = scmp.lt.s32.totalorder %s1683_s12, 3 }
   0xe   : > { %s3222_s0 = sld [smem:[#allocation31_spill]]  ;;  %s1764_s21 = sadd.s32 1, %s1683_s12  }
   0xf   : > { %p1756_p8 = pnand %p1375_p5, %p97_p7  ;;  %s44_s22 = ssub.s32 %s1683_s12, %s1764_s21 }
  0x10   : > { %p45_p12 = scmp.eq.s32.totalorder %s44_s22, 0  ;;  %s47_s23 = sadd.s32 1, %s1679_s11 }
  0x11   : > { %p1499_p10 = pneg %p1756_p8  ;;  %p54_p13 = scmp.ne.s32.totalorder %s1679_s11, %s1675_s10 }
  0x12   : > { %s1685_s24 = smov [#allocation2]   ;;  %p55_p0 = scmp.eq.s32.totalorder %s1683_s12, 0 }
  0x13   : > { %p1500_p11 = pnand %p1499_p10, %p61_p1  ;;  %p1779_p3 = por %p84_p2, %p54_p13 }
  0x14   : > { %s109_s19 = sshll.u32 %s3222_s0, 4  ;;  %s120_s27 = sand.u32 1, %s1679_s11   ;;  %s110_s19 = int_to_ptr.hbm [resolvable:$true] %s109_s19 }
  0x15   : > { %1502 = dma.hbm_to_smem (!%p1500_p11), %s110_s19, 16, %s1685_s24, [#allocation5]  }
  0x16   : > { %s1774_s25 = scalar_select %p45_p12, %s1679_s11, %s47_s23  }
  0x17   : > { %p56_p5 = por %p55_p0, %p54_p13  ;;  %p1512_p7 = scmp.lt.s32.totalorder %s1683_s12, 2 }
  0x18   : > { %s1378_s28 = sshll.u32 %s120_s27, 3  ;;  %s1489_s29 = sshll.u32 %s1683_s12, 3 }
  0x19   : > { %s3225_s1 = sld [smem:[#allocation32_spill]]  ;;  %s124_s6 = scalar_lea.vmem [#allocation6], %s1378_s28 }
  0x1a   : > { %s133_s7 = sshll.u32 %s124_s6, 4  ;;  %p1789_p10 = pnand %p1512_p7, %p56_p5  ;;  %s134_s7 = int_to_ptr.vmem [resolvable:$true] %s133_s7 }
  0x1b   : > { %s121_s14 = scalar_lea.sflag [#allocation3], %s120_s27 }
  0x1c   : > { %p1587_p11 = pneg %p1789_p10 }
  0x1f   : > { %s129_s4 = scalar_lea.hbm %s3225_s1, %s1489_s29  ;;  %s1590_s23 = scalar_lea.hbm %s3225_s1, 16 }
  0x20   : > { %s131_s5 = sshll.u32 %s129_s4, 4  ;;  %s132_s5 = int_to_ptr.hbm [resolvable:$true] %s131_s5 }
  0x21   : > { %s1583_s17 = sshra.s32 %s132_s5, 4  ;;  %s1584_s17 = int_to_ptr.hbm [resolvable:$true] %s1583_s17 }
  0x22   : > { %s1585_s18 = scalar_lea.hbm %s1584_s17, 8  ;;  %p1591_p0 = scmp.lt.s32.totalorder %s1584_s17, %s3225_s1 }
  0x23   : > { %p1586_p2 = scmp.ne.s32.totalorder %s1584_s17, %s1585_s18  ;;  %p1592_p5 = scmp.lt.s32.totalorder %s1590_s23, %s1585_s18 }
  0x25   : > { %p1588_p12 = pnand %p1587_p11, %p1586_p2  ;;  %p1593_p7 = por %p1592_p5, %p1591_p0 }
  0x27   : > { %p1589_p13 = pneg %p1588_p12 }
  0x29   : > { %p1594_p9 = pnand %p1593_p7, %p1589_p13 }
  0x2b   : > { %1597 = shalt.err (!%p1594_p9)
}
  0x2c   : > { %1506 = dma.hbm_to_vmem [thread:$0]  (!%p1789_p10), %s132_s5, 128, %s134_s7, %s121_s14  }
  0x2d   : > { %142 = sbr.rel (%p1756_p8) target bundleno = 579 (0x243), region = 28 }
  0x32   : > { %1658 = dma.done.wait (%p61_p1), [#allocation5], 16  }
  0x33   : > { %1660 = vsyncadd (%p61_p1), [#allocation5], 4294967280  ;;  %s1810_s27 = sand.u32 1, %s1675_s10  }
  0x34   : > { %s3190_s29 = sshll.u32 %s1810_s27, 3  ;;  %s150_s30 = scalar_lea.sflag [#allocation3], %s1810_s27 }
  0x35   : > { %s153_s3 = scalar_lea.vmem [#allocation6], %s3190_s29 }
  0x36   : > { %1662 = dma.done.wait (%p1743_p4), %s150_s30, 128  }
  0x37   : > { %1664 = vsyncadd (%p1743_p4), %s150_s30, 4294967168 }
  0x38   : > { %159 = sfence }
  0x39   : > { %v1820_v0 = vld [vmem:[%s153_s3] sm:$0xff]  ;;  %vm3210_vm0 = vcmask 1043456   ;;  %vm221_vm1 = vcmask 1040384   ;;  %s1686_s15 = smov 48   ;;  %s1687_s20 = smov 16   ;;  %v322_v37 = vlaneseq }
  0x3a   : > { %3227 = vst [vmem:[#allocation11_spill] sm:$0xff] %v1820_v0  ;;  %s1688_s4 = smov 32   ;;  %s1689_s5 = smov 112  }
  0x3b   : > { %178 = vst [vmem:[#allocation1] ss:$2 sm:$0xff] %v1820_v0  ;;  %s1690_s6 = smov 96   ;;  %s3191_s7 = smov 3   ;;  %v1863_v39 = vand.u32 127, %v322_v37 }
  0x3c   : > { %s1692_s8 = smov 80   ;;  %s3193_s14 = smov 2  }
  0x3d   : > { %s3195_s17 = smov 1   ;;  %s1695_s18 = smov 127   ;;  %vm403_vm2 = vcmp.lt.s32.totalorder %v1863_v39, 48  ;;  %vm550_vm3 = vcmp.lt.s32.totalorder %v1863_v39, 32  ;;  %vm664_vm4 = vcmp.lt.s32.totalorder %v1863_v39, 16  ;;  %vm406_vm5 = vcmp.ge.s32.totalorder %v1863_v39, 48 }
  0x3e   : > { %s1696_s19 = smov 126   ;;  %s3197_s22 = smov 125   ;;  %vm422_vm6 = vcmp.lt.s32.totalorder %v1863_v39, 3  ;;  %vm553_vm7 = vcmp.ge.s32.totalorder %v1863_v39, 32  ;;  %v1950_v62 = vadd.s32 128, %v1863_v39  ;;  %vm1105_vm8 = vcmp.lt.s32.totalorder %v1863_v39, 80 }
  0x3f   : > { %vm3216_vm10 = vcmp.lt.s32.totalorder %v1863_v39, 2  ;;  %vm463_vm11 = vcmp.lt.s32.totalorder %v1863_v39, 1  ;;  %vm667_vm12 = vcmp.ge.s32.totalorder %v1863_v39, 16  ;;  %vm3212_vm13 = vcmp.lt.s32.totalorder %v1863_v39, 127  ;;  %s2100_s23 = sld [smem:[#allocation2 + $0x3]] }
  0x40   : > { %vm1109_vm9 = vcmp.lt.s32.totalorder %v1950_v62, 208  ;;  %vm875_vm14 = vcmp.lt.s32.totalorder %v1863_v39, 112  ;;  %vm881_vm15 = vcmp.lt.s32.totalorder %v1950_v62, 240  ;;  %s2104_s24 = sld [smem:[#allocation2 + $0x34]] }
  0x41   : > { %s2110_s28 = sld [smem:[#allocation2 + $0xa]] }
  0x42   : > { %v179_v1 = vld.sshfl [vmem:[#allocation1] sm:$0xff pattern:$0x75316420]  ;;  %v180_v2 = vld.sshfl [vmem:[#allocation1 + $0x8] sm:$0xff pattern:$0x75316420] }
  0x43   : > { %v184_v3 = vsel %vm3210_vm0, %v179_v1, 0.0  ;;  %200 = vst [vmem:[#allocation1] ss:$2 sm:$0xff] %v1820_v0  ;;  %v191_v4 = vsel %vm3210_vm0, %v180_v2, 0.0  ;;  %s2114_s30 = sld [smem:[#allocation2 + $0x3b]] }
  0x44   : > { %v185_v5 = vrot.slane %v184_v3, 4  ;;  %v192_v6 = vrot.slane %v191_v4, 4  ;;  %s2116_s3 = sld [smem:[#allocation2 + $0x11]] }
  0x45   : > { %s2140_s29 = sld [smem:[#allocation2 + $0x32]] }
  0x46   : > { %v186_v7 = vadd.f32 %v185_v5, %v184_v3  ;;  %v193_v8 = vadd.f32 %v192_v6, %v191_v4  ;;  %s2164_s0 = sld [smem:[#allocation2 + $0x2]] }
  0x47   : > { %s2169_s1 = sld [smem:[#allocation2 + $0x33]] }
  0x48   : > { %v187_v9 = vrot.slane %v186_v7, 2  ;;  %v194_v10 = vrot.slane %v193_v8, 2 }
  0x4a   : > { %v188_v11 = vadd.f32 %v187_v9, %v186_v7  ;;  %v201_v12 = vld.sshfl [vmem:[#allocation1] sm:$0xff pattern:$0x75316420]  ;;  %v202_v13 = vld.sshfl [vmem:[#allocation1 + $0x8] sm:$0xff pattern:$0x75316420]  ;;  %v195_v20 = vadd.f32 %v194_v10, %v193_v8 }
  0x4b   : > { %v205_v14 = vsel %vm3210_vm0, %v201_v12, -inf  ;;  %v212_v15 = vsel %vm3210_vm0, %v202_v13, -inf }
  0x4c   : > { %v189_v16 = vrot.slane %v188_v11, 1  ;;  %v206_v17 = vrot.slane %v205_v14, 4  ;;  %v213_v18 = vrot.slane %v212_v15, 4  ;;  %v196_v26 = vrot.slane %v195_v20, 1 }
  0x4e   : > { %v207_v19 = vmax.f32 %v205_v14, %v206_v17  ;;  %v214_v21 = vmax.f32 %v212_v15, %v213_v18  ;;  %v190_v22 = vadd.f32 %v189_v16, %v188_v11  ;;  %v197_v31 = vadd.f32 %v196_v26, %v195_v20 }
  0x50   : > { %v208_v23 = vrot.slane %v207_v19, 2  ;;  %v215_v24 = vrot.slane %v214_v21, 2  ;;  %v219_v29 = vmul.f32 0.25, %v190_v22  ;;  %v220_v35 = vmul.f32 0.25, %v197_v31 }
  0x52   : > { %v209_v25 = vmax.f32 %v207_v19, %v208_v23  ;;  %v216_v27 = vmax.f32 %v214_v21, %v215_v24 }
  0x54   : > { %v210_v28 = vrot.slane %v209_v25, 1  ;;  %v217_v32 = vrot.slane %v216_v27, 1 }
  0x56   : > { %v211_v30 = vmax.f32 %v209_v25, %v210_v28  ;;  %v218_v34 = vmax.f32 %v216_v27, %v217_v32 }
  0x58   : > { %v1828_v33 = vsel %vm221_vm1, %v219_v29, %v211_v30  ;;  %v1833_v36 = vsel %vm221_vm1, %v220_v35, %v218_v34  ;;  %vm991_vm1 = vcmp.lt.s32.totalorder %v1863_v39, 96 }
  0x59   : > { %3228 = vst [vmem:[#allocation12_spill] sm:$0xff] %v1828_v33  ;;  %399 = vrot.lane.b32.xlu0 %v1828_v33, %s1686_s15  ;;  %660 = vrot.lane.b32.xlu1 %v1828_v33, %s1687_s20 }
  0x5a   : > { %546 = vrot.lane.b32.xlu2 %v1828_v33, %s1688_s4  ;;  %3229 = vst [vmem:[#allocation13_spill] sm:$0xff] %v1833_v36 }
  0x61   : > { %401 = vrot.lane.b32.xlu0 %v1833_v36, %s1686_s15  ;;  %873 = vrot.lane.b32.xlu1 %v1833_v36, %s1689_s5  ;;  %s2118_s15 = sld [smem:[#allocation2 + $0x42]] }
  0x62   : > { %662 = vrot.lane.b32.xlu2 %v1833_v36, %s1687_s20  ;;  %s2120_s20 = sld [smem:[#allocation2 + $0x15]] }
  0x69   : > { %548 = vrot.lane.b32.xlu0 %v1833_v36, %s1688_s4  ;;  %987 = vrot.lane.b32.xlu1 %v1828_v33, %s1690_s6  ;;  %s2122_s4 = sld [smem:[#allocation2 + $0x46]] }
  0x6a   : > { %989 = vrot.lane.b32.xlu2 %v1833_v36, %s1690_s6  ;;  %s2130_s6 = sld [smem:[#allocation2 + $0x47]] }
  0x71   : > { %871 = vrot.lane.b32.xlu0 %v1828_v33, %s1689_s5  ;;  %774 = vrot.lane.b32.xlu1 %v1828_v33, %s3191_s7  ;;  %s2124_s5 = sld [smem:[#allocation2 + $0x16]] }
  0x72   : > { %776 = vrot.lane.b32.xlu2 %v1833_v36, %s3191_s7 }
  0x79   : > { %1101 = vrot.lane.b32.xlu0 %v1828_v33, %s1692_s8  ;;  %1103 = vrot.lane.b32.xlu1 %v1833_v36, %s1692_s8  ;;  %s2134_s8 = sld [smem:[#allocation2 + $0x1]] }
  0x7a   : > { %789 = vrot.lane.b32.xlu2 %v1828_v33, %s3193_s14 }
  0x81   : > { %791 = vrot.lane.b32.xlu0 %v1833_v36, %s3193_s14  ;;  %804 = vrot.lane.b32.xlu1 %v1828_v33, %s3195_s17 }
  0x82   : > { %806 = vrot.lane.b32.xlu2 %v1833_v36, %s3195_s17 }
  0x89   : > { %828 = vrot.lane.b32.xlu1 %v1833_v36, %s1695_s18  ;;  %826 = vrot.lane.b32.xlu0 %v1828_v33, %s1695_s18 }
  0x8a   : > { %841 = vrot.lane.b32.xlu2 %v1828_v33, %s1696_s19 }
  0xb4   : > { %v547_v42 = vpop.permute.xlu2 %546 }
  0xbc   : > { %v663_v46 = vpop.permute.xlu2 %662 }
  0xc4   : > { %v1912_v49 = vpop.permute.xlu2 %989 }
  0xcb   : > { %v400_v38 = vpop.permute.xlu0 %399  ;;  %v661_v45 = vpop.permute.xlu1 %660 }
  0xcc   : > { %v1896_v47 = vsel %vm664_vm4, %v661_v45, %v663_v46  ;;  %v777_v54 = vpop.permute.xlu2 %776  ;;  %v666_v11 = vsel %vm664_vm4, %v663_v46, %v661_v45 }
  0xcd   : > { %v1991_v12 = vsel %vm667_vm12, %v666_v11, 0.0  ;;  %v782_v11 = vstv %s2120_s20  ;;  %s3244_s20 = smov 125  }
  0xd3   : > { %v402_v40 = vpop.permute.xlu0 %401  ;;  %v1910_v48 = vpop.permute.xlu1 %873 }
  0xd4   : > { %v1868_v41 = vsel %vm403_vm2, %v400_v38, %v402_v40  ;;  %v405_v50 = vsel %vm403_vm2, %v402_v40, %v400_v38  ;;  %v790_v61 = vpop.permute.xlu2 %789  ;;  %vm995_vm2 = vcmp.lt.s32.totalorder %v1950_v62, 224 }
  0xd5   : > { %488 = vrot.lane.b32.xlu0 %v1868_v41, %s1695_s18  ;;  %441 = vrot.lane.b32.xlu2 %v1868_v41, %s3193_s14  ;;  %v1917_v51 = vsel %vm406_vm5, %v405_v50, 0.0  ;;  %v2152_v50 = vand.u32 15, %v1950_v62  ;;  %v609_v62 = vstv %s2114_s30  ;;  %s2222_s30 = sld [smem:[#allocation2]]  ;;  %vm530_vm5 = vcmp.lt.s32.totalorder %v1863_v39, 125 }
  0xd6   : > { %420 = vrot.lane.b32.xlu1 %v1868_v41, %s3191_s7 }
  0xdb   : > { %v549_v43 = vpop.permute.xlu0 %548  ;;  %v1925_v52 = vpop.permute.xlu1 %987 }
  0xdc   : > { %v1879_v44 = vsel %vm550_vm3, %v547_v42, %v549_v43  ;;  %v552_v59 = vsel %vm550_vm3, %v549_v43, %v547_v42  ;;  %v807_v7 = vpop.permute.xlu2 %806  ;;  %v993_v34 = vsel %vm991_vm1, %v1912_v49, %v1925_v52  ;;  %v2092_v35 = vsel %vm991_vm1, %v1925_v52, %v1912_v49 }
  0xdd   : > { %508 = vrot.lane.b32.xlu2 %v1868_v41, %s1696_s19  ;;  %595 = vrot.lane.b32.xlu0 %v1879_v44, %s3195_s17  ;;  %v1947_v60 = vsel %vm553_vm7, %v552_v59, 0.0  ;;  %3239 = vst [vmem:[#allocation23_spill] sm:$0xff] %v2092_v35  ;;  %v2094_v38 = vsel %vm995_vm2, %v993_v34, 0.0  ;;  %v2147_v49 = vshrl.u32 %v322_v37, 7  ;;  %v722_v52 = vstv %s2116_s3  ;;  %s2180_s3 = sld [smem:[#allocation2 + $0xd]] }
  0xde   : > { %461 = vrot.lane.b32.xlu1 %v1868_v41, %s3195_s17  ;;  %3240 = vst [vmem:[#allocation24_spill] sm:$0xff] %v2094_v38  ;;  %v479_v37 = vstv %s2100_s23  ;;  %s2194_s23 = sld [smem:[#allocation2 + $0x3e]]  ;;  %v783_v34 = vstv %s2122_s4 }
  0xdf   : > { %vm431_vm3 = vcmp.eq.s32.totalorder %v2147_v49, 0  ;;  %s2278_s4 = sld [smem:[#allocation2 + $0xf]] }
  0xe3   : > { %v1927_v53 = vpop.permute.xlu0 %871  ;;  %v775_v55 = vpop.permute.xlu1 %774 }
  0xe4   : > { %v1938_v56 = vsel %vm422_vm6, %v775_v55, %v777_v54  ;;  %v1942_v57 = vsel %vm422_vm6, %v777_v54, %v775_v55  ;;  %v2012_v17 = vpop.permute.xlu2 %841  ;;  %v877_v20 = vsel %vm875_vm14, %v1910_v48, %v1927_v53  ;;  %v2038_v21 = vsel %vm875_vm14, %v1927_v53, %v1910_v48 }
  0xe5   : > { %647 = vrot.lane.b32.xlu0 %v1879_v44, %s3197_s22  ;;  %565 = vrot.lane.b32.xlu2 %v1879_v44, %s3191_s7  ;;  %3236 = vst [vmem:[#allocation20_spill] sm:$0xff] %v2012_v17  ;;  %v2040_v22 = vsel %vm881_vm15, %v877_v20, 0.0  ;;  %v723_v53 = vstv %s2118_s15  ;;  %v480_v54 = vstv %s2104_s24  ;;  %v2174_v55 = vadd.s32 4294967293, %v2152_v50  ;;  %s2199_s24 = sld [smem:[#allocation2 + $0x6]] }
  0xe6   : > { %528 = vrot.lane.b32.xlu1 %v1868_v41, %s3197_s22  ;;  %3237 = vst [vmem:[#allocation21_spill] sm:$0xff] %v2038_v21  ;;  %s2229_s15 = sld [smem:[#allocation2 + $0x31]] }
  0xe7   : > { %3238 = vst [vmem:[#allocation22_spill] sm:$0xff] %v2040_v22  ;;  %vm354_vm4 = vcmp.ge.s32.totalorder %v2174_v55, 0 }
  0xe8   : > { %v2255_v0 = vsel %vm354_vm4, %v1938_v56, 0.0 }
  0xe9   : > { %3246 = vst [vmem:[#allocation29_spill] sm:$0xff] %v2255_v0 }
  0xeb   : > { %v1102_v58 = vpop.permute.xlu0 %1101  ;;  %v1104_v63 = vpop.permute.xlu1 %1103  ;;  %v539_v0 = vstv %s2199_s24  ;;  %s2440_s24 = sld [smem:[#allocation2 + $0x13]] }
  0xec   : > { %v1960_v1 = vsel %vm1105_vm8, %v1102_v58, %v1104_v63  ;;  %v1107_v2 = vsel %vm1105_vm8, %v1104_v63, %v1102_v58  ;;  %v724_v63 = vsel %vm431_vm3, %v722_v52, %v723_v53  ;;  %v2220_v53 = vadd.s32 4294967294, %v2152_v50 }
  0xed   : > { %694 = vrot.lane.b32.xlu0 %v1896_v47, %s3193_s14  ;;  %617 = vrot.lane.b32.xlu2 %v1879_v44, %s1695_s18  ;;  %v1962_v4 = vsel %vm1109_vm9, %v1107_v2, 0.0  ;;  %v2212_v20 = vmul.f32 %v724_v63, %v1896_v47 }
  0xee   : > { %580 = vrot.lane.b32.xlu1 %v1879_v44, %s3193_s14  ;;  %vm362_vm8 = vcmp.ge.s32.totalorder %v2220_v53, 0 }
  0xef   : > { %3243 = vst [vmem:[#allocation27_spill] sm:$0xff] %v2212_v20  ;;  %v433_v20 = vstv %s2229_s15  ;;  %s2475_s15 = sld [smem:[#allocation2 + $0xe]] }
  0xf3   : > { %v792_v3 = vpop.permute.xlu0 %791  ;;  %v805_v8 = vpop.permute.xlu1 %804 }
  0xf4   : > { %v1967_v5 = vsel %vm3216_vm10, %v790_v61, %v792_v3  ;;  %v1971_v6 = vsel %vm3216_vm10, %v792_v3, %v790_v61  ;;  %v1982_v9 = vsel %vm463_vm11, %v805_v8, %v807_v7  ;;  %v1986_v10 = vsel %vm463_vm11, %v807_v7, %v805_v8 }
  0xf5   : > { %761 = vrot.lane.b32.xlu0 %v1896_v47, %s3197_s22  ;;  %709 = vrot.lane.b32.xlu2 %v1896_v47, %s3195_s17  ;;  %3230 = vst [vmem:[#allocation14_spill] sm:$0xff] %v1967_v5  ;;  %v608_v61 = vstv %s2110_s28  ;;  %v2197_v7 = vand.u32 15, %v1863_v39  ;;  %v481_v8 = vsel %vm431_vm3, %v479_v37, %v480_v54  ;;  %s2204_s28 = sld [smem:[#allocation2 + $0x37]]  ;;  %v797_v37 = vstv %s2124_s5 }
  0xf6   : > { %632 = vrot.lane.b32.xlu1 %v1879_v44, %s1696_s19  ;;  %3231 = vst [vmem:[#allocation15_spill] sm:$0xff] %v1971_v6  ;;  %v798_v54 = vstv %s2130_s6  ;;  %s2294_s5 = sld [smem:[#allocation2 + $0x40]]  ;;  %v432_v6 = vstv %s2222_s30 }
  0xf7   : > { %3232 = vst [vmem:[#allocation16_spill] sm:$0xff] %v1982_v9  ;;  %v2217_v52 = vadd.s32 4294967294, %v2197_v7  ;;  %v2272_v56 = vadd.s32 1, %v2197_v7  ;;  %v653_v9 = vstv %s2180_s3  ;;  %s2404_s6 = sld [smem:[#allocation2 + $0x3d]] }
  0xf8   : > { %3233 = vst [vmem:[#allocation17_spill] sm:$0xff] %v1986_v10  ;;  %v654_v10 = vstv %s2194_s23  ;;  %s2415_s3 = sld [smem:[#allocation2 + $0x38]]  ;;  %s3250_s23 = smov 1  }
  0xf9   : > { %vm361_vm7 = vcmp.ge.s32.totalorder %v2217_v52, 0  ;;  %vm3211_vm15 = vcmp.lt.s32.totalorder %v2272_v56, 16  ;;  %s2469_s30 = sld [smem:[#allocation2 + $0x3c]] }
  0xfb   : > { %v829_v13 = vpop.permute.xlu1 %828  ;;  %v827_v14 = vpop.permute.xlu0 %826  ;;  %v540_v5 = vstv %s2204_s28  ;;  %s2460_s28 = sld [smem:[#allocation2 + $0xb]] }
  0xfc   : > { %v2002_v15 = vsel %vm3212_vm13, %v827_v14, %v829_v13  ;;  %v2006_v16 = vsel %vm3212_vm13, %v829_v13, %v827_v14  ;;  %v610_v13 = vsel %vm431_vm3, %v608_v61, %v609_v62  ;;  %v2209_v14 = vmul.f32 %v724_v63, %v1991_v12 }
  0xfd   : > { %459 = vrot.lane.b32.xlu0 %v1917_v51, %s3195_s17  ;;  %746 = vrot.lane.b32.xlu2 %v1896_v47, %s1696_s19  ;;  %3234 = vst [vmem:[#allocation18_spill] sm:$0xff] %v2002_v15  ;;  %v2227_v61 = vadd.s32 4294967295, %v2197_v7  ;;  %v2238_v62 = vadd.s32 4294967295, %v2152_v50  ;;  %v2246_v63 = vmul.f32 %v481_v8, %v1917_v51  ;;  %v472_v15 = vstv %s2164_s0  ;;  %s2326_s0 = sld [smem:[#allocation2 + $0x36]] }
  0xfe   : > { %679 = vrot.lane.b32.xlu1 %v1896_v47, %s3191_s7  ;;  %3235 = vst [vmem:[#allocation19_spill] sm:$0xff] %v2006_v16 }
  0xff   : > { %3242 = vst [vmem:[#allocation26_spill] sm:$0xff] %v2209_v14  ;;  %vm369_vm9 = vcmp.ge.s32.totalorder %v2227_v61, 0  ;;  %vm370_vm14 = vcmp.ge.s32.totalorder %v2238_v62, 0 }
 0x105   : > { %526 = vrot.lane.b32.xlu0 %v1917_v51, %s3197_s22  ;;  %439 = vrot.lane.b32.xlu2 %v1917_v51, %s3193_s14 }
 0x106   : > { %731 = vrot.lane.b32.xlu1 %v1896_v47, %s1695_s18  ;;  %v2232_v47 = vmul.f32 %v481_v8, %v1868_v41  ;;  %v2250_v41 = vsel %vm431_vm3, %v782_v11, %v783_v34  ;;  %v452_v11 = vstv %s2134_s8  ;;  %s2409_s8 = sld [smem:[#allocation2 + $0x7]] }
 0x107   : > { %3245 = vst [vmem:[#allocation28_spill] sm:$0xff] %v2250_v41 }
 0x10d   : > { %578 = vrot.lane.b32.xlu0 %v1947_v60, %s3193_s14  ;;  %486 = vrot.lane.b32.xlu2 %v1917_v51, %s1695_s18 }
 0x10e   : > { %418 = vrot.lane.b32.xlu1 %v1917_v51, %s3191_s7 }
 0x115   : > { %630 = vrot.lane.b32.xlu0 %v1947_v60, %s1696_s19  ;;  %593 = vrot.lane.b32.xlu2 %v1947_v60, %s3195_s17 }
 0x116   : > { %506 = vrot.lane.b32.xlu1 %v1917_v51, %s1696_s19  ;;  %v2269_v51 = vsel %vm431_vm3, %v797_v37, %v798_v54 }
 0x117   : > { %3247 = vst [vmem:[#allocation30_spill] sm:$0xff] %v2269_v51  ;;  %v2312_v51 = vadd.s32 3, %v2152_v50 }
 0x119   : > { %vm3214_vm0 = vcmp.lt.s32.totalorder %v2312_v51, 16 }
 0x11d   : > { %677 = vrot.lane.b32.xlu0 %v1991_v12, %s3191_s7  ;;  %645 = vrot.lane.b32.xlu2 %v1947_v60, %s3197_s22 }
 0x11e   : > { %563 = vrot.lane.b32.xlu1 %v1947_v60, %s3191_s7 }
 0x125   : > { %729 = vrot.lane.b32.xlu0 %v1991_v12, %s1695_s18  ;;  %692 = vrot.lane.b32.xlu2 %v1991_v12, %s3193_s14 }
 0x126   : > { %615 = vrot.lane.b32.xlu1 %v1947_v60, %s1695_s18 }
 0x12d   : > { %759 = vrot.lane.b32.xlu0 %v1991_v12, %s3197_s22  ;;  %744 = vrot.lane.b32.xlu2 %v1991_v12, %s1696_s19 }
 0x12e   : > { %707 = vrot.lane.b32.xlu1 %v1991_v12, %s3195_s17  ;;  %v2235_v12 = vadd.s32 4294967293, %v2197_v7 }
 0x12f   : > { %v2022_v18 = vpop.permute.xlu2 %441 }
 0x130   : > { %vm353_vm12 = vcmp.ge.s32.totalorder %v2235_v12, 0 }
 0x135   : > { %843 = vrot.lane.b32.xlu0 %v1833_v36, %s1696_s19  ;;  %858 = vrot.lane.b32.xlu2 %v1833_v36, %s3197_s22  ;;  %v2309_v36 = vadd.s32 3, %v2197_v7 }
 0x136   : > { %856 = vrot.lane.b32.xlu1 %v1828_v33, %s3197_s22  ;;  %v473_v33 = vstv %s2169_s1  ;;  %s3248_s1 = smov 2  }
 0x137   : > { %v2031_v19 = vpop.permute.xlu2 %508  ;;  %vm3215_vm2 = vcmp.lt.s32.totalorder %v2309_v36, 16 }
 0x13d   : > { %905 = vrot.lane.b32.xlu2 %v2038_v21, %s3193_s14  ;;  %890 = vrot.lane.b32.xlu0 %v2038_v21, %s3191_s7 }
 0x13e   : > { %892 = vrot.lane.b32.xlu1 %v2040_v22, %s3191_s7 }
 0x13f   : > { %v2048_v23 = vpop.permute.xlu2 %565 }
 0x145   : > { %922 = vrot.lane.b32.xlu2 %v2040_v22, %s3195_s17  ;;  %907 = vrot.lane.b32.xlu0 %v2040_v22, %s3193_s14 }
 0x146   : > { %920 = vrot.lane.b32.xlu1 %v2038_v21, %s3195_s17 }
 0x147   : > { %v2056_v24 = vpop.permute.xlu2 %617  ;;  %v2058_v25 = vpop.permute.xlu0 %488 }
 0x148   : > { %v2060_v26 = vpop.permute.xlu1 %420 }
 0x14d   : > { %957 = vrot.lane.b32.xlu2 %v2038_v21, %s1696_s19  ;;  %942 = vrot.lane.b32.xlu0 %v2038_v21, %s1695_s18 }
 0x14e   : > { %944 = vrot.lane.b32.xlu1 %v2040_v22, %s1695_s18 }
 0x14f   : > { %v2068_v27 = vpop.permute.xlu2 %709  ;;  %v2070_v28 = vpop.permute.xlu0 %595 }
 0x150   : > { %v2072_v29 = vpop.permute.xlu1 %461 }
 0x155   : > { %974 = vrot.lane.b32.xlu2 %v2040_v22, %s3197_s22  ;;  %959 = vrot.lane.b32.xlu0 %v2040_v22, %s1696_s19  ;;  %v2263_v22 = vmul.f32 %v610_v13, %v1879_v44  ;;  %v2282_v44 = vadd.s32 1, %v2152_v50 }
 0x156   : > { %972 = vrot.lane.b32.xlu1 %v2038_v21, %s3197_s22  ;;  %s2156_s22 = sld [smem:[#allocation2 + $0x3a]] }
 0x157   : > { %v2081_v30 = vpop.permute.xlu2 %746  ;;  %v2083_v31 = vpop.permute.xlu0 %647  ;;  %vm3213_vm1 = vcmp.lt.s32.totalorder %v2282_v44, 16 }
 0x158   : > { %v2085_v32 = vpop.permute.xlu1 %528 }
 0x15c   : > { %v602_v17 = vstv %s2156_s22  ;;  %s2379_s22 = sld [smem:[#allocation2 + $0xc]] }
 0x15d   : > { %1019 = vrot.lane.b32.xlu2 %v2092_v35, %s3193_s14  ;;  %1004 = vrot.lane.b32.xlu0 %v2092_v35, %s3191_s7 }
 0x15e   : > { %1006 = vrot.lane.b32.xlu1 %v2094_v38, %s3191_s7  ;;  %s2144_s7 = sld [smem:[#allocation2 + $0x4]] }
 0x15f   : > { %v2106_v40 = vpop.permute.xlu2 %439  ;;  %v2108_v42 = vpop.permute.xlu0 %694 }
 0x160   : > { %v2112_v43 = vpop.permute.xlu1 %580  ;;  %v445_v16 = vsel %vm3216_vm10, %v2022_v18, %v2106_v40  ;;  %v444_v41 = vsel %vm3216_vm10, %v2106_v40, %v2022_v18 }
 0x164   : > { %v499_v54 = vstv %s2144_s7  ;;  %s3249_s7 = smov 3  }
 0x165   : > { %1036 = vrot.lane.b32.xlu2 %v2094_v38, %s3195_s17  ;;  %1021 = vrot.lane.b32.xlu0 %v2094_v38, %s3193_s14  ;;  %s2149_s14 = sld [smem:[#allocation2 + $0x35]] }
 0x166   : > { %1034 = vrot.lane.b32.xlu1 %v2092_v35, %s3195_s17  ;;  %s2154_s17 = sld [smem:[#allocation2 + $0x9]] }
 0x167   : > { %v2136_v45 = vpop.permute.xlu2 %486  ;;  %v2138_v46 = vpop.permute.xlu0 %761 }
 0x168   : > { %3241 = vst [vmem:[#allocation25_spill] sm:$0xff] %v2138_v46  ;;  %v2142_v48 = vpop.permute.xlu1 %632  ;;  %v450_v46 = vsel %vm361_vm7, %v445_v16, 0.0  ;;  %v474_v16 = vsel %vm431_vm3, %v472_v15, %v473_v33  ;;  %v2366_v33 = vsel %vm431_vm3, %v539_v0, %v540_v5  ;;  %v491_v0 = vsel %vm3212_vm13, %v2136_v45, %v2058_v25 }
 0x16c   : > { %v601_v21 = vstv %s2154_s17  ;;  %s2354_s17 = sld [smem:[#allocation2 + $0x39]] }
 0x16d   : > { %1071 = vrot.lane.b32.xlu2 %v2092_v35, %s1696_s19  ;;  %1056 = vrot.lane.b32.xlu0 %v2092_v35, %s1695_s18  ;;  %v2344_v40 = vsel %vm431_vm3, %v601_v21, %v602_v17 }
 0x16e   : > { %1058 = vrot.lane.b32.xlu1 %v2094_v38, %s1695_s18 }
 0x16f   : > { %v2176_v58 = vpop.permute.xlu2 %593  ;;  %v2178_v59 = vpop.permute.xlu0 %459 }
 0x170   : > { %v2186_v2 = vpop.permute.xlu1 %679  ;;  %v2192_v3 = vsel %vm463_vm11, %v2072_v29, %v2178_v59  ;;  %v464_v17 = vsel %vm463_vm11, %v2178_v59, %v2072_v29  ;;  %v2377_v29 = vadd.s32 2, %v2197_v7  ;;  %v492_v59 = vsel %vm3212_vm13, %v2058_v25, %v2136_v45 }
 0x171   : > { %v470_v5 = vsel %vm369_vm9, %v2192_v3, 0.0  ;;  %v471_v7 = vsel %vm370_vm14, %v464_v17, 0.0  ;;  %v497_v25 = vsel %vm3211_vm15, %v491_v0, 0.0  ;;  %vm510_vm13 = vcmp.lt.s32.totalorder %v1863_v39, 126 }
 0x172   : > { %v475_v45 = vmul.f32 %v474_v16, %v470_v5  ;;  %vm387_vm15 = vcmp.lt.s32.totalorder %v2377_v29, 16 }
 0x175   : > { %1088 = vrot.lane.b32.xlu2 %v2094_v38, %s3244_s20  ;;  %1073 = vrot.lane.b32.xlu0 %v2094_v38, %s1696_s19  ;;  %v2260_v38 = vmul.f32 %v610_v13, %v1947_v60  ;;  %v453_v13 = vstv %s2140_s29  ;;  %s2317_s29 = sld [smem:[#allocation2 + $0x5]] }
 0x176   : > { %1086 = vrot.lane.b32.xlu1 %v2092_v35, %s3244_s20  ;;  %v500_v35 = vstv %s2149_s14  ;;  %v454_v14 = vsel %vm431_vm3, %v452_v11, %v453_v13  ;;  %s2338_s14 = sld [smem:[#allocation2 + $0x8]]  ;;  %v2350_v11 = vsel %vm431_vm3, %v653_v9, %v654_v10  ;;  %v434_v9 = vsel %vm431_vm3, %v432_v6, %v433_v20 }
 0x177   : > { %v2274_v60 = vpop.permute.xlu2 %645  ;;  %v2276_v8 = vpop.permute.xlu0 %526  ;;  %v501_v18 = vsel %vm431_vm3, %v499_v54, %v500_v35  ;;  %v451_v35 = vsel %vm362_vm8, %v444_v41, 0.0  ;;  %v455_v21 = vmul.f32 %v454_v14, %v450_v46 }
 0x178   : > { %v2286_v34 = vpop.permute.xlu1 %731  ;;  %v2292_v37 = vsel %vm530_vm5, %v2276_v8, %v2085_v32  ;;  %v456_v13 = vmul.f32 %v454_v14, %v451_v35  ;;  %v498_v14 = vsel %vm3213_vm1, %v492_v59, 0.0  ;;  %v476_v35 = vmul.f32 %v474_v16, %v471_v7 }
 0x179   : > { %v532_v16 = vsel %vm530_vm5, %v2085_v32, %v2276_v8  ;;  %v502_v5 = vmul.f32 %v501_v18, %v497_v25  ;;  %v503_v59 = vmul.f32 %v501_v18, %v498_v14  ;;  %v537_v25 = vsel %vm3215_vm2, %v2292_v37, 0.0 }
 0x17a   : > { %v639_v37 = vstv %s2404_s6  ;;  %s2687_s6 = sld [smem:[#allocation2 + $0x19]] }
 0x17b   : > { %v519_v17 = vstv %s2317_s29  ;;  %s2573_s29 = sld [smem:[#allocation2 + $0x41]] }
 0x17d   : > { %1133 = vrot.lane.b32.xlu2 %v1960_v1, %s3248_s1  ;;  %1118 = vrot.lane.b32.xlu0 %v1960_v1, %s3249_s7 }
 0x17e   : > { %1120 = vrot.lane.b32.xlu1 %v1962_v4, %s3249_s7  ;;  %s2630_s7 = sld [smem:[#allocation2 + $0x17]] }
 0x17f   : > { %v2370_v10 = vpop.permute.xlu2 %692  ;;  %v2372_v15 = vpop.permute.xlu0 %578 }
 0x180   : > { %v419_v41 = vpop.permute.xlu1 %418 }
 0x181   : > { %v423_v6 = vsel %vm422_vm6, %v419_v41, %v2060_v26  ;;  %v424_v46 = vsel %vm422_vm6, %v2060_v26, %v419_v41  ;;  %v2407_v41 = vadd.s32 2, %v2152_v50  ;;  %v586_v50 = vstv %s2338_s14  ;;  %s2640_s14 = sld [smem:[#allocation2 + $0x48]] }
 0x182   : > { %v429_v3 = vsel %vm353_vm12, %v424_v46, 0.0  ;;  %v430_v20 = vsel %vm354_vm4, %v423_v6, 0.0  ;;  %v520_v46 = vstv %s2326_s0  ;;  %s2619_s0 = sld [smem:[#allocation2 + $0x14]] }
 0x183   : > { %v435_v54 = vmul.f32 %v434_v9, %v429_v3  ;;  %v436_v26 = vmul.f32 %v434_v9, %v430_v20  ;;  %v587_v9 = vstv %s2354_s17  ;;  %vm3217_vm1 = vcmp.lt.s32.totalorder %v2407_v41, 16  ;;  %s2657_s17 = sld [smem:[#allocation2 + $0x18]] }
 0x184   : > { %v521_v7 = vsel %vm431_vm3, %v519_v17, %v520_v46  ;;  %v538_v17 = vsel %vm3214_vm0, %v532_v16, 0.0  ;;  %v572_v16 = vstv %s2415_s3  ;;  %s1410_s3 = sld [smem:[#allocation2 + $0x1a]] }
 0x185   : > { %v457_v6 = vadd.f32 %v455_v21, %v435_v54  ;;  %v458_v3 = vadd.f32 %v456_v13, %v436_v26  ;;  %1150 = vrot.lane.b32.xlu2 %v1962_v4, %s3250_s23  ;;  %1135 = vrot.lane.b32.xlu0 %v1962_v4, %s3248_s1  ;;  %v638_v26 = vstv %s2379_s22  ;;  %s2626_s1 = sld [smem:[#allocation2 + $0x45]] }
 0x186   : > { %1148 = vrot.lane.b32.xlu1 %v1960_v1, %s3250_s23  ;;  %s2670_s22 = sld [smem:[#allocation2 + $0x49]] }
 0x187   : > { %v477_v21 = vadd.f32 %v475_v45, %v457_v6  ;;  %v478_v13 = vadd.f32 %v476_v35, %v458_v3  ;;  %v2434_v54 = vpop.permute.xlu2 %744  ;;  %v2436_v0 = vpop.permute.xlu0 %630  ;;  %v571_v3 = vstv %s2409_s8  ;;  %s2699_s8 = sld [smem:[#allocation2 + $0x4a]] }
 0x188   : > { %v507_v20 = vpop.permute.xlu1 %506  ;;  %s1459_s23 = sld [smem:[#allocation2 + $0x4b]] }
 0x189   : > { %v484_v32 = vadd.f32 %v2246_v63, %v477_v21  ;;  %v485_v8 = vadd.f32 %v2232_v47, %v478_v13  ;;  %v511_v45 = vsel %vm510_vm13, %v507_v20, %v2031_v19  ;;  %v512_v18 = vsel %vm510_vm13, %v2031_v19, %v507_v20 }
 0x18a   : > { %v517_v63 = vsel %vm387_vm15, %v511_v45, 0.0  ;;  %v518_v47 = vsel %vm3217_vm1, %v512_v18, 0.0  ;;  %v598_v19 = vsel %vm463_vm11, %v2070_v28, %v2176_v58  ;;  %v542_v21 = vmul.f32 %v2366_v33, %v537_v25 }
 0x18b   : > { %v504_v46 = vadd.f32 %v502_v5, %v484_v32  ;;  %v505_v14 = vadd.f32 %v503_v59, %v485_v8  ;;  %v522_v35 = vmul.f32 %v521_v7, %v517_v63  ;;  %v523_v6 = vmul.f32 %v521_v7, %v518_v47 }
 0x18c   : > { %v543_v13 = vmul.f32 %v2366_v33, %v538_v17  ;;  %v2480_v7 = vsel %vm353_vm12, %v1942_v57, 0.0  ;;  %v3251_v20 = vstv %s2294_s5  ;;  %v3252_v32 = vstv %s2278_s4  ;;  %s2502_s4 = sld [smem:[#allocation2 + $0x3f]] }
 0x18d   : > { %v524_v5 = vadd.f32 %v522_v35, %v504_v46  ;;  %v525_v59 = vadd.f32 %v523_v6, %v505_v14  ;;  %1185 = vrot.lane.b32.xlu2 %v1960_v1, %s1696_s19  ;;  %v2488_v8 = vsel %vm431_vm3, %v3252_v32, %v3251_v20  ;;  %v582_v33 = vsel %vm3216_vm10, %v2372_v15, %v2112_v43  ;;  %s2567_s5 = sld [smem:[#allocation2 + $0x10]] }
 0x18e   : > { %v583_v45 = vsel %vm3216_vm10, %v2112_v43, %v2372_v15  ;;  %1172 = vrot.lane.b32.xlu1 %v1962_v4, %s1695_s18  ;;  %1170 = vrot.lane.b32.xlu0 %v1960_v1, %s1695_s18  ;;  %v597_v57 = vsel %vm463_vm11, %v2176_v58, %v2070_v28  ;;  %v599_v18 = vsel %vm369_vm9, %v598_v19, 0.0  ;;  %v588_v15 = vsel %vm431_vm3, %v586_v50, %v587_v9  ;;  %s2556_s18 = sld [smem:[#allocation2 + $0x12]] }
 0x18f   : > { %v544_v25 = vadd.f32 %v542_v21, %v524_v5  ;;  %v545_v17 = vadd.f32 %v543_v13, %v525_v59  ;;  %v2510_v63 = vpop.permute.xlu2 %858  ;;  %v678_v43 = vpop.permute.xlu0 %677  ;;  %v752_v47 = vstv %s2440_s24  ;;  %v640_v46 = vsel %vm431_vm3, %v638_v26, %v639_v37  ;;  %s1411_s24 = sld [smem:[#allocation2 + $0x1b]] }
 0x190   : > { %v573_v14 = vsel %vm431_vm3, %v571_v3, %v572_v16  ;;  %v564_v28 = vpop.permute.xlu1 %563  ;;  %v584_v58 = vsel %vm361_vm7, %v583_v45, 0.0  ;;  %v585_v35 = vsel %vm362_vm8, %v582_v33, 0.0  ;;  %v600_v26 = vsel %vm370_vm14, %v597_v57, 0.0 }
 0x191   : > { %v567_v50 = vsel %vm422_vm6, %v564_v28, %v2048_v23  ;;  %v568_v9 = vsel %vm422_vm6, %v2048_v23, %v564_v28  ;;  %v604_v6 = vmul.f32 %v2344_v40, %v599_v18  ;;  %v649_v3 = vsel %vm530_vm5, %v2274_v60, %v2083_v31 }
 0x192   : > { %v569_v19 = vsel %vm353_vm12, %v568_v9, 0.0  ;;  %v570_v37 = vsel %vm354_vm4, %v567_v50, 0.0  ;;  %v623_v21 = vstv %s2460_s28  ;;  %v650_v13 = vsel %vm530_vm5, %v2083_v31, %v2274_v60  ;;  %s1460_s28 = sld [smem:[#allocation2 + $0x4c]] }
 0x193   : > { %v574_v16 = vmul.f32 %v573_v14, %v569_v19  ;;  %v575_v23 = vmul.f32 %v573_v14, %v570_v37  ;;  %v589_v5 = vmul.f32 %v588_v15, %v584_v58  ;;  %v590_v59 = vmul.f32 %v588_v15, %v585_v35 }
 0x194   : > { %v624_v20 = vstv %s2469_s30  ;;  %v634_v32 = vsel %vm510_vm13, %v2436_v0, %v2142_v48  ;;  %v635_v33 = vsel %vm510_vm13, %v2142_v48, %v2436_v0  ;;  %v605_v31 = vmul.f32 %v2344_v40, %v600_v26  ;;  %s2754_s30 = sld [smem:[#allocation2 + $0x1c]] }
 0x195   : > { %v576_v45 = vadd.f32 %v574_v16, %v544_v25  ;;  %v577_v57 = vadd.f32 %v575_v23, %v545_v17  ;;  %1202 = vrot.lane.b32.xlu2 %v1962_v4, %s3244_s20  ;;  %v651_v60 = vsel %vm3215_vm2, %v649_v3, 0.0  ;;  %v685_v18 = vstv %s2475_s15  ;;  %s2756_s15 = sld [smem:[#allocation2 + $0x4d]] }
 0x196   : > { %v686_v15 = vstv %s2502_s4  ;;  %1200 = vrot.lane.b32.xlu1 %v1960_v1, %s3244_s20  ;;  %1187 = vrot.lane.b32.xlu0 %v1962_v4, %s1696_s19  ;;  %v652_v48 = vsel %vm3214_vm0, %v650_v13, 0.0  ;;  %v625_v40 = vsel %vm431_vm3, %v623_v21, %v624_v20  ;;  %v696_v14 = vsel %vm3216_vm10, %v2370_v10, %v2108_v42  ;;  %s2587_s19 = sld [smem:[#allocation2 + $0x43]] }
 0x197   : > { %v591_v0 = vadd.f32 %v589_v5, %v576_v45  ;;  %v592_v25 = vadd.f32 %v590_v59, %v577_v57  ;;  %v730_v17 = vpop.permute.xlu0 %729  ;;  %v697_v28 = vsel %vm3216_vm10, %v2108_v42, %v2370_v10  ;;  %v636_v58 = vsel %vm387_vm15, %v634_v32, 0.0  ;;  %v2595_v42 = vpop.permute.xlu2 %905  ;;  %s2611_s20 = sld [smem:[#allocation2 + $0x44]] }
 0x198   : > { %v637_v35 = vsel %vm3217_vm1, %v635_v33, 0.0  ;;  %v616_v50 = vpop.permute.xlu1 %615  ;;  %vm3253_vm0 = vcmp.lt.s32.totalorder %v1863_v39, 127  ;;  %v681_v10 = vsel %vm422_vm6, %v678_v43, %v2186_v2  ;;  %v682_v3 = vsel %vm422_vm6, %v2186_v2, %v678_v43  ;;  %s2772_s4 = sld [smem:[#allocation2 + $0x1d]] }
 0x199   : > { %v606_v9 = vadd.f32 %v604_v6, %v591_v0  ;;  %v607_v26 = vadd.f32 %v605_v31, %v592_v25  ;;  %v619_v19 = vsel %vm3253_vm0, %v616_v50, %v2056_v24  ;;  %vm3254_vm2 = vmmov %vm3253_vm0  ;;  %vm3255_vm10 = vcmp.lt.s32.totalorder %v2272_v56, 16 }
 0x19a   : > { %v620_v37 = vsel %vm3254_vm2, %v2056_v24, %v616_v50  ;;  %v621_v6 = vsel %vm3255_vm10, %v619_v19, 0.0  ;;  %vm3256_vm1 = vcmp.lt.s32.totalorder %v2282_v44, 16  ;;  %v698_v5 = vsel %vm361_vm7, %v697_v28, 0.0  ;;  %vm3257_vm10 = vmmov %vm3253_vm0 }
 0x19b   : > { %v622_v16 = vsel %vm3256_vm1, %v620_v37, 0.0  ;;  %v613_v23 = vadd.f32 %v2260_v38, %v606_v9  ;;  %v614_v24 = vadd.f32 %v2263_v22, %v607_v26  ;;  %v626_v21 = vmul.f32 %v625_v40, %v621_v6 }
 0x19c   : > { %v627_v13 = vmul.f32 %v625_v40, %v622_v16  ;;  %v641_v2 = vmul.f32 %v640_v46, %v636_v58  ;;  %v642_v43 = vmul.f32 %v640_v46, %v637_v35  ;;  %v687_v59 = vsel %vm431_vm3, %v685_v18, %v686_v15 }
 0x19d   : > { %v683_v38 = vsel %vm353_vm12, %v682_v3, 0.0  ;;  %v684_v22 = vsel %vm354_vm4, %v681_v10, 0.0  ;;  %v628_v20 = vadd.f32 %v626_v21, %v613_v23  ;;  %v656_v33 = vmul.f32 %v2350_v11, %v651_v60 }
 0x19e   : > { %v629_v32 = vadd.f32 %v627_v13, %v614_v24  ;;  %v657_v45 = vmul.f32 %v2350_v11, %v652_v48  ;;  %v699_v46 = vsel %vm362_vm8, %v696_v14, 0.0  ;;  %v737_v57 = vstv %s2556_s18  ;;  %s2780_s18 = sld [smem:[#allocation2 + $0x4e]] }
 0x19f   : > { %v643_v31 = vadd.f32 %v641_v2, %v628_v20  ;;  %v715_v15 = vstv %s2567_s5  ;;  %v716_v0 = vstv %s2573_s29  ;;  %v760_v25 = vpop.permute.xlu0 %759  ;;  %v703_v40 = vmul.f32 %v2488_v8, %v698_v5  ;;  %v2655_v6 = vpop.permute.xlu2 %922  ;;  %s2792_s5 = sld [smem:[#allocation2 + $0x1e]] }
 0x1a0   : > { %v644_v18 = vadd.f32 %v642_v43, %v629_v32  ;;  %v688_v28 = vmul.f32 %v687_v59, %v683_v38  ;;  %v689_v58 = vmul.f32 %v687_v59, %v684_v22  ;;  %v738_v60 = vstv %s2587_s19  ;;  %v708_v35 = vpop.permute.xlu1 %707  ;;  %v3260_v22 = vld [vmem:[#allocation25_spill] sm:$0xff]  ;;  %s2800_s29 = sld [smem:[#allocation2 + $0x4f]] }
 0x1a1   : > { %v658_v11 = vadd.f32 %v656_v33, %v643_v31  ;;  %v711_v14 = vsel %vm463_vm11, %v708_v35, %v2068_v27  ;;  %v712_v50 = vsel %vm463_vm11, %v2068_v27, %v708_v35  ;;  %v704_v9 = vmul.f32 %v2488_v8, %v699_v46  ;;  %s2808_s19 = sld [smem:[#allocation2 + $0x1f]] }
 0x1a2   : > { %v659_v48 = vadd.f32 %v657_v45, %v644_v18  ;;  %v717_v26 = vsel %vm431_vm3, %v715_v15, %v716_v0  ;;  %v713_v19 = vsel %vm369_vm9, %v712_v50, 0.0  ;;  %v714_v37 = vsel %vm370_vm14, %v711_v14, 0.0 }
 0x1a3   : > { %v733_v10 = vsel %vm3253_vm0, %v730_v17, %v2286_v34  ;;  %v734_v27 = vsel %vm3257_vm10, %v2286_v34, %v730_v17  ;;  %v690_v3 = vadd.f32 %v688_v28, %v658_v11  ;;  %v753_v16 = vstv %s2611_s20  ;;  %v3263_v28 = vld [vmem:[#allocation27_spill] sm:$0xff]  ;;  %s2814_s20 = sld [smem:[#allocation2 + $0x50]] }
 0x1a4   : > { %v691_v8 = vadd.f32 %v689_v58, %v659_v48  ;;  %v748_v23 = vsel %vm510_vm13, %v2434_v54, %v2081_v30  ;;  %v749_v24 = vsel %vm510_vm13, %v2081_v30, %v2434_v54  ;;  %v739_v34 = vsel %vm431_vm3, %v737_v57, %v738_v60 }
 0x1a5   : > { %v705_v17 = vadd.f32 %v703_v40, %v690_v3  ;;  %v718_v13 = vmul.f32 %v717_v26, %v713_v19  ;;  %v719_v5 = vmul.f32 %v717_v26, %v714_v37  ;;  %vm3258_vm1 = vcmp.lt.s32.totalorder %v2272_v56, 16  ;;  %v3266_v26 = vld [vmem:[#allocation15_spill] sm:$0xff]  ;;  %v3267_v37 = vld [vmem:[#allocation14_spill] sm:$0xff] }
 0x1a6   : > { %v706_v21 = vadd.f32 %v704_v9, %v691_v8  ;;  %v735_v2 = vsel %vm3258_vm1, %v733_v10, 0.0  ;;  %vm3259_vm2 = vcmp.lt.s32.totalorder %v2282_v44, 16  ;;  %v767_v59 = vstv %s2619_s0  ;;  %s2830_s0 = sld [smem:[#allocation2 + $0x20]] }
 0x1a7   : > { %v736_v43 = vsel %vm3259_vm2, %v734_v27, 0.0  ;;  %v768_v38 = vstv %s2626_s1  ;;  %v720_v30 = vadd.f32 %v718_v13, %v705_v17  ;;  %v763_v20 = vsel %vm530_vm5, %v760_v25, %v3260_v22  ;;  %v2684_v33 = vpop.permute.xlu0 %843  ;;  %v3268_v17 = vld [vmem:[#allocation28_spill] sm:$0xff]  ;;  %v3269_v13 = vld [vmem:[#allocation29_spill] sm:$0xff]  ;;  %s2832_s1 = sld [smem:[#allocation2 + $0x51]] }
 0x1a8   : > { %v721_v54 = vadd.f32 %v719_v5, %v706_v21  ;;  %v764_v32 = vsel %vm530_vm5, %v3260_v22, %v760_v25  ;;  %v812_v45 = vstv %s2630_s7  ;;  %v754_v46 = vsel %vm431_vm3, %v752_v47, %v753_v16  ;;  %v2697_v18 = vpop.permute.xlu1 %856  ;;  %v3262_v25 = vld [vmem:[#allocation26_spill] sm:$0xff]  ;;  %s2835_s7 = sld [smem:[#allocation2 + $0x21]] }
 0x1a9   : > { %v750_v57 = vsel %vm387_vm15, %v748_v23, 0.0  ;;  %vm3261_vm0 = vcmp.lt.s32.totalorder %v2407_v41, 16  ;;  %v740_v15 = vmul.f32 %v739_v34, %v735_v2  ;;  %v741_v0 = vmul.f32 %v739_v34, %v736_v43  ;;  %v2718_v34 = vpop.permute.xlu2 %957  ;;  %v3270_v43 = vld [vmem:[#allocation17_spill] sm:$0xff] }
 0x1aa   : > { %v751_v31 = vsel %vm3261_vm0, %v749_v24, 0.0  ;;  %v727_v40 = vadd.f32 %v3262_v25, %v720_v30  ;;  %v728_v58 = vadd.f32 %v3263_v28, %v721_v54  ;;  %v813_v60 = vstv %s2640_s14  ;;  %s2844_s14 = sld [smem:[#allocation2 + $0x52]] }
 0x1ab   : > { %v769_v47 = vsel %vm431_vm3, %v767_v59, %v768_v38  ;;  %vm3264_vm10 = vcmp.lt.s32.totalorder %v2309_v36, 16  ;;  %vm3265_vm1 = vcmp.lt.s32.totalorder %v2312_v51, 16  ;;  %v755_v48 = vmul.f32 %v754_v46, %v750_v57  ;;  %v3271_v38 = vld [vmem:[#allocation16_spill] sm:$0xff] }
 0x1ac   : > { %v765_v35 = vsel %vm3264_vm10, %v763_v20, 0.0  ;;  %v766_v11 = vsel %vm3265_vm1, %v764_v32, 0.0  ;;  %v756_v14 = vmul.f32 %v754_v46, %v751_v31  ;;  %v742_v50 = vadd.f32 %v740_v15, %v727_v40  ;;  %v3272_v32 = vld [vmem:[#allocation30_spill] sm:$0xff] }
 0x1ad   : > { %v743_v9 = vadd.f32 %v741_v0, %v728_v58  ;;  %v795_v19 = vsel %vm361_vm7, %v3266_v26, 0.0  ;;  %v796_v10 = vsel %vm362_vm8, %v3267_v37, 0.0  ;;  %v819_v27 = vstv %s2657_s17  ;;  %v3277_v26 = vld [vmem:[#allocation19_spill] sm:$0xff]  ;;  %s2854_s17 = sld [smem:[#allocation2 + $0x22]] }
 0x1ae   : > { %v820_v3 = vstv %s2670_s22  ;;  %v757_v8 = vadd.f32 %v755_v48, %v742_v50  ;;  %v770_v23 = vmul.f32 %v769_v47, %v765_v35  ;;  %v771_v24 = vmul.f32 %v769_v47, %v766_v11  ;;  %v3273_v47 = vld [vmem:[#allocation13_spill] sm:$0xff]  ;;  %v3274_v11 = vld [vmem:[#allocation12_spill] sm:$0xff]  ;;  %v3275_v50 = vld [vmem:[#allocation18_spill] sm:$0xff]  ;;  %s2858_s22 = sld [smem:[#allocation2 + $0x53]] }
 0x1af   : > { %v758_v16 = vadd.f32 %v756_v14, %v743_v9  ;;  %v785_v21 = vmul.f32 %v3268_v17, %v2480_v7  ;;  %v786_v5 = vmul.f32 %v3268_v17, %v3269_v13  ;;  %v814_v2 = vsel %vm431_vm3, %v812_v45, %v813_v60  ;;  %v2732_v20 = vpop.permute.xlu0 %890 }
 0x1b0   : > { %v810_v59 = vsel %vm369_vm9, %v3270_v43, 0.0  ;;  %v811_v30 = vsel %vm370_vm14, %v3271_v38, 0.0  ;;  %v772_v54 = vadd.f32 %v770_v23, %v757_v8  ;;  %v800_v7 = vmul.f32 %v3272_v32, %v795_v19  ;;  %v893_v45 = vpop.permute.xlu1 %892  ;;  %v3279_v43 = vld [vmem:[#allocation20_spill] sm:$0xff] }
 0x1b1   : > { %v773_v22 = vadd.f32 %v771_v24, %v758_v16  ;;  %v801_v46 = vmul.f32 %v3272_v32, %v796_v10  ;;  %v821_v57 = vsel %vm431_vm3, %v819_v27, %v820_v3  ;;  %v834_v31 = vstv %s2687_s6  ;;  %v2750_v23 = vpop.permute.xlu2 %974  ;;  %s2866_s6 = sld [smem:[#allocation2 + $0x23]] }
 0x1b2   : > { %v835_v15 = vstv %s2699_s8  ;;  %v787_v0 = vadd.f32 %v785_v21, %v772_v54  ;;  %v815_v40 = vmul.f32 %v814_v2, %v810_v59  ;;  %v816_v28 = vmul.f32 %v814_v2, %v811_v30  ;;  %s2868_s8 = sld [smem:[#allocation2 + $0x54]] }
 0x1b3   : > { %v788_v25 = vadd.f32 %v786_v5, %v773_v22  ;;  %v823_v35 = vmul.f32 %v821_v57, %v3273_v47  ;;  %v822_v48 = vmul.f32 %v821_v57, %v3274_v11  ;;  %v836_v14 = vsel %vm431_vm3, %v834_v31, %v835_v15 }
 0x1b4   : > { %v802_v58 = vadd.f32 %v800_v7, %v787_v0  ;;  %vm3276_vm2 = vcmp.lt.s32.totalorder %v2272_v56, 16  ;;  %vm3278_vm0 = vcmp.lt.s32.totalorder %v2282_v44, 16  ;;  %v849_v5 = vstv %s1410_s3  ;;  %s2886_s3 = sld [smem:[#allocation2 + $0x24]] }
 0x1b5   : > { %v803_v60 = vadd.f32 %v801_v46, %v788_v25  ;;  %v832_v9 = vsel %vm3276_vm2, %v3275_v50, 0.0  ;;  %v833_v19 = vsel %vm3278_vm0, %v3277_v26, 0.0  ;;  %v850_v2 = vstv %s1459_s23  ;;  %s2894_s23 = sld [smem:[#allocation2 + $0x55]] }
 0x1b6   : > { %v817_v37 = vadd.f32 %v815_v40, %v802_v58  ;;  %v837_v27 = vmul.f32 %v836_v14, %v832_v9  ;;  %v838_v3 = vmul.f32 %v836_v14, %v833_v19  ;;  %v845_v59 = vsel %vm510_vm13, %v3279_v43, %v2684_v33 }
 0x1b7   : > { %v818_v10 = vadd.f32 %v816_v28, %v803_v60  ;;  %v908_v24 = vpop.permute.xlu0 %907  ;;  %v846_v38 = vsel %vm510_vm13, %v2684_v33, %v3279_v43  ;;  %v864_v22 = vstv %s1411_s24  ;;  %v865_v7 = vstv %s1460_s28  ;;  %s2914_s24 = sld [smem:[#allocation2 + $0x25]] }
 0x1b8   : > { %v824_v16 = vadd.f32 %v822_v48, %v817_v37  ;;  %v2752_v17 = vpop.permute.xlu1 %920  ;;  %v851_v46 = vsel %vm431_vm3, %v849_v5, %v850_v2  ;;  %v847_v57 = vsel %vm387_vm15, %v845_v59, 0.0  ;;  %vm3280_vm10 = vcmp.lt.s32.totalorder %v2407_v41, 16  ;;  %s2924_s28 = sld [smem:[#allocation2 + $0x56]] }
 0x1b9   : > { %v825_v8 = vadd.f32 %v823_v35, %v818_v10  ;;  %v2770_v32 = vpop.permute.xlu2 %1019  ;;  %v848_v33 = vsel %vm3280_vm10, %v846_v38, 0.0  ;;  %v860_v31 = vsel %vm530_vm5, %v2697_v18, %v2510_v63  ;;  %v861_v15 = vsel %vm530_vm5, %v2510_v63, %v2697_v18 }
 0x1ba   : > { %v839_v13 = vadd.f32 %v837_v27, %v824_v16  ;;  %v866_v0 = vsel %vm431_vm3, %v864_v22, %v865_v7  ;;  %v852_v25 = vmul.f32 %v851_v46, %v847_v57  ;;  %v853_v40 = vmul.f32 %v851_v46, %v848_v33 }
 0x1bb   : > { %v840_v21 = vadd.f32 %v838_v3, %v825_v8  ;;  %vm3281_vm1 = vcmp.lt.s32.totalorder %v2309_v36, 16  ;;  %vm3282_vm2 = vcmp.lt.s32.totalorder %v2312_v51, 16  ;;  %v898_v60 = vstv %s2754_s30  ;;  %s2934_s30 = sld [smem:[#allocation2 + $0x26]] }
 0x1bc   : > { %v862_v28 = vsel %vm3281_vm1, %v860_v31, 0.0  ;;  %v863_v58 = vsel %vm3282_vm2, %v861_v15, 0.0  ;;  %v899_v47 = vstv %s2756_s15  ;;  %v854_v63 = vadd.f32 %v852_v25, %v839_v13  ;;  %s2940_s15 = sld [smem:[#allocation2 + $0x57]] }
 0x1bd   : > { %v855_v18 = vadd.f32 %v853_v40, %v840_v21  ;;  %v894_v35 = vsel %vm422_vm6, %v2732_v20, %v893_v45  ;;  %v895_v11 = vsel %vm422_vm6, %v893_v45, %v2732_v20  ;;  %v867_v50 = vmul.f32 %v866_v0, %v862_v28 }
 0x1be   : > { %v868_v9 = vmul.f32 %v866_v0, %v863_v58  ;;  %v900_v26 = vsel %vm431_vm3, %v898_v60, %v899_v47  ;;  %v896_v19 = vsel %vm353_vm12, %v895_v11, 0.0  ;;  %v897_v20 = vsel %vm354_vm4, %v894_v35, 0.0 }
 0x1bf   : > { %v2766_v30 = vpop.permute.xlu0 %942  ;;  %v913_v45 = vstv %s2772_s4  ;;  %v914_v37 = vstv %s2780_s18  ;;  %v869_v27 = vadd.f32 %v867_v50, %v854_v63  ;;  %vm3283_vm0 = vcmp.lt.s32.totalorder %v1863_v39, 2  ;;  %s2952_s4 = sld [smem:[#allocation2 + $0x27]] }
 0x1c0   : > { %v2768_v54 = vpop.permute.xlu1 %944  ;;  %v870_v10 = vadd.f32 %v868_v9, %v855_v18  ;;  %v909_v3 = vsel %vm3283_vm0, %v2595_v42, %v908_v24  ;;  %vm3284_vm10 = vmmov %vm3283_vm0  ;;  %v901_v21 = vmul.f32 %v900_v26, %v896_v19  ;;  %v902_v13 = vmul.f32 %v900_v26, %v897_v20  ;;  %s2958_s18 = sld [smem:[#allocation2 + $0x58]] }
 0x1c1   : > { %v910_v8 = vsel %vm3284_vm10, %v908_v24, %v2595_v42  ;;  %v2828_v16 = vpop.permute.xlu2 %1036  ;;  %v928_v5 = vstv %s2792_s5  ;;  %v929_v2 = vstv %s2800_s29  ;;  %v915_v43 = vsel %vm431_vm3, %v913_v45, %v914_v37  ;;  %s2966_s5 = sld [smem:[#allocation2 + $0x28]] }
 0x1c2   : > { %v911_v42 = vsel %vm361_vm7, %v910_v8, 0.0  ;;  %v912_v24 = vsel %vm362_vm8, %v909_v3, 0.0  ;;  %v903_v59 = vadd.f32 %v901_v21, %v869_v27  ;;  %v904_v38 = vadd.f32 %v902_v13, %v870_v10  ;;  %v3288_v27 = vld [vmem:[#allocation22_spill] sm:$0xff]  ;;  %s2970_s29 = sld [smem:[#allocation2 + $0x59]] }
 0x1c3   : > { %v924_v22 = vsel %vm463_vm11, %v2752_v17, %v2655_v6  ;;  %v925_v7 = vsel %vm463_vm11, %v2655_v6, %v2752_v17  ;;  %v916_v33 = vmul.f32 %v915_v43, %v911_v42  ;;  %v917_v31 = vmul.f32 %v915_v43, %v912_v24 }
 0x1c4   : > { %v935_v15 = vstv %s2808_s19  ;;  %v936_v0 = vstv %s2814_s20  ;;  %v930_v25 = vsel %vm431_vm3, %v928_v5, %v929_v2  ;;  %v926_v6 = vsel %vm369_vm9, %v925_v7, 0.0  ;;  %s2979_s19 = sld [smem:[#allocation2 + $0x29]] }
 0x1c5   : > { %v927_v17 = vsel %vm370_vm14, %v924_v22, 0.0  ;;  %v918_v40 = vadd.f32 %v916_v33, %v903_v59  ;;  %v919_v28 = vadd.f32 %v917_v31, %v904_v38  ;;  %v937_v58 = vsel %vm431_vm3, %v935_v15, %v936_v0  ;;  %s2984_s20 = sld [smem:[#allocation2 + $0x5a]] }
 0x1c6   : > { %v931_v60 = vmul.f32 %v930_v25, %v926_v6  ;;  %v932_v47 = vmul.f32 %v930_v25, %v927_v17  ;;  %v950_v63 = vstv %s2830_s0  ;;  %v951_v18 = vstv %s2832_s1  ;;  %s2994_s0 = sld [smem:[#allocation2 + $0x2a]] }
 0x1c7   : > { %v960_v48 = vpop.permute.xlu0 %959  ;;  %vm3285_vm1 = vcmp.lt.s32.totalorder %v1863_v39, 127  ;;  %v965_v9 = vstv %s2835_s7  ;;  %v966_v26 = vstv %s2844_s14  ;;  %v939_v3 = vmul.f32 %v937_v58, %v3288_v27  ;;  %s2996_s1 = sld [smem:[#allocation2 + $0x5b]] }
 0x1c8   : > { %v2810_v14 = vpop.permute.xlu1 %972  ;;  %v946_v11 = vsel %vm3285_vm1, %v2766_v30, %v2768_v54  ;;  %vm3286_vm2 = vmmov %vm3285_vm1  ;;  %v933_v19 = vadd.f32 %v931_v60, %v918_v40  ;;  %v934_v20 = vadd.f32 %v932_v47, %v919_v28  ;;  %v961_v45 = vsel %vm510_vm13, %v2718_v34, %v960_v48  ;;  %s3006_s7 = sld [smem:[#allocation2 + $0x2b]] }
 0x1c9   : > { %v2874_v35 = vpop.permute.xlu2 %1071  ;;  %v947_v50 = vsel %vm3286_vm2, %v2768_v54, %v2766_v30  ;;  %v962_v37 = vsel %vm510_vm13, %v960_v48, %v2718_v34  ;;  %v3287_v54 = vld [vmem:[#allocation21_spill] sm:$0xff]  ;;  %v952_v21 = vsel %vm431_vm3, %v950_v63, %v951_v18  ;;  %vm3289_vm0 = vcmp.lt.s32.totalorder %v2272_v56, 16  ;;  %s3016_s14 = sld [smem:[#allocation2 + $0x5c]] }
 0x1ca   : > { %v938_v10 = vmul.f32 %v937_v58, %v3287_v54  ;;  %v948_v13 = vsel %vm3289_vm0, %v946_v11, 0.0  ;;  %vm3290_vm10 = vcmp.lt.s32.totalorder %v2282_v44, 16  ;;  %v980_v34 = vstv %s2854_s17  ;;  %s3034_s17 = sld [smem:[#allocation2 + $0x2c]] }
 0x1cb   : > { %v949_v5 = vsel %vm3290_vm10, %v947_v50, 0.0  ;;  %v981_v48 = vstv %s2858_s22  ;;  %v967_v2 = vsel %vm431_vm3, %v965_v9, %v966_v26  ;;  %v963_v43 = vsel %vm387_vm15, %v961_v45, 0.0  ;;  %s3042_s22 = sld [smem:[#allocation2 + $0x5d]] }
 0x1cc   : > { %vm3291_vm1 = vcmp.lt.s32.totalorder %v2407_v41, 16  ;;  %v941_v24 = vadd.f32 %v939_v3, %v934_v20  ;;  %v940_v59 = vadd.f32 %v938_v10, %v933_v19  ;;  %v1012_v38 = vstv %s2866_s6  ;;  %s3050_s6 = sld [smem:[#allocation2 + $0x2d]] }
 0x1cd   : > { %v964_v42 = vsel %vm3291_vm1, %v962_v37, 0.0  ;;  %v1013_v22 = vstv %s2868_s8  ;;  %v953_v7 = vmul.f32 %v952_v21, %v948_v13  ;;  %v954_v33 = vmul.f32 %v952_v21, %v949_v5  ;;  %s3060_s8 = sld [smem:[#allocation2 + $0x5e]] }
 0x1ce   : > { %v976_v31 = vsel %vm530_vm5, %v2810_v14, %v2750_v23  ;;  %v977_v15 = vsel %vm530_vm5, %v2750_v23, %v2810_v14  ;;  %v968_v0 = vmul.f32 %v967_v2, %v963_v43  ;;  %v969_v25 = vmul.f32 %v967_v2, %v964_v42 }
 0x1cf   : > { %v1005_v46 = vpop.permute.xlu0 %1004  ;;  %v982_v6 = vsel %vm431_vm3, %v980_v34, %v981_v48  ;;  %v1014_v17 = vsel %vm431_vm3, %v1012_v38, %v1013_v22  ;;  %v955_v58 = vadd.f32 %v953_v7, %v940_v59  ;;  %v956_v23 = vadd.f32 %v954_v33, %v941_v24 }
 0x1d0   : > { %v1007_v57 = vpop.permute.xlu1 %1006  ;;  %v1027_v60 = vstv %s2886_s3  ;;  %v1028_v47 = vstv %s2894_s23  ;;  %vm3292_vm2 = vcmp.lt.s32.totalorder %v2309_v36, 16  ;;  %vm3293_vm0 = vcmp.lt.s32.totalorder %v2312_v51, 16  ;;  %s3066_s3 = sld [smem:[#allocation2 + $0x2e]] }
 0x1d1   : > { %v1008_v40 = vsel %vm422_vm6, %v1005_v46, %v1007_v57  ;;  %v1009_v28 = vsel %vm422_vm6, %v1007_v57, %v1005_v46  ;;  %v2936_v14 = vpop.permute.xlu2 %1088  ;;  %v978_v18 = vsel %vm3292_vm2, %v976_v31, 0.0  ;;  %v979_v11 = vsel %vm3293_vm0, %v977_v15, 0.0  ;;  %s3076_s23 = sld [smem:[#allocation2 + $0x5f]] }
 0x1d2   : > { %vm3294_vm10 = vcmp.lt.s32.totalorder %v1863_v39, 2  ;;  %v970_v9 = vadd.f32 %v968_v0, %v955_v58  ;;  %v971_v26 = vadd.f32 %v969_v25, %v956_v23  ;;  %v1010_v19 = vsel %vm353_vm12, %v1009_v28, 0.0 }
 0x1d3   : > { %vm3295_vm1 = vmmov %vm3294_vm10  ;;  %v1011_v20 = vsel %vm354_vm4, %v1008_v40, 0.0  ;;  %v1029_v45 = vsel %vm431_vm3, %v1027_v60, %v1028_v47  ;;  %v983_v37 = vmul.f32 %v982_v6, %v978_v18  ;;  %v1015_v10 = vmul.f32 %v1014_v17, %v1010_v19 }
 0x1d4   : > { %v1016_v27 = vmul.f32 %v1014_v17, %v1011_v20  ;;  %v1042_v13 = vstv %s2914_s24  ;;  %v1043_v5 = vstv %s2924_s28  ;;  %v1049_v42 = vstv %s2934_s30  ;;  %s3082_s24 = sld [smem:[#allocation2 + $0x30]] }
 0x1d5   : > { %v985_v21 = vadd.f32 %v983_v37, %v970_v9  ;;  %v1044_v22 = vsel %vm431_vm3, %v1042_v13, %v1043_v5  ;;  %v1050_v7 = vstv %s2940_s15  ;;  %v1064_v15 = vstv %s2952_s4  ;;  %s3086_s28 = sld [smem:[#allocation2 + $0x61]]  ;;  %s1490_s4 = sshll.u32 %s1734_s13, 3 }
 0x1d6   : > { %v1065_v0 = vstv %s2958_s18  ;;  %vm3296_vm2 = vcmp.lt.s32.totalorder %v1863_v39, 127  ;;  %v1051_v23 = vsel %vm431_vm3, %v1049_v42, %v1050_v7  ;;  %v1079_v47 = vstv %s2966_s5  ;;  %s3092_s30 = sld [smem:[#allocation2 + $0x2f]]  ;;  %s3316_s13 = sshll.u32 %s1810_s27, 3 }
 0x1d7   : > { %v1022_v30 = vpop.permute.xlu0 %1021  ;;  %v1017_v59 = vadd.f32 %v1015_v10, %v985_v21  ;;  %vm3297_vm0 = vmmov %vm3296_vm2  ;;  %v1066_v60 = vsel %vm431_vm3, %v1064_v15, %v1065_v0  ;;  %v1080_v18 = vstv %s2970_s29  ;;  %v1095_v21 = vstv %s2984_s20  ;;  %s3094_s15 = sld [smem:[#allocation2 + $0x60]]  ;;  %s1287_s29 = scalar_lea.hbm %s3189_s2, %s1490_s4 }
 0x1d8   : > { %v1035_v8 = vpop.permute.xlu1 %1034  ;;  %v1023_v46 = vsel %vm3294_vm10, %v2770_v32, %v1022_v30  ;;  %v1024_v57 = vsel %vm3295_vm1, %v1022_v30, %v2770_v32  ;;  %v984_v32 = vmul.f32 %v982_v6, %v979_v11  ;;  %vm3298_vm10 = vcmp.lt.s32.totalorder %v2272_v56, 16 }
 0x1d9   : > { %v1025_v30 = vsel %vm361_vm7, %v1024_v57, 0.0  ;;  %v1026_v54 = vsel %vm362_vm8, %v1023_v46, 0.0  ;;  %v1038_v34 = vsel %vm463_vm11, %v1035_v8, %v2828_v16  ;;  %v1039_v48 = vsel %vm463_vm11, %v2828_v16, %v1035_v8  ;;  %v2990_v8 = vpop.permute.xlu2 %1133 }
 0x1da   : > { %v986_v3 = vadd.f32 %v984_v32, %v971_v26  ;;  %v1030_v2 = vmul.f32 %v1029_v45, %v1025_v30  ;;  %v1031_v43 = vmul.f32 %v1029_v45, %v1026_v54  ;;  %v1040_v31 = vsel %vm369_vm9, %v1039_v48, 0.0  ;;  %v3300_v26 = vld [vmem:[#allocation23_spill] sm:$0xff]  ;;  %v3301_v45 = vld [vmem:[#allocation24_spill] sm:$0xff] }
 0x1db   : > { %v1041_v16 = vsel %vm370_vm14, %v1038_v34, 0.0  ;;  %v1045_v28 = vmul.f32 %v1044_v22, %v1040_v31  ;;  %vm3299_vm1 = vcmp.lt.s32.totalorder %v2282_v44, 16  ;;  %v1052_v19 = vmul.f32 %v1051_v23, %v3300_v26 }
 0x1dc   : > { %v1018_v38 = vadd.f32 %v1016_v27, %v986_v3  ;;  %v1032_v25 = vadd.f32 %v1030_v2, %v1017_v59  ;;  %v1046_v58 = vmul.f32 %v1044_v22, %v1041_v16  ;;  %v1053_v37 = vmul.f32 %v1051_v23, %v3301_v45 }
 0x1dd   : > { %v1094_v3 = vstv %s2979_s19  ;;  %v1126_v34 = vstv %s2994_s0  ;;  %v1127_v48 = vstv %s2996_s1  ;;  %v1141_v16 = vstv %s3006_s7  ;;  %s175_s19 = scalar_lea.vmem [#allocation7], %s3316_s13  ;;  %s1291_s0 = sshll.u32 %s1287_s29, 4  ;;  %s1292_s0 = int_to_ptr.hbm [resolvable:$true] %s1291_s0 }
 0x1de   : > { %v1033_v6 = vadd.f32 %v1031_v43, %v1018_v38  ;;  %v1047_v46 = vadd.f32 %v1045_v28, %v1032_v25  ;;  %v1142_v15 = vstv %s3016_s14  ;;  %v1096_v0 = vsel %vm431_vm3, %v1094_v3, %v1095_v21  ;;  %s1289_s20 = sshll.u32 %s175_s19, 4  ;;  %s1276_s1 = scalar_lea.sflag [#allocation4], %s1810_s27  ;;  %s1290_s20 = int_to_ptr.vmem [resolvable:$true] %s1289_s20 }
 0x1df   : > { %v1057_v63 = vpop.permute.xlu0 %1056  ;;  %v1128_v25 = vsel %vm431_vm3, %v1126_v34, %v1127_v48  ;;  %v1156_v26 = vstv %s3034_s17  ;;  %v1179_v34 = vstv %s3076_s23  ;;  %s1627_s7 = sshra.s32 %s1292_s0, 4  ;;  %s1628_s7 = int_to_ptr.hbm [resolvable:$true] %s1627_s7 }
 0x1e0   : > { %v1059_v50 = vpop.permute.xlu1 %1058  ;;  %v1048_v57 = vadd.f32 %v1046_v58, %v1033_v6  ;;  %v1054_v5 = vadd.f32 %v1052_v19, %v1047_v46  ;;  %s1629_s14 = scalar_lea.hbm %s1628_s7, 8  ;;  %p1634_p9 = scmp.lt.s32.totalorder %s1628_s7, %s3189_s2 }
 0x1e1   : > { %v1060_v17 = vsel %vm3296_vm2, %v1057_v63, %v1059_v50  ;;  %v1061_v40 = vsel %vm3297_vm0, %v1059_v50, %v1057_v63  ;;  %vm3302_vm2 = vcmp.lt.s32.totalorder %v2407_v41, 16  ;;  %v1151_v2 = vpop.permute.xlu2 %1150  ;;  %vm3303_vm0 = vcmp.lt.s32.totalorder %v2309_v36, 16  ;;  %p1630_p1 = scmp.ne.s32.totalorder %s1628_s7, %s1629_s14 }
 0x1e2   : > { %v1062_v50 = vsel %vm3298_vm10, %v1060_v17, 0.0  ;;  %v1063_v9 = vsel %vm3299_vm1, %v1061_v40, 0.0  ;;  %v1055_v13 = vadd.f32 %v1053_v37, %v1048_v57  ;;  %vm3304_vm10 = vcmp.lt.s32.totalorder %v2312_v51, 16 }
 0x1e3   : > { %v1067_v10 = vmul.f32 %v1066_v60, %v1062_v50  ;;  %v1068_v27 = vmul.f32 %v1066_v60, %v1063_v9  ;;  %v1143_v60 = vsel %vm431_vm3, %v1141_v16, %v1142_v15  ;;  %v1209_v16 = vstv %s3086_s28  ;;  %p1631_p4 = pnand %p1630_p1, %p1779_p3 }
 0x1e4   : > { %v1193_v15 = vstv %s3092_s30 }
 0x1e5   : > { %v1069_v7 = vadd.f32 %v1067_v10, %v1054_v5  ;;  %v1070_v31 = vadd.f32 %v1068_v27, %v1055_v13  ;;  %v1164_v27 = vstv %s3060_s8  ;;  %v1178_v5 = vstv %s3066_s3  ;;  %p1632_p8 = pneg %p1631_p4 }
 0x1e7   : > { %v1074_v24 = vpop.permute.xlu0 %1073 }
 0x1e8   : > { %v1087_v33 = vpop.permute.xlu1 %1086  ;;  %v1075_v11 = vsel %vm510_vm13, %v2874_v35, %v1074_v24  ;;  %v1076_v63 = vsel %vm510_vm13, %v1074_v24, %v2874_v35  ;;  %v1081_v35 = vsel %vm431_vm3, %v1079_v47, %v1080_v18 }
 0x1e9   : > { %v1077_v32 = vsel %vm387_vm15, %v1075_v11, 0.0  ;;  %v1078_v30 = vsel %vm3302_vm2, %v1076_v63, 0.0  ;;  %v1090_v43 = vsel %vm530_vm5, %v1087_v33, %v2936_v14  ;;  %v1091_v42 = vsel %vm530_vm5, %v2936_v14, %v1087_v33  ;;  %v1186_v45 = vpop.permute.xlu2 %1185 }
 0x1ea   : > { %v1082_v24 = vmul.f32 %v1081_v35, %v1077_v32  ;;  %v1083_v59 = vmul.f32 %v1081_v35, %v1078_v30  ;;  %v1092_v14 = vsel %vm3303_vm0, %v1090_v43, 0.0  ;;  %v1093_v33 = vsel %vm3304_vm10, %v1091_v42, 0.0 }
 0x1eb   : > { %v1097_v55 = vmul.f32 %v1096_v0, %v1092_v14  ;;  %v1098_v18 = vmul.f32 %v1096_v0, %v1093_v33  ;;  %v1163_v32 = vstv %s3050_s6  ;;  %v1194_v0 = vstv %s3094_s15  ;;  %s1633_s6 = scalar_lea.hbm %s3189_s2, 16 }
 0x1ec   : > { %v1084_v6 = vadd.f32 %v1082_v24, %v1069_v7  ;;  %v1085_v17 = vadd.f32 %v1083_v59, %v1070_v31  ;;  %v1165_v42 = vsel %vm431_vm3, %v1163_v32, %v1164_v27  ;;  %v1180_v24 = vsel %vm431_vm3, %v1178_v5, %v1179_v34  ;;  %p1635_p10 = scmp.lt.s32.totalorder %s1633_s6, %s1629_s14 }
 0x1ed   : > { %v1208_v31 = vstv %s3082_s24  ;;  %v1166_v14 = vmul.f32 %v1165_v42, %v1960_v1  ;;  %v1167_v33 = vmul.f32 %v1165_v42, %v1962_v4 }
 0x1ee   : > { %v1100_v50 = vadd.f32 %v1098_v18, %v1085_v17  ;;  %v1099_v9 = vadd.f32 %v1097_v55, %v1084_v6  ;;  %p1636_p2 = por %p1635_p10, %p1634_p9 }
 0x1ef   : > { %v1119_v20 = vpop.permute.xlu0 %1118 }
 0x1f0   : > { %v1121_v54 = vpop.permute.xlu1 %1120  ;;  %p1637_p11 = pnand %p1636_p2, %p1632_p8 }
 0x1f1   : > { %v1122_v38 = vsel %vm422_vm6, %v1119_v20, %v1121_v54  ;;  %v1123_v22 = vsel %vm422_vm6, %v1121_v54, %v1119_v20  ;;  %vm3305_vm6 = vcmp.lt.s32.totalorder %v1863_v39, 2 }
 0x1f2   : > { %v1124_v40 = vsel %vm353_vm12, %v1123_v22, 0.0  ;;  %v1125_v28 = vsel %vm354_vm4, %v1122_v38, 0.0  ;;  %vm3306_vm1 = vmmov %vm3305_vm6 }
 0x1f3   : > { %v1129_v46 = vmul.f32 %v1128_v25, %v1124_v40  ;;  %v1130_v57 = vmul.f32 %v1128_v25, %v1125_v28  ;;  %v1203_v25 = vpop.permute.xlu2 %1202  ;;  %vm3312_vm12 = vmmov %vm3304_vm10 }
 0x1f5   : > { %v1131_v37 = vadd.f32 %v1129_v46, %v1099_v9  ;;  %v1132_v35 = vadd.f32 %v1130_v57, %v1100_v50 }
 0x1f7   : > { %v1136_v58 = vpop.permute.xlu0 %1135 }
 0x1f8   : > { %v1149_v23 = vpop.permute.xlu1 %1148  ;;  %v1137_v47 = vsel %vm3305_vm6, %v2990_v8, %v1136_v58  ;;  %v1138_v12 = vsel %vm3306_vm1, %v1136_v58, %v2990_v8  ;;  %v1157_v8 = vstv %s3042_s22 }
 0x1f9   : > { %v1139_v11 = vsel %vm361_vm7, %v1138_v12, 0.0  ;;  %v1140_v63 = vsel %vm362_vm8, %v1137_v47, 0.0  ;;  %v1152_v19 = vsel %vm463_vm11, %v1149_v23, %v1151_v2  ;;  %v1153_v52 = vsel %vm463_vm11, %v1151_v2, %v1149_v23 }
 0x1fa   : > { %v1144_v53 = vmul.f32 %v1143_v60, %v1139_v11  ;;  %v1145_v20 = vmul.f32 %v1143_v60, %v1140_v63  ;;  %v1158_v30 = vsel %vm431_vm3, %v1156_v26, %v1157_v8  ;;  %v1154_v54 = vsel %vm369_vm9, %v1153_v52, 0.0  ;;  %vm3311_vm9 = vmmov %vm3303_vm0 }
 0x1fb   : > { %v1155_v10 = vsel %vm370_vm14, %v1152_v19, 0.0  ;;  %vm3307_vm11 = vcmp.lt.s32.totalorder %v1863_v39, 127  ;;  %v1159_v43 = vmul.f32 %v1158_v30, %v1154_v54  ;;  %vm3309_vm7 = vcmp.lt.s32.totalorder %v2272_v56, 16 }
 0x1fc   : > { %v1146_v3 = vadd.f32 %v1144_v53, %v1131_v37  ;;  %v1147_v21 = vadd.f32 %v1145_v20, %v1132_v35  ;;  %vm3308_vm4 = vmmov %vm3307_vm11  ;;  %v1160_v62 = vmul.f32 %v1158_v30, %v1155_v10  ;;  %vm3310_vm8 = vcmp.lt.s32.totalorder %v2282_v44, 16 }
 0x1fd   : > { %v1210_v56 = vsel %vm431_vm3, %v1208_v31, %v1209_v16  ;;  %v1195_v44 = vsel %vm431_vm3, %v1193_v15, %v1194_v0  ;;  %vm3313_vm3 = vmmov %vm3302_vm2 }
 0x1fe   : > { %v1161_v59 = vadd.f32 %v1159_v43, %v1146_v3  ;;  %v1162_v38 = vadd.f32 %v1160_v62, %v1147_v21 }
 0x200   : > { %v1173_v13 = vpop.permute.xlu1 %1172  ;;  %v1171_v48 = vpop.permute.xlu0 %1170  ;;  %v1169_v40 = vadd.f32 %v1167_v33, %v1162_v38  ;;  %v1168_v28 = vadd.f32 %v1166_v14, %v1161_v59 }
 0x201   : > { %v1174_v2 = vsel %vm3307_vm11, %v1171_v48, %v1173_v13  ;;  %v1175_v61 = vsel %vm3308_vm4, %v1173_v13, %v1171_v48  ;;  %vm3317_vm11 = vcmask 1043456  }
 0x202   : > { %v1176_v22 = vsel %vm3309_vm7, %v1174_v2, 0.0  ;;  %v1177_v7 = vsel %vm3310_vm8, %v1175_v61, 0.0 }
 0x203   : > { %v1181_v6 = vmul.f32 %v1180_v24, %v1176_v22  ;;  %v1182_v17 = vmul.f32 %v1180_v24, %v1177_v7 }
 0x205   : > { %v1183_v11 = vadd.f32 %v1181_v6, %v1168_v28  ;;  %v1184_v63 = vadd.f32 %v1182_v17, %v1169_v40 }
 0x208   : > { %v1201_v58 = vpop.permute.xlu1 %1200  ;;  %v1188_v23 = vpop.permute.xlu0 %1187 }
 0x209   : > { %v1204_v60 = vsel %vm530_vm5, %v1201_v58, %v1203_v25  ;;  %v1205_v1 = vsel %vm530_vm5, %v1203_v25, %v1201_v58  ;;  %v1189_v4 = vsel %vm510_vm13, %v1186_v45, %v1188_v23  ;;  %v1190_v47 = vsel %vm510_vm13, %v1188_v23, %v1186_v45  ;;  %v3318_v58 = vld [vmem:[#allocation11_spill] sm:$0xff] }
 0x20a   : > { %v1206_v12 = vsel %vm3311_vm9, %v1204_v60, 0.0  ;;  %v1207_v49 = vsel %vm3312_vm12, %v1205_v1, 0.0  ;;  %v1191_v55 = vsel %vm387_vm15, %v1189_v4, 0.0  ;;  %v1192_v18 = vsel %vm3313_vm3, %v1190_v47, 0.0 }
 0x20b   : > { %v1196_v46 = vmul.f32 %v1195_v44, %v1191_v55  ;;  %v1197_v57 = vmul.f32 %v1195_v44, %v1192_v18  ;;  %v1211_v50 = vmul.f32 %v1210_v56, %v1206_v12  ;;  %v1212_v9 = vmul.f32 %v1210_v56, %v1207_v49 }
 0x20c   : > { %vm1215_vm13 = vcmask 1041408  }
 0x20d   : > { %v1198_v39 = vadd.f32 %v1196_v46, %v1183_v11  ;;  %v1199_v26 = vadd.f32 %v1197_v57, %v1184_v63 }
 0x20f   : > { %v1213_v36 = vadd.f32 %v1211_v50, %v1198_v39  ;;  %v1214_v8 = vadd.f32 %v1212_v9, %v1199_v26 }
 0x211   : > { %v1216_v19 = vsel %vm1215_vm13, %v1213_v36, 0.0  ;;  %v1223_v51 = vsel %vm1215_vm13, %v1214_v8, 0.0 }
 0x212   : > { %v1217_v52 = vrot.slane %v1216_v19, 4  ;;  %v1224_v53 = vrot.slane %v1223_v51, 4 }
 0x214   : > { %v1218_v29 = vadd.f32 %v1217_v52, %v1216_v19  ;;  %v1225_v20 = vadd.f32 %v1224_v53, %v1223_v51 }
 0x216   : > { %v1219_v45 = vrot.slane %v1218_v29, 2  ;;  %v1226_v41 = vrot.slane %v1225_v20, 2 }
 0x218   : > { %v1220_v37 = vadd.f32 %v1219_v45, %v1218_v29  ;;  %v1227_v35 = vadd.f32 %v1226_v41, %v1225_v20 }
 0x21a   : > { %v1221_v32 = vrot.slane %v1220_v37, 1  ;;  %v1228_v30 = vrot.slane %v1227_v35, 1 }
 0x21c   : > { %v1222_v54 = vadd.f32 %v1221_v32, %v1220_v37  ;;  %v1229_v10 = vadd.f32 %v1228_v30, %v1227_v35 }
 0x21e   : > { %v1482_v27 = vmul.f32 -1.442695, %v1222_v54  ;;  %v1483_v3 = vmul.f32 -1.442695, %v1229_v10 }
 0x220   : > { %1560 = vpow2.f32 %v1482_v27 }
 0x221   : > { %1562 = vpow2.f32 %v1483_v3 }
 0x226   : > { %v1561_v21 = vpop.eup %1560 }
 0x227   : > { %v1563_v13 = vpop.eup %1562  ;;  %v1236_v5 = vadd.f32 1.0, %v1561_v21 }
 0x228   : > { %v1237_v34 = vadd.f32 1.0, %v1563_v13 }
 0x229   : > { %1564 = vrcp.f32 %v1236_v5  ;;  %vm1243_vm15 = vweird.f32 %v1236_v5  ;;  %v1249_v31 = vand.u32 2147483648, %v1236_v5  ;;  %v1247_v15 = vand.u32 2147483647, %v1236_v5 }
 0x22a   : > { %1566 = vrcp.f32 %v1237_v34  ;;  %v1264_v59 = vand.u32 2147483648, %v1237_v34  ;;  %v1262_v22 = vand.u32 2147483647, %v1237_v34  ;;  %vm1258_vm0 = vweird.f32 %v1237_v34 }
 0x22b   : > { %v1250_v6 = vor.u32 1.1754944e-38, %v1249_v31  ;;  %vm1248_vm1 = vcmp.eq.f32.partialorder %v1247_v15, 8.507059e+37 }
 0x22c   : > { %v1265_v14 = vor.u32 1.1754944e-38, %v1264_v59  ;;  %vm1263_vm6 = vcmp.eq.f32.partialorder %v1262_v22, 8.507059e+37 }
 0x22f   : > { %v1565_v48 = vpop.eup %1564 }
 0x230   : > { %v1567_v2 = vpop.eup %1566  ;;  %v1239_v61 = vmul.f32 %v1565_v48, %v1236_v5  ;;  %vm1244_vm5 = vweird.f32 %v1565_v48 }
 0x231   : > { %v1254_v43 = vmul.f32 %v1567_v2, %v1237_v34  ;;  %vm1259_vm14 = vweird.f32 %v1567_v2  ;;  %vm3145_vm2 = vmor %vm1243_vm15, %vm1244_vm5 }
 0x232   : > { %v1240_v62 = vsub.f32 1.0, %v1239_v61  ;;  %vm1260_vm10 = vmor %vm1258_vm0, %vm1259_vm14 }
 0x233   : > { %v1255_v42 = vsub.f32 1.0, %v1254_v43 }
 0x234   : > { %v1241_v24 = vmul.f32 %v1565_v48, %v1240_v62 }
 0x235   : > { %v1256_v38 = vmul.f32 %v1567_v2, %v1255_v42 }
 0x236   : > { %v1242_v7 = vadd.f32 %v1565_v48, %v1241_v24 }
 0x237   : > { %v1257_v0 = vadd.f32 %v1567_v2, %v1256_v38 }
 0x238   : > { %v1246_v33 = vsel %vm3145_vm2, %v1565_v48, %v1242_v7 }
 0x239   : > { %v1261_v25 = vsel %vm1260_vm10, %v1567_v2, %v1257_v0  ;;  %v1251_v28 = vsel %vm1248_vm1, %v1250_v6, %v1246_v33 }
 0x23a   : > { %v1266_v17 = vsel %vm1263_vm6, %v1265_v14, %v1261_v25 }
 0x23b   : > { %v1270_v40 = vrot.slane %v1266_v17, 4 }
 0x23d   : > { %v1271_v56 = vsel %vm3317_vm11, %v1251_v28, %v1270_v40 }
 0x23e   : > { %v1273_v44 = vmul.f32 %v1271_v56, %v3318_v58 }
 0x240   : > { %1274 = vst [vmem:[%s175_s19] sm:$0xff] %v1273_v44 }
 0x241   : > { %1640 = shalt.err (!%p1637_p11)
}
 0x242   : > { %1497 = dma.vmem_to_hbm [thread:$0]  (%p1779_p3), %s1290_s20, 128, %s1292_s0, %s1276_s1  }
 0x243 PF: > { %s1303_s27 = sand.u32 1, %s1671_s9   ;;  %p3319_p12 = scmp.ge.s32.totalorder %s1683_s12, 2 }
 0x244   : > { %s1304_s23 = scalar_lea.sflag [#allocation4], %s1303_s27 }
 0x245   : > { %p1508_p13 = pnand %p3319_p12, %p1748_p6 }
 0x247   : > { %p1509_p0 = pneg %p1508_p13 }
 0x249   : > { %1666 = dma.done.wait (%p1509_p0), %s1304_s23, 128  }
 0x24a   : > { %1668 = vsyncadd (%p1509_p0), %s1304_s23, 4294967168  ;;  %p16_p5 = scmp.ge.s32.totalorder %s1764_s21, 4   ;;  %s3320_s9 = smov %s1675_s10 }
 0x24b   : > { %s3321_s10 = smov %s1679_s11  ;;  %s3322_s11 = smov %s1774_s25 }
 0x24c   : > { %s3323_s12 = smov %s1764_s21  ;;  %18 = sbr.rel (!%p16_p5) target bundleno = 9 (0x9), region = 78 }
 0x251   :  { %1310 = vsyncpa [#allocation3], 1 }
 0x252   :  { %1312 = vsyncpa [#allocation3 + $0x1], 1 }
 0x253   :  { %1313 = vsyncpa [#allocation4], 1 }
 0x254   :  { %1315 = vsyncpa [#allocation4 + $0x1], 1 }
 0x255   :  { %1316 = vsyncpa [#allocation5], 1 }
 0x256   :  { %1318 = vsyncpa [#allocation5 + $0x1], 1 }

</bundles_post_ra>
